<compile_context>
chip_gen: v7x
topology: tpu7x:2x2x1
jax: 0.10.0
libtpu: 0.0.40
codegen_flags: <defaults>
</compile_context>

<pallas_src>
import math
import jax
import jax.numpy as jnp
from jax.experimental import pallas as pl
from jax.experimental.pallas import tpu as pltpu


def _im2col(slice_fn, H, W, C):
    """Build the (H*W, 9*C) im2col matrix from 9 shifted (H, W, C) windows.

    Column ordering is (dy, dx, c_in), matching w.reshape(9*C, C) of an
    HWIO (3, 3, C_in, C_out) weight tensor.
    """
    cols = [slice_fn(dy, dx) for dy in range(3) for dx in range(3)]
    patches = jnp.concatenate(cols, axis=-1)          # (H, W, 9C)
    return patches.reshape(H * W, 9 * C)


def resblock_fused_kernel(xp_ref, w1_ref, b1_ref, w2_ref, b2_ref, o_ref, yp_ref):
    # xp_ref: (1, H+2, W+2, C)  zero-padded input tile (also supplies residual)
    # w1_ref: (9C, C)           conv1 weights, im2col layout
    # b1_ref: (1, C)            conv1 bias
    # w2_ref: (9C, C)           conv2 weights, im2col layout
    # b2_ref: (1, C)            conv2 bias
    # o_ref : (1, H, W, C)      output tile:  x + conv2(lrelu(conv1(x)+b1)) + b2
    # yp_ref: (H+2, W+2, C) f32 VMEM scratch for the zero-haloed intermediate
    _, H, W, C = o_ref.shape

    # ---- conv1: single im2col matmul + bias + LeakyReLU(0.2) ----
    p1 = _im2col(lambda dy, dx: xp_ref[0, dy:dy + H, dx:dx + W, :], H, W, C)
    a1 = jnp.dot(p1, w1_ref[...], preferred_element_type=jnp.float32)
    a1 = a1 + b1_ref[...]
    y = jnp.where(a1 >= 0, a1, 0.2 * a1)

    # ---- stage intermediate in VMEM with a zero halo (SAME padding), no HBM ----
    yp_ref[...] = jnp.zeros_like(yp_ref)
    yp_ref[1:H + 1, 1:W + 1, :] = y.reshape(H, W, C).astype(yp_ref.dtype)

    # ---- conv2: single im2col matmul + bias + residual add ----
    p2 = _im2col(lambda dy, dx: yp_ref[dy:dy + H, dx:dx + W, :], H, W, C)
    a2 = jnp.dot(p2, w2_ref[...], preferred_element_type=jnp.float32)
    a2 = a2 + b2_ref[...]

    res = xp_ref[0, 1:1 + H, 1:1 + W, :].reshape(H * W, C).astype(jnp.float32)
    o_ref[...] = (res + a2).reshape(1, H, W, C).astype(o_ref.dtype)


def residual_block_no_bn(x_nchw, w1, b1, w2, b2):
    """x_nchw: (N, C, H, W) float32.  w*: (3,3,C,C) HWIO, b*: (C,)."""
    N, C, H, W = x_nchw.shape
    x = jnp.transpose(x_nchw, (0, 2, 3, 1))                   # NCHW -> NHWC
    xp = jnp.pad(x, ((0, 0), (1, 1), (1, 1), (0, 0)))         # only pad of the block
    w1m = w1.reshape(9 * C, C)                                 # (dy, dx, cin) -> rows
    w2m = w2.reshape(9 * C, C)
    b1r = b1.reshape(1, C)
    b2r = b2.reshape(1, C)

    pad_spec = pl.BlockSpec((1, H + 2, W + 2, C), lambda n: (n, 0, 0, 0))
    out_spec = pl.BlockSpec((1, H, W, C), lambda n: (n, 0, 0, 0))
    w_spec = pl.BlockSpec((9 * C, C), lambda n: (0, 0))
    b_spec = pl.BlockSpec((1, C), lambda n: (0, 0))

    out = pl.pallas_call(
        resblock_fused_kernel,
        out_shape=jax.ShapeDtypeStruct((N, H, W, C), x.dtype),
        grid_spec=pltpu.PrefetchScalarGridSpec(
            num_scalar_prefetch=0,
            grid=(N,),
            in_specs=[pad_spec, w_spec, b_spec, w_spec, b_spec],
            out_specs=out_spec,
            scratch_shapes=[pltpu.VMEM((H + 2, W + 2, C), jnp.float32)],
        ),
        compiler_params=pltpu.CompilerParams(
            dimension_semantics=("parallel",),
            vmem_limit_bytes=32 * 1024 * 1024,
        ),
    )(xp, w1m, b1r, w2m, b2r)

    return jnp.transpose(out, (0, 3, 1, 2))                    # NHWC -> NCHW


# ----- pure-JAX reference (for correctness check) -----
def _ref_conv(x_nhwc, w_hwio, b):
    y = jax.lax.conv_general_dilated(
        x_nhwc, w_hwio, window_strides=(1, 1), padding="SAME",
        dimension_numbers=("NHWC", "HWIO", "NHWC"))
    return y + b


def residual_block_ref(x_nchw, w1, b1, w2, b2):
    x = jnp.transpose(x_nchw, (0, 2, 3, 1))
    y = _ref_conv(x, w1, b1)
    y = jnp.where(y >= 0, y, 0.2 * y)
    y = _ref_conv(y, w2, b2)
    return jnp.transpose(x + y, (0, 3, 1, 2))


if __name__ == "__main__":
    # Module default nf=64 channels, small spatial extent.
    N, nf, H, W = 2, 64, 16, 16

    key = jax.random.PRNGKey(0)
    k_x, k_w1, k_w2, k_b1, k_b2 = jax.random.split(key, 5)

    # Xavier-normal weights scaled by 0.1 (as in initialize_weights_xavier),
    # small random biases to exercise the bias path. HWIO = (3, 3, C_in, C_out).
    fan = nf * 3 * 3
    xavier_std = math.sqrt(2.0 / (fan + fan))
    w1 = jax.random.normal(k_w1, (3, 3, nf, nf), jnp.float32) * xavier_std * 0.1
    w2 = jax.random.normal(k_w2, (3, 3, nf, nf), jnp.float32) * xavier_std * 0.1
    b1 = jax.random.normal(k_b1, (nf,), jnp.float32) * 0.01
    b2 = jax.random.normal(k_b2, (nf,), jnp.float32) * 0.01

    x = jax.random.normal(k_x, (N, nf, H, W), jnp.float32)     # NCHW like PyTorch

    fwd = jax.jit(residual_block_no_bn)
    out = jax.block_until_ready(fwd(x, w1, b1, w2, b2))
    ref = jax.block_until_ready(residual_block_ref(x, w1, b1, w2, b2))

    assert out.shape == (N, nf, H, W)
    err = float(jnp.max(jnp.abs(out - ref)))
    assert err < 2e-3, f"mismatch vs JAX reference: max abs err = {err}"
    print("KERNEL_OK")
</pallas_src>

<mosaic_0001>
module attributes {stable_mosaic.version = 11 : i64} {
  func.func @resblock_fused_kernel(%arg0: i32, %arg1: memref<1x18x18x64xf32, #tpu.memory_space<vmem>>, %arg2: memref<576x64xf32, #tpu.memory_space<vmem>>, %arg3: memref<1x64xf32, #tpu.memory_space<vmem>>, %arg4: memref<576x64xf32, #tpu.memory_space<vmem>>, %arg5: memref<1x64xf32, #tpu.memory_space<vmem>>, %arg6: memref<1x16x16x64xf32, #tpu.memory_space<vmem>>, %arg7: memref<18x18x64xf32, #tpu.memory_space<vmem>>) attributes {dimension_semantics = [#tpu.dimension_semantics<parallel>], iteration_bounds = array<i64: 2>, scalar_prefetch = 0 : i64, scratch_operands = 1 : i64, tpu.core_type = #tpu.core_type<tc>, window_params = [{transform_indices = @transform_0, window_bounds = array<i64: 1, 18, 18, 64>}, {pipeline_mode = #tpu.pipeline_mode<synchronous>, transform_indices = @transform_1, window_bounds = array<i64: 576, 64>}, {pipeline_mode = #tpu.pipeline_mode<synchronous>, transform_indices = @transform_2, window_bounds = array<i64: 1, 64>}, {pipeline_mode = #tpu.pipeline_mode<synchronous>, transform_indices = @transform_3, window_bounds = array<i64: 576, 64>}, {pipeline_mode = #tpu.pipeline_mode<synchronous>, transform_indices = @transform_4, window_bounds = array<i64: 1, 64>}, {transform_indices = @transform_5, window_bounds = array<i64: 1, 16, 16, 64>}]} {
    %c0 = arith.constant 0 : index
    %c0_0 = arith.constant 0 : index
    %c0_1 = arith.constant 0 : index
    %c0_2 = arith.constant 0 : index
    %0 = vector.load %arg1[%c0, %c0_0, %c0_1, %c0_2] : memref<1x18x18x64xf32, #tpu.memory_space<vmem>>, vector<1x16x16x64xf32>
    %1 = vector.shape_cast %0 : vector<1x16x16x64xf32> to vector<16x16x64xf32>
    %c0_3 = arith.constant 0 : index
    %c0_4 = arith.constant 0 : index
    %c1 = arith.constant 1 : index
    %c0_5 = arith.constant 0 : index
    %2 = vector.load %arg1[%c0_3, %c0_4, %c1, %c0_5] : memref<1x18x18x64xf32, #tpu.memory_space<vmem>>, vector<1x16x16x64xf32>
    %3 = vector.shape_cast %2 : vector<1x16x16x64xf32> to vector<16x16x64xf32>
    %c0_6 = arith.constant 0 : index
    %c0_7 = arith.constant 0 : index
    %c2 = arith.constant 2 : index
    %c0_8 = arith.constant 0 : index
    %4 = vector.load %arg1[%c0_6, %c0_7, %c2, %c0_8] : memref<1x18x18x64xf32, #tpu.memory_space<vmem>>, vector<1x16x16x64xf32>
    %5 = vector.shape_cast %4 : vector<1x16x16x64xf32> to vector<16x16x64xf32>
    %c0_9 = arith.constant 0 : index
    %c1_10 = arith.constant 1 : index
    %c0_11 = arith.constant 0 : index
    %c0_12 = arith.constant 0 : index
    %6 = vector.load %arg1[%c0_9, %c1_10, %c0_11, %c0_12] : memref<1x18x18x64xf32, #tpu.memory_space<vmem>>, vector<1x16x16x64xf32>
    %7 = vector.shape_cast %6 : vector<1x16x16x64xf32> to vector<16x16x64xf32>
    %c0_13 = arith.constant 0 : index
    %c1_14 = arith.constant 1 : index
    %c1_15 = arith.constant 1 : index
    %c0_16 = arith.constant 0 : index
    %8 = vector.load %arg1[%c0_13, %c1_14, %c1_15, %c0_16] : memref<1x18x18x64xf32, #tpu.memory_space<vmem>>, vector<1x16x16x64xf32>
    %9 = vector.shape_cast %8 : vector<1x16x16x64xf32> to vector<16x16x64xf32>
    %c0_17 = arith.constant 0 : index
    %c1_18 = arith.constant 1 : index
    %c2_19 = arith.constant 2 : index
    %c0_20 = arith.constant 0 : index
    %10 = vector.load %arg1[%c0_17, %c1_18, %c2_19, %c0_20] : memref<1x18x18x64xf32, #tpu.memory_space<vmem>>, vector<1x16x16x64xf32>
    %11 = vector.shape_cast %10 : vector<1x16x16x64xf32> to vector<16x16x64xf32>
    %c0_21 = arith.constant 0 : index
    %c2_22 = arith.constant 2 : index
    %c0_23 = arith.constant 0 : index
    %c0_24 = arith.constant 0 : index
    %12 = vector.load %arg1[%c0_21, %c2_22, %c0_23, %c0_24] : memref<1x18x18x64xf32, #tpu.memory_space<vmem>>, vector<1x16x16x64xf32>
    %13 = vector.shape_cast %12 : vector<1x16x16x64xf32> to vector<16x16x64xf32>
    %c0_25 = arith.constant 0 : index
    %c2_26 = arith.constant 2 : index
    %c1_27 = arith.constant 1 : index
    %c0_28 = arith.constant 0 : index
    %14 = vector.load %arg1[%c0_25, %c2_26, %c1_27, %c0_28] : memref<1x18x18x64xf32, #tpu.memory_space<vmem>>, vector<1x16x16x64xf32>
    %15 = vector.shape_cast %14 : vector<1x16x16x64xf32> to vector<16x16x64xf32>
    %c0_29 = arith.constant 0 : index
    %c2_30 = arith.constant 2 : index
    %c2_31 = arith.constant 2 : index
    %c0_32 = arith.constant 0 : index
    %16 = vector.load %arg1[%c0_29, %c2_30, %c2_31, %c0_32] : memref<1x18x18x64xf32, #tpu.memory_space<vmem>>, vector<1x16x16x64xf32>
    %17 = vector.shape_cast %16 : vector<1x16x16x64xf32> to vector<16x16x64xf32>
    %18 = tpu.concatenate %1, %3, %5, %7, %9, %11, %13, %15, %17 in 2 : vector<16x16x64xf32>, vector<16x16x64xf32>, vector<16x16x64xf32>, vector<16x16x64xf32>, vector<16x16x64xf32>, vector<16x16x64xf32>, vector<16x16x64xf32>, vector<16x16x64xf32>, vector<16x16x64xf32> -> vector<16x16x576xf32>
    %19 = vector.shape_cast %18 : vector<16x16x576xf32> to vector<256x576xf32>
    %c0_33 = arith.constant 0 : index
    %c0_34 = arith.constant 0 : index
    %20 = vector.load %arg2[%c0_33, %c0_34] : memref<576x64xf32, #tpu.memory_space<vmem>>, vector<576x64xf32>
    %cst = arith.constant dense<0.000000e+00> : vector<256x64xf32>
    %21 = tpu.matmul %19, %20, %cst {dimension_numbers = #tpu.dot_dimension_numbers<[1], [0], [0], [1], [0, 0, 1, 1], [], []>} : vector<256x576xf32>, vector<576x64xf32>, vector<256x64xf32> -> vector<256x64xf32>
    %c0_35 = arith.constant 0 : index
    %c0_36 = arith.constant 0 : index
    %22 = vector.load %arg3[%c0_35, %c0_36] : memref<1x64xf32, #tpu.memory_space<vmem>>, vector<1x64xf32>
    %23 = vector.broadcast %22 : vector<1x64xf32> to vector<256x64xf32>
    %24 = arith.addf %21, %23 : vector<256x64xf32>
    %cst_37 = arith.constant 0.000000e+00 : f32
    %25 = vector.broadcast %cst_37 : f32 to vector<256x64xf32>
    %26 = arith.cmpf oge, %24, %25 : vector<256x64xf32>
    %cst_38 = arith.constant 2.000000e-01 : f32
    %27 = vector.broadcast %cst_38 : f32 to vector<256x64xf32>
    %28 = arith.mulf %27, %24 : vector<256x64xf32>
    %29 = arith.select %26, %24, %28 : vector<256x64xi1>, vector<256x64xf32>
    %cst_39 = arith.constant 0.000000e+00 : f32
    %30 = vector.broadcast %cst_39 : f32 to vector<18x18x64xf32>
    %c0_40 = arith.constant 0 : index
    %c0_41 = arith.constant 0 : index
    %c0_42 = arith.constant 0 : index
    %31 = vector.load %arg7[%c0_40, %c0_41, %c0_42] : memref<18x18x64xf32, #tpu.memory_space<vmem>>, vector<18x18x64xf32>
    tpu.vector_store %arg7[%c0_40, %c0_41, %c0_42], %30 {strides = array<i32>} : memref<18x18x64xf32, #tpu.memory_space<vmem>>, vector<18x18x64xf32>,
    %32 = vector.shape_cast %29 : vector<256x64xf32> to vector<16x16x64xf32>
    %c1_43 = arith.constant 1 : index
    %c1_44 = arith.constant 1 : index
    %c0_45 = arith.constant 0 : index
    %33 = vector.load %arg7[%c1_43, %c1_44, %c0_45] : memref<18x18x64xf32, #tpu.memory_space<vmem>>, vector<16x16x64xf32>
    tpu.vector_store %arg7[%c1_43, %c1_44, %c0_45], %32 {strides = array<i32>} : memref<18x18x64xf32, #tpu.memory_space<vmem>>, vector<16x16x64xf32>,
    %c0_46 = arith.constant 0 : index
    %c0_47 = arith.constant 0 : index
    %c0_48 = arith.constant 0 : index
    %34 = vector.load %arg7[%c0_46, %c0_47, %c0_48] : memref<18x18x64xf32, #tpu.memory_space<vmem>>, vector<16x16x64xf32>
    %c0_49 = arith.constant 0 : index
    %c1_50 = arith.constant 1 : index
    %c0_51 = arith.constant 0 : index
    %35 = vector.load %arg7[%c0_49, %c1_50, %c0_51] : memref<18x18x64xf32, #tpu.memory_space<vmem>>, vector<16x16x64xf32>
    %c0_52 = arith.constant 0 : index
    %c2_53 = arith.constant 2 : index
    %c0_54 = arith.constant 0 : index
    %36 = vector.load %arg7[%c0_52, %c2_53, %c0_54] : memref<18x18x64xf32, #tpu.memory_space<vmem>>, vector<16x16x64xf32>
    %c1_55 = arith.constant 1 : index
    %c0_56 = arith.constant 0 : index
    %c0_57 = arith.constant 0 : index
    %37 = vector.load %arg7[%c1_55, %c0_56, %c0_57] : memref<18x18x64xf32, #tpu.memory_space<vmem>>, vector<16x16x64xf32>
    %c1_58 = arith.constant 1 : index
    %c1_59 = arith.constant 1 : index
    %c0_60 = arith.constant 0 : index
    %38 = vector.load %arg7[%c1_58, %c1_59, %c0_60] : memref<18x18x64xf32, #tpu.memory_space<vmem>>, vector<16x16x64xf32>
    %c1_61 = arith.constant 1 : index
    %c2_62 = arith.constant 2 : index
    %c0_63 = arith.constant 0 : index
    %39 = vector.load %arg7[%c1_61, %c2_62, %c0_63] : memref<18x18x64xf32, #tpu.memory_space<vmem>>, vector<16x16x64xf32>
    %c2_64 = arith.constant 2 : index
    %c0_65 = arith.constant 0 : index
    %c0_66 = arith.constant 0 : index
    %40 = vector.load %arg7[%c2_64, %c0_65, %c0_66] : memref<18x18x64xf32, #tpu.memory_space<vmem>>, vector<16x16x64xf32>
    %c2_67 = arith.constant 2 : index
    %c1_68 = arith.constant 1 : index
    %c0_69 = arith.constant 0 : index
    %41 = vector.load %arg7[%c2_67, %c1_68, %c0_69] : memref<18x18x64xf32, #tpu.memory_space<vmem>>, vector<16x16x64xf32>
    %c2_70 = arith.constant 2 : index
    %c2_71 = arith.constant 2 : index
    %c0_72 = arith.constant 0 : index
    %42 = vector.load %arg7[%c2_70, %c2_71, %c0_72] : memref<18x18x64xf32, #tpu.memory_space<vmem>>, vector<16x16x64xf32>
    %43 = tpu.concatenate %34, %35, %36, %37, %38, %39, %40, %41, %42 in 2 : vector<16x16x64xf32>, vector<16x16x64xf32>, vector<16x16x64xf32>, vector<16x16x64xf32>, vector<16x16x64xf32>, vector<16x16x64xf32>, vector<16x16x64xf32>, vector<16x16x64xf32>, vector<16x16x64xf32> -> vector<16x16x576xf32>
    %44 = vector.shape_cast %43 : vector<16x16x576xf32> to vector<256x576xf32>
    %c0_73 = arith.constant 0 : index
    %c0_74 = arith.constant 0 : index
    %45 = vector.load %arg4[%c0_73, %c0_74] : memref<576x64xf32, #tpu.memory_space<vmem>>, vector<576x64xf32>
    %cst_75 = arith.constant dense<0.000000e+00> : vector<256x64xf32>
    %46 = tpu.matmul %44, %45, %cst_75 {dimension_numbers = #tpu.dot_dimension_numbers<[1], [0], [0], [1], [0, 0, 1, 1], [], []>} : vector<256x576xf32>, vector<576x64xf32>, vector<256x64xf32> -> vector<256x64xf32>
    %c0_76 = arith.constant 0 : index
    %c0_77 = arith.constant 0 : index
    %47 = vector.load %arg5[%c0_76, %c0_77] : memref<1x64xf32, #tpu.memory_space<vmem>>, vector<1x64xf32>
    %48 = vector.broadcast %47 : vector<1x64xf32> to vector<256x64xf32>
    %49 = arith.addf %46, %48 : vector<256x64xf32>
    %c0_78 = arith.constant 0 : index
    %c1_79 = arith.constant 1 : index
    %c1_80 = arith.constant 1 : index
    %c0_81 = arith.constant 0 : index
    %50 = vector.load %arg1[%c0_78, %c1_79, %c1_80, %c0_81] : memref<1x18x18x64xf32, #tpu.memory_space<vmem>>, vector<1x16x16x64xf32>
    %51 = vector.shape_cast %50 : vector<1x16x16x64xf32> to vector<16x16x64xf32>
    %52 = vector.shape_cast %51 : vector<16x16x64xf32> to vector<256x64xf32>
    %53 = arith.addf %52, %49 : vector<256x64xf32>
    %54 = vector.shape_cast %53 : vector<256x64xf32> to vector<1x16x16x64xf32>
    %c0_82 = arith.constant 0 : index
    %c0_83 = arith.constant 0 : index
    %c0_84 = arith.constant 0 : index
    %c0_85 = arith.constant 0 : index
    %55 = vector.load %arg6[%c0_82, %c0_83, %c0_84, %c0_85] : memref<1x16x16x64xf32, #tpu.memory_space<vmem>>, vector<1x16x16x64xf32>
    tpu.vector_store %arg6[%c0_82, %c0_83, %c0_84, %c0_85], %54 {strides = array<i32>} : memref<1x16x16x64xf32, #tpu.memory_space<vmem>>, vector<1x16x16x64xf32>,
    return
  }
  func.func @transform_0(%arg0: i32) -> (i32, i32, i32, i32) {
    %c0_i32 = arith.constant 0 : i32
    %c0_i32_0 = arith.constant 0 : i32
    %c0_i32_1 = arith.constant 0 : i32
    %c0_i32_2 = arith.constant 0 : i32
    return %arg0, %c0_i32, %c0_i32_0, %c0_i32_1 : i32, i32, i32, i32
  }
  func.func @transform_1(%arg0: i32) -> (i32, i32) {
    %c0_i32 = arith.constant 0 : i32
    %c0_i32_0 = arith.constant 0 : i32
    %c0_i32_1 = arith.constant 0 : i32
    return %c0_i32, %c0_i32_0 : i32, i32
  }
  func.func @transform_2(%arg0: i32) -> (i32, i32) {
    %c0_i32 = arith.constant 0 : i32
    %c0_i32_0 = arith.constant 0 : i32
    %c0_i32_1 = arith.constant 0 : i32
    return %c0_i32, %c0_i32_0 : i32, i32
  }
  func.func @transform_3(%arg0: i32) -> (i32, i32) {
    %c0_i32 = arith.constant 0 : i32
    %c0_i32_0 = arith.constant 0 : i32
    %c0_i32_1 = arith.constant 0 : i32
    return %c0_i32, %c0_i32_0 : i32, i32
  }
  func.func @transform_4(%arg0: i32) -> (i32, i32) {
    %c0_i32 = arith.constant 0 : i32
    %c0_i32_0 = arith.constant 0 : i32
    %c0_i32_1 = arith.constant 0 : i32
    return %c0_i32, %c0_i32_0 : i32, i32
  }
  func.func @transform_5(%arg0: i32) -> (i32, i32, i32, i32) {
    %c0_i32 = arith.constant 0 : i32
    %c0_i32_0 = arith.constant 0 : i32
    %c0_i32_1 = arith.constant 0 : i32
    %c0_i32_2 = arith.constant 0 : i32
    return %arg0, %c0_i32, %c0_i32_0, %c0_i32_1 : i32, i32, i32, i32
  }
}

</mosaic_0001>

<bundles_post_ra>
// kernel: residual_block_no_bn.1
= control target key start
LH: loop header
LB: loop body
LE: loop exit
PB: predicated region body
PF: predicated region fallthrough
CT: control target
= control target key end

     0   :  { %10 = vsyncpa [#allocation4], 0  ;;  %s8385_s0 = inlined_call_operand.vmem [shape: f32[2,18,18,64], index: 0, kind: input, shape index: {}]   ;;  %s8386_s1 = inlined_call_operand.vmem [shape: f32[576,64], index: 1, kind: input, shape index: {}]   ;;  %s8387_s2 = inlined_call_operand.vmem [shape: f32[1,64], index: 2, kind: input, shape index: {}]   ;;  %s8388_s3 = inlined_call_operand.vmem [shape: f32[576,64], index: 3, kind: input, shape index: {}]   ;;  %s8389_s4 = inlined_call_operand.vmem [shape: f32[1,64], index: 4, kind: input, shape index: {}]   ;;  %s8390_s5 = inlined_call_operand.hbm [shape: f32[2,16,16,64], index: 5, kind: output, shape index: {}]  }
   0x1   :  { %12 = vsyncpa [#allocation4 + $0x1], 0  ;;  %s5860_s18 = smov 0   ;;  %s5862_s19 = smov 0  }
   0x2   :  { %s5864_s20 = smov 0   ;;  %s5866_s21 = smov 0  }
   0x3 LB: > { %s5881_s22 = sadd.s32 4294967295, %s5822_s21   ;;  %s4139_s23 = sadd.s32 4294967294, %s5822_s21   ;;  %s5822_s21 = sphi %s5866_s21, %s8504_s21   ;;  %s5818_s20 = sphi %s5864_s20, %s8503_s20   ;;  %s5814_s19 = sphi %s5862_s19, %s8502_s19   ;;  %s5810_s18 = sphi %s5860_s18, %s8501_s18  }
   0x4   : > { %s5885_s24 = sadd.s32 1, %s5822_s21   ;;  %s135_s25 = sadd.s32 1, %s5818_s20 }
   0x5   : > { %s132_s26 = ssub.s32 %s5822_s21, %s5885_s24  ;;  %p145_p0 = scmp.ne.s32.totalorder %s5818_s20, %s5814_s19 }
   0x6   : > { %p133_p1 = scmp.eq.s32.totalorder %s132_s26, 0  ;;  %p146_p2 = scmp.eq.s32.totalorder %s5881_s22, 1 }
   0x7   : > { %p151_p3 = scmp.ne.s32.totalorder %s5814_s19, %s5810_s18  ;;  %p152_p4 = scmp.eq.s32.totalorder %s4139_s23, 1 }
   0x8   : > { %s5896_s27 = scalar_select %p133_p1, %s5818_s20, %s135_s25  }
   0x9   : > { %p5898_p5 = por %p146_p2, %p145_p0  ;;  %p5902_p6 = por %p152_p4, %p151_p3 }
   0xa   : > { %p4142_p7 = scmp.ge.s32.totalorder %s5822_s21, 1  ;;  %p190_p8 = scmp.lt.s32.totalorder %s5822_s21, 3 }
   0xc   : > { %p191_p9 = pnand %p4142_p7, %p190_p8 }
   0xe   : > { %194 = sbr.rel (%p191_p9) target bundleno = 1135 (0x46f), region = 40 }
  0x15   : > { %p218_p10 = scmp.lt.s32.totalorder %s5881_s22, 1  ;;  %v1154_v0 = vld [vmem:[%s8386_s1] sm:$0xff]  ;;  %v1155_v1 = vld [vmem:[%s8386_s1 + $0x8] sm:$0xff]  ;;  %v1156_v2 = vld [vmem:[%s8386_s1 + $0x10] sm:$0xff]  ;;  %v8395_v3 = vmov 0.0|0.0   ;;  %s5825_s10 = smov 64  }
  0x16   : > { %4649 = vmatprep.subr.bf16.mxu0 %v8395_v3  ;;  %v4650_v4 = vpack.c.bf16 %v1155_v1, %v1154_v0  ;;  %v1157_v5 = vld [vmem:[%s8386_s1 + $0x18] sm:$0xff]  ;;  %v1158_v7 = vld [vmem:[%s8386_s1 + $0x20] sm:$0xff]  ;;  %v1159_v8 = vld [vmem:[%s8386_s1 + $0x28] sm:$0xff]  ;;  %vm1025_vm0 = vcmask 523264   ;;  %vm2102_vm1 = vcmask 517120   ;;  %s4440_s8 = sshll.u32 %s5881_s22, 12 }
  0x17   : > { %s219_s13 = scalar_select %p218_p10, %s5881_s22, 1  ;;  %v4653_v6 = vpack.c.bf16 %v1157_v5, %v1156_v2  ;;  %v1160_v9 = vld [vmem:[%s8386_s1 + $0x30] sm:$0xff]  ;;  %v1161_v10 = vld [vmem:[%s8386_s1 + $0x38] sm:$0xff]  ;;  %v4656_v14 = vpack.c.bf16 %v1159_v8, %v1158_v7  ;;  %v1162_v27 = vld [vmem:[%s8386_s1 + $0x40] sm:$0xff] }
  0x18   : > { %4651 = vmatpush1.bf16.msra.mxu0 %v4650_v4  ;;  %v4659_v26 = vpack.c.bf16 %v1161_v10, %v1160_v9  ;;  %v1163_v30 = vld [vmem:[%s8386_s1 + $0x48] sm:$0xff]  ;;  %v1164_v36 = vld [vmem:[%s8386_s1 + $0x50] sm:$0xff]  ;;  %v1165_v39 = vld [vmem:[%s8386_s1 + $0x58] sm:$0xff] }
  0x19   : > { %s5073_s14 = smul.u32 432, %s219_s13  ;;  %4652 = vmatprep.subr.bf16.mxu0 %v8395_v3  ;;  %v4662_v35 = vpack.c.bf16 %v1163_v30, %v1162_v27  ;;  %v4665_v44 = vpack.c.bf16 %v1165_v39, %v1164_v36  ;;  %v1166_v45 = vld [vmem:[%s8386_s1 + $0x60] sm:$0xff]  ;;  %v1167_v48 = vld [vmem:[%s8386_s1 + $0x68] sm:$0xff]  ;;  %v1168_v54 = vld [vmem:[%s8386_s1 + $0x70] sm:$0xff]  ;;  %s8334_s13 = scalar_lea.hbm %s8390_s5, %s4440_s8 }
  0x1a   : > { %v4668_v53 = vpack.c.bf16 %v1167_v48, %v1166_v45  ;;  %v1169_v57 = vld [vmem:[%s8386_s1 + $0x78] sm:$0xff]  ;;  %v1170_v63 = vld [vmem:[%s8386_s1 + $0x80] sm:$0xff]  ;;  %v1171_v2 = vld [vmem:[%s8386_s1 + $0x88] sm:$0xff] }
  0x1b   : > { %s5933_s30 = scalar_lea.vmem %s8385_s0, %s5073_s14  ;;  %v4671_v62 = vpack.c.bf16 %v1169_v57, %v1168_v54  ;;  %v4674_v8 = vpack.c.bf16 %v1171_v2, %v1170_v63  ;;  %v1172_v9 = vld [vmem:[%s8386_s1 + $0x90] sm:$0xff]  ;;  %v1175_v30 = vld [vmem:[%s8386_s1 + $0xa8] sm:$0xff]  ;;  %v1177_v45 = vld [vmem:[%s8386_s1 + $0xb8] sm:$0xff]  ;;  %s5827_s14 = smov [#allocation3]  }
  0x1c   : > { %v255_v11 = vld [vmem:[%s5933_s30 + $0x1] sm:$0xff]  ;;  %v5943_v12 = vld [vmem:[%s5933_s30 + $0x18] sm:$0xff]  ;;  %v256_v13 = vld [vmem:[%s5933_s30 + $0x9] sm:$0xff]  ;;  %4654 = vmatpush1.bf16.msra.mxu0 %v4653_v6  ;;  %s5764_s15 = sshll.u32 %s5827_s14, 4  ;;  %s5765_s15 = int_to_ptr.vmem [resolvable:$false] %s5764_s15 }
  0x1d   : > { %v5118_v15 = vpack.i.bf16 %v255_v11, %v5943_v12  ;;  %v5948_v16 = vld [vmem:[%s5933_s30 + $0x20] sm:$0xff]  ;;  %v5952_v18 = vld [vmem:[%s5933_s30 + $0x30] sm:$0xff]  ;;  %4655 = vmatprep.subr.bf16.mxu0 %v8395_v3  ;;  %v5958_v21 = vld [vmem:[%s5933_s30 + $0x38] sm:$0xff]  ;;  %s5766_s16 = scalar_lea.vmem %s5765_s15, 8192 }
  0x1e   : > { %v257_v17 = vld [vmem:[%s5933_s30 + $0x19] sm:$0xff]  ;;  %v258_v20 = vld [vmem:[%s5933_s30 + $0x21] sm:$0xff]  ;;  %v5123_v22 = vpack.i.bf16 %v256_v13, %v5948_v16  ;;  %v5965_v24 = vld [vmem:[%s5933_s30 + $0x31] sm:$0xff] }
  0x1f   : > { %v5128_v19 = vpack.i.bf16 %v257_v17, %v5952_v18  ;;  %5119 = vrot.lane.b32.xlu0 %v5118_v15, %s5825_s10  ;;  %v5133_v23 = vpack.i.bf16 %v258_v20, %v5958_v21  ;;  %v5968_v25 = vld [vmem:[%s5933_s30 + $0x48] sm:$0xff]  ;;  %v5974_v28 = vld [vmem:[%s5933_s30 + $0x39] sm:$0xff]  ;;  %v5977_v29 = vld [vmem:[%s5933_s30 + $0x50] sm:$0xff] }
  0x20   : > { %4657 = vmatpush1.bf16.msra.mxu0 %v4656_v14  ;;  %v5138_v31 = vpack.i.bf16 %v5965_v24, %v5968_v25  ;;  %v5143_v32 = vpack.i.bf16 %v5974_v28, %v5977_v29  ;;  %v5990_v33 = vld [vmem:[%s5933_s30 + $0x49] sm:$0xff]  ;;  %v5993_v34 = vld [vmem:[%s5933_s30 + $0x60] sm:$0xff]  ;;  %v5999_v37 = vld [vmem:[%s5933_s30 + $0x51] sm:$0xff] }
  0x21   : > { %5129 = vrot.lane.b32.xlu1 %v5128_v19, %s5825_s10  ;;  %4658 = vmatprep.subr.bf16.mxu0 %v8395_v3  ;;  %v6002_v38 = vld [vmem:[%s5933_s30 + $0x68] sm:$0xff]  ;;  %v5148_v40 = vpack.i.bf16 %v5990_v33, %v5993_v34  ;;  %v6018_v43 = vld [vmem:[%s5933_s30 + $0x78] sm:$0xff]  ;;  %v6027_v47 = vld [vmem:[%s5933_s30 + $0x80] sm:$0xff] }
  0x22   : > { %v5153_v41 = vpack.i.bf16 %v5999_v37, %v6002_v38  ;;  %v6015_v42 = vld [vmem:[%s5933_s30 + $0x61] sm:$0xff]  ;;  %v6024_v46 = vld [vmem:[%s5933_s30 + $0x69] sm:$0xff]  ;;  %v6040_v51 = vld [vmem:[%s5933_s30 + $0x79] sm:$0xff] }
  0x23   : > { %5124 = vrot.lane.b32.xlu0 %v5123_v22, %s5825_s10  ;;  %v5158_v49 = vpack.i.bf16 %v6015_v42, %v6018_v43  ;;  %v5163_v50 = vpack.i.bf16 %v6024_v46, %v6027_v47  ;;  %v6043_v52 = vld [vmem:[%s5933_s30 + $0x90] sm:$0xff]  ;;  %v6049_v55 = vld [vmem:[%s5933_s30 + $0x81] sm:$0xff]  ;;  %v6052_v56 = vld [vmem:[%s5933_s30 + $0x98] sm:$0xff] }
  0x24   : > { %4660 = vmatpush1.bf16.msra.mxu0 %v4659_v26  ;;  %v5168_v58 = vpack.i.bf16 %v6040_v51, %v6043_v52  ;;  %v5173_v59 = vpack.i.bf16 %v6049_v55, %v6052_v56  ;;  %v6065_v60 = vld [vmem:[%s5933_s30 + $0x91] sm:$0xff]  ;;  %v6068_v61 = vld [vmem:[%s5933_s30 + $0xa8] sm:$0xff]  ;;  %v6074_v0 = vld [vmem:[%s5933_s30 + $0x99] sm:$0xff] }
  0x25   : > { %5134 = vrot.lane.b32.xlu1 %v5133_v23, %s5825_s10  ;;  %4661 = vmatprep.subr.bf16.mxu0 %v8395_v3  ;;  %8426 = vst [vmem:[#allocation6_spill] sm:$0xff] %v6068_v61  ;;  %v6077_v1 = vld [vmem:[%s5933_s30 + $0xb0] sm:$0xff]  ;;  %v5178_v4 = vpack.i.bf16 %v6065_v60, %v6068_v61  ;;  %v6093_v7 = vld [vmem:[%s5933_s30 + $0xc0] sm:$0xff]  ;;  %v6102_v11 = vld [vmem:[%s5933_s30 + $0xc8] sm:$0xff] }
  0x26   : > { %8427 = vst [vmem:[#allocation7_spill] sm:$0xff] %v6077_v1  ;;  %v5183_v5 = vpack.i.bf16 %v6074_v0, %v6077_v1  ;;  %v6090_v6 = vld [vmem:[%s5933_s30 + $0xa9] sm:$0xff]  ;;  %8428 = vst [vmem:[#allocation8_spill] sm:$0xff] %v6093_v7  ;;  %v6099_v10 = vld [vmem:[%s5933_s30 + $0xb1] sm:$0xff] }
  0x27   : > { %5139 = vrot.lane.b32.xlu0 %v5138_v31, %s5825_s10  ;;  %8429 = vst [vmem:[#allocation9_spill] sm:$0xff] %v6102_v11  ;;  %v1173_v13 = vld [vmem:[%s8386_s1 + $0x98] sm:$0xff]  ;;  %v5188_v14 = vpack.i.bf16 %v6090_v6, %v6093_v7  ;;  %v1174_v15 = vld [vmem:[%s8386_s1 + $0xa0] sm:$0xff]  ;;  %v5193_v17 = vpack.i.bf16 %v6099_v10, %v6102_v11  ;;  %v6127_v26 = vld [vmem:[%s5933_s30 + $0xc9] sm:$0xff] }
  0x28   : > { %4663 = vmatpush1.bf16.msra.mxu0 %v4662_v35  ;;  %v6118_v19 = vld [vmem:[%s5933_s30 + $0xc1] sm:$0xff]  ;;  %v6121_v20 = vld [vmem:[%s5933_s30 + $0xd8] sm:$0xff]  ;;  %v4677_v22 = vpack.c.bf16 %v1173_v13, %v1172_v9  ;;  %v6148_v36 = vld [vmem:[%s5933_s30 + $0xf0] sm:$0xff] }
  0x29   : > { %5144 = vrot.lane.b32.xlu1 %v5143_v32, %s5825_s10  ;;  %4664 = vmatprep.subr.bf16.mxu0 %v8395_v3  ;;  %8430 = vst [vmem:[#allocation10_spill] sm:$0xff] %v6121_v20  ;;  %v6124_v23 = vld [vmem:[%s5933_s30 + $0x32] sm:$0xff]  ;;  %v6130_v27 = vld [vmem:[%s5933_s30 + $0xe0] sm:$0xff]  ;;  %v5198_v31 = vpack.i.bf16 %v6118_v19, %v6121_v20  ;;  %8432 = vst [vmem:[#allocation12_spill] sm:$0xff] %v6148_v36 }
  0x2a   : > { %8431 = vst [vmem:[#allocation11_spill] sm:$0xff] %v6130_v27  ;;  %4537 = vmatprep.mubr.msk.f32.mxu1 %vm1025_vm0, %v6124_v23  ;;  %v5203_v32 = vpack.i.bf16 %v6127_v26, %v6130_v27  ;;  %v6145_v35 = vld [vmem:[%s5933_s30 + $0xd9] sm:$0xff]  ;;  %v6151_v39 = vld [vmem:[%s5933_s30 + $0xe1] sm:$0xff]  ;;  %v288_v11 = vld [vmem:[%s5933_s30 + $0xa] sm:$0xff] }
  0x2b   : > { %5149 = vrot.lane.b32.xlu0 %v5148_v40, %s5825_s10  ;;  %v4680_v40 = vpack.c.bf16 %v1175_v30, %v1174_v15  ;;  %v5208_v48 = vpack.i.bf16 %v6145_v35, %v6148_v36  ;;  %v6176_v54 = vld [vmem:[%s5933_s30 + $0xf9] sm:$0xff]  ;;  %v6204_v13 = vld [vmem:[%s5933_s30 + $0x128] sm:$0xff] }
  0x2c   : > { %4666 = vmatpush1.bf16.msra.mxu0 %v4665_v44  ;;  %v1176_v44 = vld [vmem:[%s8386_s1 + $0xb0] sm:$0xff]  ;;  %8437 = vst [vmem:[#allocation17_spill] sm:$0xff] %v6204_v13  ;;  %v1181_v15 = vld [vmem:[%s8386_s1 + $0xd8] sm:$0xff]  ;;  %v6220_v30 = vld [vmem:[%s5933_s30 + $0x121] sm:$0xff] }
  0x2d   : > { %5154 = vrot.lane.b32.xlu1 %v5153_v41, %s5825_s10  ;;  %4667 = vmatprep.subr.bf16.mxu0 %v8395_v3  ;;  %v6154_v41 = vld [vmem:[%s5933_s30 + $0xf8] sm:$0xff]  ;;  %v4683_v57 = vpack.c.bf16 %v1177_v45, %v1176_v44  ;;  %v6229_v44 = vld [vmem:[%s5933_s30 + $0x140] sm:$0xff] }
  0x2e   : > { %8433 = vst [vmem:[#allocation13_spill] sm:$0xff] %v6154_v41  ;;  %8439 = vst [vmem:[#allocation19_spill] sm:$0xff] %v6229_v44  ;;  %v1182_v45 = vld [vmem:[%s8386_s1 + $0xe0] sm:$0xff] }
  0x2f   : > { %5159 = vrot.lane.b32.xlu0 %v5158_v49, %s5825_s10  ;;  %v5213_v49 = vpack.i.bf16 %v6151_v39, %v6154_v41 }
  0x30   : > { %4669 = vmatpush1.bf16.msra.mxu0 %v4668_v53  ;;  %v6173_v53 = vld [vmem:[%s5933_s30 + $0x108] sm:$0xff] }
  0x31   : > { %5164 = vrot.lane.b32.xlu1 %v5163_v50, %s5825_s10  ;;  %4670 = vmatprep.subr.bf16.mxu0 %v8395_v3  ;;  %v6170_v50 = vld [vmem:[%s5933_s30 + $0xf1] sm:$0xff]  ;;  %8434 = vst [vmem:[#allocation14_spill] sm:$0xff] %v6173_v53 }
  0x32   : > { %v5218_v63 = vpack.i.bf16 %v6170_v50, %v6173_v53  ;;  %v4302_v53 = vld [vmem:[%s5933_s30 + $0x189] sm:$0xff] }
  0x33   : > { %5169 = vrot.lane.b32.xlu0 %v5168_v58, %s5825_s10  ;;  %v6179_v58 = vld [vmem:[%s5933_s30 + $0x110] sm:$0xff] }
  0x34   : > { %4672 = vmatpush1.bf16.msra.mxu0 %v4671_v62  ;;  %8435 = vst [vmem:[#allocation15_spill] sm:$0xff] %v6179_v58  ;;  %v1179_v62 = vld [vmem:[%s8386_s1 + $0xc8] sm:$0xff]  ;;  %v5223_v2 = vpack.i.bf16 %v6176_v54, %v6179_v58  ;;  %v6503_v58 = vld [vmem:[%s5933_s30 + $0x172] sm:$0xff] }
  0x35   : > { %5174 = vrot.lane.b32.xlu1 %v5173_v59, %s5825_s10  ;;  %4673 = vmatprep.subr.bf16.mxu0 %v8395_v3  ;;  %v1178_v59 = vld [vmem:[%s8386_s1 + $0xc0] sm:$0xff] }
  0x36   : > { %v4686_v9 = vpack.c.bf16 %v1179_v62, %v1178_v59  ;;  %v6245_v59 = vld [vmem:[%s5933_s30 + $0x139] sm:$0xff]  ;;  %v6248_v62 = vld [vmem:[%s5933_s30 + $0x150] sm:$0xff] }
  0x37   : > { %5179 = vrot.lane.b32.xlu0 %v5178_v4, %s5825_s10  ;;  %v6195_v4 = vld [vmem:[%s5933_s30 + $0x109] sm:$0xff]  ;;  %8440 = vst [vmem:[#allocation20_spill] sm:$0xff] %v6248_v62 }
  0x38   : > { %4675 = vmatpush1.bf16.msra.mxu0 %v4674_v8  ;;  %v6201_v8 = vld [vmem:[%s5933_s30 + $0x111] sm:$0xff] }
  0x39   : > { %5184 = vrot.lane.b32.xlu1 %v5183_v5, %s5825_s10  ;;  %4676 = vmatprep.subr.bf16.mxu0 %v8395_v3  ;;  %v6198_v5 = vld [vmem:[%s5933_s30 + $0x120] sm:$0xff] }
  0x3a   : > { %8436 = vst [vmem:[#allocation16_spill] sm:$0xff] %v6198_v5 }
  0x3b   : > { %5189 = vrot.lane.b32.xlu0 %v5188_v14, %s5825_s10  ;;  %v1180_v14 = vld [vmem:[%s8386_s1 + $0xd0] sm:$0xff] }
  0x3c   : > { %4678 = vmatpush1.bf16.msra.mxu0 %v4677_v22  ;;  %v5233_v22 = vpack.i.bf16 %v6201_v8, %v6204_v13 }
  0x3d   : > { %5194 = vrot.lane.b32.xlu1 %v5193_v17, %s5825_s10  ;;  %4679 = vmatprep.subr.bf16.mxu0 %v8395_v3  ;;  %v5228_v17 = vpack.i.bf16 %v6195_v4, %v6198_v5  ;;  %v223_v5 = vld [vmem:[%s5933_s30] sm:$0xff] }
  0x3f   : > { %5199 = vrot.lane.b32.xlu0 %v5198_v31, %s5825_s10  ;;  %v6223_v31 = vld [vmem:[%s5933_s30 + $0x138] sm:$0xff] }
  0x40   : > { %4681 = vmatpush1.bf16.msra.mxu0 %v4680_v40  ;;  %8438 = vst [vmem:[#allocation18_spill] sm:$0xff] %v6223_v31  ;;  %v4689_v40 = vpack.c.bf16 %v1181_v15, %v1180_v14  ;;  %v1184_v14 = vld [vmem:[%s8386_s1 + $0xf0] sm:$0xff]  ;;  %v1185_v15 = vld [vmem:[%s8386_s1 + $0xf8] sm:$0xff] }
  0x41   : > { %5204 = vrot.lane.b32.xlu1 %v5203_v32, %s5825_s10  ;;  %4682 = vmatprep.subr.bf16.mxu0 %v8395_v3  ;;  %v6226_v32 = vld [vmem:[%s5933_s30 + $0x129] sm:$0xff] }
  0x43   : > { %5209 = vrot.lane.b32.xlu0 %v5208_v48, %s5825_s10  ;;  %v1183_v48 = vld [vmem:[%s8386_s1 + $0xe8] sm:$0xff] }
  0x44   : > { %4684 = vmatpush1.bf16.msra.mxu0 %v4683_v57  ;;  %v5243_v57 = vpack.i.bf16 %v6226_v32, %v6229_v44  ;;  %v4176_v44 = vld [vmem:[%s5933_s30 + $0x188] sm:$0xff] }
  0x45   : > { %5214 = vrot.lane.b32.xlu1 %v5213_v49, %s5825_s10  ;;  %4685 = vmatprep.subr.bf16.mxu0 %v8395_v3  ;;  %v5238_v49 = vpack.i.bf16 %v6220_v30, %v6223_v31  ;;  %v6498_v31 = vld [vmem:[%s5933_s30 + $0x16a] sm:$0xff] }
  0x47   : > { %5219 = vrot.lane.b32.xlu0 %v5218_v63, %s5825_s10  ;;  %v6251_v63 = vld [vmem:[%s5933_s30 + $0x141] sm:$0xff] }
  0x48   : > { %4687 = vmatpush1.bf16.msra.mxu0 %v4686_v9  ;;  %v6254_v9 = vld [vmem:[%s5933_s30 + $0x158] sm:$0xff] }
  0x49   : > { %5224 = vrot.lane.b32.xlu1 %v5223_v2, %s5825_s10  ;;  %4688 = vmatprep.subr.bf16.mxu0 %v8395_v3  ;;  %v4692_v2 = vpack.c.bf16 %v1183_v48, %v1182_v45  ;;  %8441 = vst [vmem:[#allocation21_spill] sm:$0xff] %v6254_v9  ;;  %v6273_v45 = vld [vmem:[%s5933_s30 + $0x168] sm:$0xff]  ;;  %v4695_v48 = vpack.c.bf16 %v1185_v15, %v1184_v14  ;;  %v4175_v15 = vld [vmem:[%s5933_s30 + $0x180] sm:$0xff] }
  0x4a   : > { %8442 = vst [vmem:[#allocation22_spill] sm:$0xff] %v6273_v45  ;;  %v6289_v14 = vld [vmem:[%s5933_s30 + $0x169] sm:$0xff] }
  0x4b   : > { %5229 = vrot.lane.b32.xlu0 %v5228_v17, %s5825_s10  ;;  %v5248_v17 = vpack.i.bf16 %v6245_v59, %v6248_v62  ;;  %v6280_v62 = vld [vmem:[%s5933_s30 + $0x170] sm:$0xff] }
  0x4c   : > { %4690 = vmatpush1.bf16.msra.mxu0 %v4689_v40  ;;  %v6270_v40 = vld [vmem:[%s5933_s30 + $0x151] sm:$0xff]  ;;  %8443 = vst [vmem:[#allocation23_spill] sm:$0xff] %v6280_v62 }
  0x4d   : > { %5234 = vrot.lane.b32.xlu1 %v5233_v22, %s5825_s10  ;;  %4691 = vmatprep.subr.bf16.mxu0 %v8395_v3  ;;  %v5253_v22 = vpack.i.bf16 %v6251_v63, %v6254_v9  ;;  %v6294_v9 = vld [vmem:[%s5933_s30 + $0x171] sm:$0xff] }
  0x4f   : > { %5239 = vrot.lane.b32.xlu0 %v5238_v49, %s5825_s10  ;;  %v6277_v49 = vld [vmem:[%s5933_s30 + $0x159] sm:$0xff] }
  0x50   : > { %4693 = vmatpush1.bf16.msra.mxu0 %v4692_v2  ;;  %v5263_v2 = vpack.i.bf16 %v6277_v49, %v6280_v62  ;;  %v6305_v62 = vld [vmem:[%s5933_s30 + $0x22] sm:$0xff] }
  0x51   : > { %5244 = vrot.lane.b32.xlu1 %v5243_v57, %s5825_s10  ;;  %4694 = vmatprep.subr.bf16.mxu0 %v8395_v3  ;;  %v5258_v57 = vpack.i.bf16 %v6270_v40, %v6273_v45  ;;  %v1186_v45 = vld [vmem:[%s8386_s1 + $0x100] sm:$0xff] }
  0x53   : > { %5249 = vrot.lane.b32.xlu0 %v5248_v17, %s5825_s10  ;;  %v5268_v17 = vpack.i.bf16 %v6289_v14, %v4175_v15  ;;  %v6314_v15 = vld [vmem:[%s5933_s30 + $0x3a] sm:$0xff] }
  0x54   : > { %4696 = vmatpush1.bf16.msra.mxu0 %v4695_v48  ;;  %v6302_v48 = vld [vmem:[%s5933_s30 + $0x1a] sm:$0xff] }
  0x55   : > { %5254 = vrot.lane.b32.xlu1 %v5253_v22, %s5825_s10  ;;  %4697 = vmatprep.subr.bf16.mxu0 %v8395_v3  ;;  %v5273_v22 = vpack.i.bf16 %v6294_v9, %v4176_v44  ;;  %v5278_v3 = vpack.i.bf16 %v6302_v48, %v5965_v24  ;;  %v5288_v44 = vpack.i.bf16 %v6124_v23, %v5990_v33  ;;  %v6323_v24 = vld [vmem:[%s5933_s30 + $0x4a] sm:$0xff]  ;;  %v6335_v33 = vld [vmem:[%s5933_s30 + $0x62] sm:$0xff] }
  0x57   : > { %5259 = vrot.lane.b32.xlu0 %v5258_v57, %s5825_s10  ;;  %v5283_v57 = vpack.i.bf16 %v6305_v62, %v5974_v28 }
  0x59   : > { %5264 = vrot.lane.b32.xlu1 %v5263_v2, %s5825_s10  ;;  %v5293_v2 = vpack.i.bf16 %v6314_v15, %v5999_v37  ;;  %v5308_v37 = vpack.i.bf16 %v6335_v33, %v6040_v51 }
  0x5b   : > { %5269 = vrot.lane.b32.xlu0 %v5268_v17, %s5825_s10  ;;  %v6326_v17 = vld [vmem:[%s5933_s30 + $0x52] sm:$0xff] }
  0x5c   : > { %v5303_v28 = vpack.i.bf16 %v6326_v17, %v6024_v46 }
  0x5d   : > { %5274 = vrot.lane.b32.xlu1 %v5273_v22, %s5825_s10  ;;  %v6338_v22 = vld [vmem:[%s5933_s30 + $0x6a] sm:$0xff] }
  0x5f   : > { %5279 = vrot.lane.b32.xlu0 %v5278_v3, %s5825_s10  ;;  %v5298_v3 = vpack.i.bf16 %v6323_v24, %v6015_v42  ;;  %v5313_v42 = vpack.i.bf16 %v6338_v22, %v6049_v55 }
  0x61   : > { %5284 = vrot.lane.b32.xlu1 %v5283_v57, %s5825_s10  ;;  %v6347_v57 = vld [vmem:[%s5933_s30 + $0x7a] sm:$0xff] }
  0x62   : > { %v5318_v46 = vpack.i.bf16 %v6347_v57, %v6065_v60 }
  0x63   : > { %5289 = vrot.lane.b32.xlu0 %v5288_v44, %s5825_s10  ;;  %v6350_v44 = vld [vmem:[%s5933_s30 + $0x82] sm:$0xff] }
  0x64   : > { %v5323_v51 = vpack.i.bf16 %v6350_v44, %v6074_v0 }
  0x65   : > { %5294 = vrot.lane.b32.xlu1 %v5293_v2, %s5825_s10  ;;  %v6359_v2 = vld [vmem:[%s5933_s30 + $0x92] sm:$0xff] }
  0x66   : > { %v5328_v55 = vpack.i.bf16 %v6359_v2, %v6090_v6 }
  0x67   : > { %5299 = vrot.lane.b32.xlu0 %v5298_v3, %s5825_s10  ;;  %v6362_v3 = vld [vmem:[%s5933_s30 + $0x9a] sm:$0xff] }
  0x68   : > { %v5333_v60 = vpack.i.bf16 %v6362_v3, %v6099_v10 }
  0x69   : > { %5304 = vrot.lane.b32.xlu1 %v5303_v28, %s5825_s10  ;;  %v6371_v28 = vld [vmem:[%s5933_s30 + $0xaa] sm:$0xff] }
  0x6a   : > { %v5338_v0 = vpack.i.bf16 %v6371_v28, %v6118_v19 }
  0x6b   : > { %5309 = vrot.lane.b32.xlu0 %v5308_v37, %s5825_s10  ;;  %v6374_v37 = vld [vmem:[%s5933_s30 + $0xb2] sm:$0xff] }
  0x6c   : > { %v5343_v6 = vpack.i.bf16 %v6374_v37, %v6127_v26 }
  0x6d   : > { %5314 = vrot.lane.b32.xlu1 %v5313_v42, %s5825_s10  ;;  %v6383_v42 = vld [vmem:[%s5933_s30 + $0xc2] sm:$0xff] }
  0x6e   : > { %v5348_v10 = vpack.i.bf16 %v6383_v42, %v6145_v35 }
  0x6f   : > { %5319 = vrot.lane.b32.xlu0 %v5318_v46, %s5825_s10  ;;  %v6386_v46 = vld [vmem:[%s5933_s30 + $0xca] sm:$0xff] }
  0x70   : > { %v5353_v19 = vpack.i.bf16 %v6386_v46, %v6151_v39 }
  0x71   : > { %5324 = vrot.lane.b32.xlu1 %v5323_v51, %s5825_s10  ;;  %v6395_v51 = vld [vmem:[%s5933_s30 + $0xda] sm:$0xff] }
  0x72   : > { %v5358_v26 = vpack.i.bf16 %v6395_v51, %v6170_v50 }
  0x73   : > { %5329 = vrot.lane.b32.xlu0 %v5328_v55, %s5825_s10  ;;  %v6398_v55 = vld [vmem:[%s5933_s30 + $0xe2] sm:$0xff] }
  0x74   : > { %v5363_v35 = vpack.i.bf16 %v6398_v55, %v6176_v54 }
  0x75   : > { %5334 = vrot.lane.b32.xlu1 %v5333_v60, %s5825_s10  ;;  %v6407_v60 = vld [vmem:[%s5933_s30 + $0xf2] sm:$0xff] }
  0x76   : > { %v5368_v39 = vpack.i.bf16 %v6407_v60, %v6195_v4  ;;  %v1219_v4 = vld [vmem:[%s8386_s1 + $0x208] sm:$0xff] }
  0x77   : > { %5339 = vrot.lane.b32.xlu0 %v5338_v0, %s5825_s10  ;;  %v6410_v0 = vld [vmem:[%s5933_s30 + $0xfa] sm:$0xff] }
  0x78   : > { %v5373_v50 = vpack.i.bf16 %v6410_v0, %v6201_v8 }
  0x79   : > { %5344 = vrot.lane.b32.xlu1 %v5343_v6, %s5825_s10  ;;  %v6419_v6 = vld [vmem:[%s5933_s30 + $0x10a] sm:$0xff] }
  0x7a   : > { %v5378_v54 = vpack.i.bf16 %v6419_v6, %v6220_v30 }
  0x7b   : > { %5349 = vrot.lane.b32.xlu0 %v5348_v10, %s5825_s10  ;;  %v6422_v10 = vld [vmem:[%s5933_s30 + $0x112] sm:$0xff] }
  0x7c   : > { %v5383_v8 = vpack.i.bf16 %v6422_v10, %v6226_v32  ;;  %v1221_v32 = vld [vmem:[%s8386_s1 + $0x218] sm:$0xff] }
  0x7d   : > { %5354 = vrot.lane.b32.xlu1 %v5353_v19, %s5825_s10  ;;  %v1218_v19 = vld [vmem:[%s8386_s1 + $0x200] sm:$0xff] }
  0x7f   : > { %5359 = vrot.lane.b32.xlu0 %v5358_v26, %s5825_s10  ;;  %v6437_v26 = vld [vmem:[%s5933_s30 + $0x122] sm:$0xff] }
  0x80   : > { %v5388_v30 = vpack.i.bf16 %v6437_v26, %v6245_v59 }
  0x81   : > { %5364 = vrot.lane.b32.xlu1 %v5363_v35, %s5825_s10  ;;  %v4745_v35 = vpack.c.bf16 %v1219_v4, %v1218_v19  ;;  %v6458_v4 = vld [vmem:[%s5933_s30 + $0x142] sm:$0xff] }
  0x83   : > { %5369 = vrot.lane.b32.xlu0 %v5368_v39, %s5825_s10  ;;  %v6440_v39 = vld [vmem:[%s5933_s30 + $0x12a] sm:$0xff]  ;;  %4746 = vmatprep.subr.bf16.mxu1 %v4745_v35 }
  0x84   : > { %4748 = vmatpush3.bf16.msra.mxu1 %v4745_v35  ;;  %v5393_v19 = vpack.i.bf16 %v6440_v39, %v6251_v63  ;;  %v1223_v63 = vld [vmem:[%s8386_s1 + $0x228] sm:$0xff] }
  0x85   : > { %5374 = vrot.lane.b32.xlu1 %v5373_v50, %s5825_s10  ;;  %v1220_v50 = vld [vmem:[%s8386_s1 + $0x210] sm:$0xff] }
  0x86   : > { %v4749_v59 = vpack.c.bf16 %v1221_v32, %v1220_v50  ;;  %v5403_v50 = vpack.i.bf16 %v6458_v4, %v6277_v49 }
  0x87   : > { %5379 = vrot.lane.b32.xlu0 %v5378_v54, %s5825_s10  ;;  %v6455_v54 = vld [vmem:[%s5933_s30 + $0x13a] sm:$0xff] }
  0x88   : > { %4750 = vmatprep.subr.bf16.mxu1 %v4749_v59  ;;  %v5398_v35 = vpack.i.bf16 %v6455_v54, %v6270_v40  ;;  %v6476_v40 = vld [vmem:[%s5933_s30 + $0x15a] sm:$0xff] }
  0x89   : > { %5384 = vrot.lane.b32.xlu1 %v5383_v8, %s5825_s10  ;;  %4752 = vmatpush3.bf16.msra.mxu1 %v4749_v59  ;;  %v1222_v8 = vld [vmem:[%s8386_s1 + $0x220] sm:$0xff] }
  0x8a   : > { %v4753_v32 = vpack.c.bf16 %v1223_v63, %v1222_v8  ;;  %v287_v59 = vld [vmem:[%s5933_s30 + $0x2] sm:$0xff]  ;;  %v1225_v8 = vld [vmem:[%s8386_s1 + $0x238] sm:$0xff] }
  0x8b   : > { %5389 = vrot.lane.b32.xlu0 %v5388_v30, %s5825_s10  ;;  %v6473_v30 = vld [vmem:[%s5933_s30 + $0x152] sm:$0xff]  ;;  %v1187_v63 = vld [vmem:[%s8386_s1 + $0x108] sm:$0xff] }
  0x8c   : > { %4754 = vmatprep.subr.bf16.mxu1 %v4753_v32  ;;  %v5408_v49 = vpack.i.bf16 %v6473_v30, %v6289_v14  ;;  %v4301_v14 = vld [vmem:[%s5933_s30 + $0x181] sm:$0xff]  ;;  %v4698_v20 = vpack.c.bf16 %v1187_v63, %v1186_v45  ;;  %v1189_v45 = vld [vmem:[%s8386_s1 + $0x118] sm:$0xff]  ;;  %v8444_v63 = vmov 0.0|0.0  }
  0x8d   : > { %5394 = vrot.lane.b32.xlu1 %v5393_v19, %s5825_s10  ;;  %4756 = vmatpush3.bf16.msra.mxu1 %v4753_v32  ;;  %v1224_v19 = vld [vmem:[%s8386_s1 + $0x230] sm:$0xff] }
  0x8e   : > { %v4757_v32 = vpack.c.bf16 %v1225_v8, %v1224_v19 }
  0x8f   : > { %5399 = vrot.lane.b32.xlu0 %v5398_v35, %s5825_s10  ;;  %v5413_v35 = vpack.i.bf16 %v6476_v40, %v6294_v9  ;;  %v5418_v9 = vpack.i.bf16 %v6498_v31, %v4301_v14 }
  0x90   : > { %4758 = vmatprep.subr.bf16.mxu1 %v4757_v32 }
  0x91   : > { %5404 = vrot.lane.b32.xlu1 %v5403_v50, %s5825_s10  ;;  %v5120_v13 = vpop.permute.xlu0 %5119  ;;  %4760 = vmatpush3.bf16.msra.mxu1 %v4757_v32 }
  0x92   : > { %v5122_v41 = vunpack.i.h.bf16 %v5120_v13  ;;  %v5121_v36 = vunpack.i.l.bf16 %v5120_v13  ;;  %v1188_v13 = vld [vmem:[%s8386_s1 + $0x110] sm:$0xff]  ;;  %4761 = vmatprep.subr.bf16.mxu1 %v8444_v63 }
  0x93   : > { %v5130_v27 = vpop.permute.xlu1 %5129  ;;  %5409 = vrot.lane.b32.xlu0 %v5408_v49, %s5825_s10  ;;  %v5423_v49 = vpack.i.bf16 %v6503_v58, %v4302_v53  ;;  %v4701_v1 = vpack.c.bf16 %v1189_v45, %v1188_v13 }
  0x94   : > { %v5131_v50 = vunpack.i.l.bf16 %v5130_v27  ;;  %v1058_v19 = vsel %vm1025_vm0, %v287_v59, %v5121_v36  ;;  %v1026_v8 = vsel %vm1025_vm0, %v223_v5, %v5122_v41  ;;  %v224_v36 = vld [vmem:[%s5933_s30 + $0x8] sm:$0xff]  ;;  %v4303_v41 = vld [vmem:[%s5933_s30 + $0x199] sm:$0xff]  ;;  %4538 = vmatmul.mubr.msk.f32.vlgmr.msra.gmra.mrb[0].mxu1 %vm1025_vm0, %v6314_v15 }
  0x95   : > { %5414 = vrot.lane.b32.xlu1 %v5413_v35, %s5825_s10  ;;  %v5125_v14 = vpop.permute.xlu0 %5124  ;;  %1393 = vmatprep.mubr.f32.mxu0 %v1058_v19  ;;  %v6522_v59 = vld [vmem:[%s5933_s30 + $0x182] sm:$0xff]  ;;  %v5132_v35 = vunpack.i.h.bf16 %v5130_v27 }
  0x96   : > { %v5127_v5 = vunpack.i.h.bf16 %v5125_v14  ;;  %v5126_v32 = vunpack.i.l.bf16 %v5125_v14  ;;  %1394 = vmatmul.mubr.f32.vlgmr.msra.gmra.mrb[0].mxu0 %v1026_v8  ;;  %v1060_v53 = vsel %vm1025_vm0, %v6302_v48, %v5131_v50  ;;  %v1190_v19 = vld [vmem:[%s8386_s1 + $0x120] sm:$0xff]  ;;  %v5428_v27 = vpack.i.bf16 %v6522_v59, %v4303_v41  ;;  %v6542_v48 = vld [vmem:[%s5933_s30 + $0x18a] sm:$0xff]  ;;  %4540 = vmatprep.mubr.msk.f32.mxu1 %vm1025_vm0, %v6323_v24 }
  0x97   : > { %v5135_v7 = vpop.permute.xlu1 %5134  ;;  %4699 = vmatpush1.bf16.msra.mxu0 %v4698_v20  ;;  %5419 = vrot.lane.b32.xlu0 %v5418_v9, %s5825_s10  ;;  %v1191_v20 = vld [vmem:[%s8386_s1 + $0x128] sm:$0xff]  ;;  %v1028_v45 = vsel %vm1025_vm0, %v5943_v12, %v5132_v35 }
  0x98   : > { %v1059_v8 = vsel %vm1025_vm0, %v288_v11, %v5126_v32  ;;  %v1027_v14 = vsel %vm1025_vm0, %v224_v36, %v5127_v5  ;;  %v5136_v61 = vunpack.i.l.bf16 %v5135_v7  ;;  %4700 = vmatprep.subr.bf16.mxu0 %v8444_v63  ;;  %v4304_v50 = vld [vmem:[%s5933_s30 + $0x1a1] sm:$0xff]  ;;  %4541 = vmatmul.mubr.msk.f32.gmra.mrb[2].mxu1 %vm1025_vm0, %v6326_v17  ;;  %v5137_v13 = vunpack.i.h.bf16 %v5135_v7  ;;  %v1192_v5 = vld [vmem:[%s8386_s1 + $0x130] sm:$0xff]  ;;  %v1193_v7 = vld [vmem:[%s8386_s1 + $0x138] sm:$0xff] }
  0x99   : > { %5424 = vrot.lane.b32.xlu1 %v5423_v49, %s5825_s10  ;;  %1398 = vmatprep.mubr.f32.mxu0 %v1059_v8  ;;  %v5140_v9 = vpop.permute.xlu0 %5139  ;;  %v5433_v11 = vpack.i.bf16 %v6542_v48, %v4304_v50  ;;  %v4704_v49 = vpack.c.bf16 %v1191_v20, %v1190_v19  ;;  %v1195_v19 = vld [vmem:[%s8386_s1 + $0x148] sm:$0xff]  ;;  %v1196_v50 = vld [vmem:[%s8386_s1 + $0x150] sm:$0xff] }
  0x9a   : > { %1399 = vmatmul.mubr.f32.gmra.mrb[2].mxu0 %v1027_v14  ;;  %v5141_v36 = vunpack.i.l.bf16 %v5140_v9  ;;  %v1061_v41 = vsel %vm1025_vm0, %v6305_v62, %v5136_v61  ;;  %4543 = vmatprep.mubr.msk.f32.mxu1 %vm1025_vm0, %v6335_v33  ;;  %v5142_v12 = vunpack.i.h.bf16 %v5140_v9  ;;  %v1029_v61 = vsel %vm1025_vm0, %v5948_v16, %v5137_v13  ;;  %v1197_v9 = vld [vmem:[%s8386_s1 + $0x158] sm:$0xff] }
  0x9b   : > { %1403 = vmatprep.mubr.f32.mxu0 %v1060_v53  ;;  %4702 = vmatpush1.bf16.msra.mxu0 %v4701_v1  ;;  %v5145_v32 = vpop.permute.xlu1 %5144  ;;  %v4707_v1 = vpack.c.bf16 %v1193_v7, %v1192_v5  ;;  %v1194_v53 = vld [vmem:[%s8386_s1 + $0x140] sm:$0xff]  ;;  %v4713_v13 = vpack.c.bf16 %v1197_v9, %v1196_v50  ;;  %v1204_v50 = vld [vmem:[%s8386_s1 + $0x190] sm:$0xff]  ;;  %v1205_v9 = vld [vmem:[%s8386_s1 + $0x198] sm:$0xff] }
  0x9c   : > { %4703 = vmatprep.subr.bf16.mxu0 %v8444_v63  ;;  %5429 = vrot.lane.b32.xlu0 %v5428_v27, %s5825_s10  ;;  %v5146_v62 = vunpack.i.l.bf16 %v5145_v32  ;;  %v1062_v35 = vsel %vm1025_vm0, %v6124_v23, %v5141_v36  ;;  %v5147_v8 = vunpack.i.h.bf16 %v5145_v32  ;;  %v1030_v23 = vsel %vm1025_vm0, %v5952_v18, %v5142_v12  ;;  %v1198_v36 = vld [vmem:[%s8386_s1 + $0x160] sm:$0xff] }
  0x9d   : > { %5434 = vrot.lane.b32.xlu1 %v5433_v11, %s5825_s10  ;;  %4544 = vmatmul.mubr.msk.f32.gmra.mrb[4].mxu1 %vm1025_vm0, %v6338_v22  ;;  %v5150_v16 = vpop.permute.xlu0 %5149  ;;  %v4710_v14 = vpack.c.bf16 %v1195_v19, %v1194_v53 }
  0x9e   : > { %1404 = vmatmul.mubr.f32.gmra.mrb[4].mxu0 %v1028_v45  ;;  %4546 = vmatprep.mubr.msk.f32.mxu1 %vm1025_vm0, %v6347_v57  ;;  %v5151_v20 = vunpack.i.l.bf16 %v5150_v16  ;;  %v1063_v27 = vsel %vm1025_vm0, %v6314_v15, %v5146_v62  ;;  %v5152_v11 = vunpack.i.h.bf16 %v5150_v16  ;;  %v1031_v15 = vsel %vm1025_vm0, %v5958_v21, %v5147_v8  ;;  %v1202_v16 = vld [vmem:[%s8386_s1 + $0x180] sm:$0xff]  ;;  %v1203_v8 = vld [vmem:[%s8386_s1 + $0x188] sm:$0xff] }
  0x9f   : > { %1408 = vmatprep.mubr.f32.mxu0 %v1061_v41  ;;  %4705 = vmatpush1.bf16.msra.mxu0 %v4704_v49  ;;  %v5155_v18 = vpop.permute.xlu1 %5154  ;;  %v1199_v41 = vld [vmem:[%s8386_s1 + $0x168] sm:$0xff] }
  0xa0   : > { %4706 = vmatprep.subr.bf16.mxu0 %v8444_v63  ;;  %v5156_v45 = vunpack.i.l.bf16 %v5155_v18  ;;  %v1064_v49 = vsel %vm1025_vm0, %v6323_v24, %v5151_v20  ;;  %v5157_v5 = vunpack.i.h.bf16 %v5155_v18  ;;  %v1032_v24 = vsel %vm1025_vm0, %v5968_v25, %v5152_v11 }
  0xa1   : > { %4547 = vmatmul.mubr.msk.f32.gmra.mrb[6].mxu1 %vm1025_vm0, %v6350_v44  ;;  %v5160_v21 = vpop.permute.xlu0 %5159  ;;  %v4716_v7 = vpack.c.bf16 %v1199_v41, %v1198_v36  ;;  %v4725_v11 = vpack.c.bf16 %v1205_v9, %v1204_v50 }
  0xa2   : > { %1409 = vmatmul.mubr.f32.gmra.mrb[6].mxu0 %v1029_v61  ;;  %4549 = vmatprep.mubr.msk.f32.mxu1 %vm1025_vm0, %v6359_v2  ;;  %v5161_v32 = vunpack.i.l.bf16 %v5160_v21  ;;  %v1065_v12 = vsel %vm1025_vm0, %v6326_v17, %v5156_v45  ;;  %v1200_v61 = vld [vmem:[%s8386_s1 + $0x170] sm:$0xff]  ;;  %v5162_v62 = vunpack.i.h.bf16 %v5160_v21  ;;  %v1033_v17 = vsel %vm1025_vm0, %v5977_v29, %v5157_v5  ;;  %v1206_v45 = vld [vmem:[%s8386_s1 + $0x1a0] sm:$0xff] }
  0xa3   : > { %1413 = vmatprep.mubr.f32.mxu0 %v1062_v35  ;;  %4708 = vmatpush1.bf16.msra.mxu0 %v4707_v1  ;;  %v1201_v1 = vld [vmem:[%s8386_s1 + $0x178] sm:$0xff]  ;;  %v5165_v25 = vpop.permute.xlu1 %5164 }
  0xa4   : > { %4709 = vmatprep.subr.bf16.mxu0 %v8444_v63  ;;  %v4719_v35 = vpack.c.bf16 %v1201_v1, %v1200_v61  ;;  %v5166_v53 = vunpack.i.l.bf16 %v5165_v25  ;;  %v1066_v19 = vsel %vm1025_vm0, %v6335_v33, %v5161_v32  ;;  %v1034_v33 = vsel %vm1025_vm0, %v5993_v34, %v5162_v62  ;;  %v1211_v62 = vld [vmem:[%s8386_s1 + $0x1c8] sm:$0xff] }
  0xa5   : > { %4550 = vmatmul.mubr.msk.f32.gmra.mrb[8].mxu1 %vm1025_vm0, %v6362_v3  ;;  %v5170_v29 = vpop.permute.xlu0 %5169 }
  0xa6   : > { %1414 = vmatmul.mubr.f32.gmra.mrb[8].mxu0 %v1030_v23  ;;  %4552 = vmatprep.mubr.msk.f32.mxu1 %vm1025_vm0, %v6371_v28  ;;  %v5167_v23 = vunpack.i.h.bf16 %v5165_v25  ;;  %v5171_v20 = vunpack.i.l.bf16 %v5170_v29  ;;  %v5172_v18 = vunpack.i.h.bf16 %v5170_v29  ;;  %v1210_v25 = vld [vmem:[%s8386_s1 + $0x1c0] sm:$0xff] }
  0xa7   : > { %1418 = vmatprep.mubr.f32.mxu0 %v1063_v27  ;;  %4711 = vmatpush1.bf16.msra.mxu0 %v4710_v14  ;;  %v4722_v14 = vpack.c.bf16 %v1203_v8, %v1202_v16  ;;  %v1067_v27 = vsel %vm1025_vm0, %v6338_v22, %v5166_v53  ;;  %v5175_v34 = vpop.permute.xlu1 %5174  ;;  %v1212_v16 = vld [vmem:[%s8386_s1 + $0x1d0] sm:$0xff]  ;;  %v1213_v8 = vld [vmem:[%s8386_s1 + $0x1d8] sm:$0xff] }
  0xa8   : > { %4712 = vmatprep.subr.bf16.mxu0 %v8444_v63  ;;  %v1035_v22 = vsel %vm1025_vm0, %v6002_v38, %v5167_v23  ;;  %v5177_v36 = vunpack.i.h.bf16 %v5175_v34  ;;  %v4737_v23 = vpack.c.bf16 %v1213_v8, %v1212_v16 }
  0xa9   : > { %4553 = vmatmul.mubr.msk.f32.gmra.mrb[10].mxu1 %vm1025_vm0, %v6374_v37  ;;  %v5180_v38 = vpop.permute.xlu0 %5179 }
  0xaa   : > { %1419 = vmatmul.mubr.f32.gmra.mrb[10].mxu0 %v1031_v15  ;;  %4555 = vmatprep.mubr.msk.f32.mxu1 %vm1025_vm0, %v6383_v42  ;;  %v5176_v15 = vunpack.i.l.bf16 %v5175_v34  ;;  %v5181_v21 = vunpack.i.l.bf16 %v5180_v38  ;;  %v5182_v32 = vunpack.i.h.bf16 %v5180_v38 }
  0xab   : > { %1423 = vmatprep.mubr.f32.mxu0 %v1064_v49  ;;  %4714 = vmatpush1.bf16.msra.mxu0 %v4713_v13  ;;  %v1068_v13 = vsel %vm1025_vm0, %v6347_v57, %v5171_v20  ;;  %v1207_v49 = vld [vmem:[%s8386_s1 + $0x1a8] sm:$0xff]  ;;  %v1036_v57 = vsel %vm1025_vm0, %v6018_v43, %v5172_v18  ;;  %v5185_v43 = vpop.permute.xlu1 %5184  ;;  %v1214_v20 = vld [vmem:[%s8386_s1 + $0x1e0] sm:$0xff] }
  0xac   : > { %4715 = vmatprep.subr.bf16.mxu0 %v8444_v63  ;;  %v4728_v41 = vpack.c.bf16 %v1207_v49, %v1206_v45  ;;  %v1069_v5 = vsel %vm1025_vm0, %v6350_v44, %v5176_v15  ;;  %v1037_v44 = vsel %vm1025_vm0, %v6027_v47, %v5177_v36  ;;  %v5186_v61 = vunpack.i.l.bf16 %v5185_v43  ;;  %v1217_v15 = vld [vmem:[%s8386_s1 + $0x1f8] sm:$0xff] }
  0xad   : > { %4556 = vmatmul.mubr.msk.f32.gmra.mrb[12].mxu1 %vm1025_vm0, %v6386_v46  ;;  %v1070_v1 = vsel %vm1025_vm0, %v6359_v2, %v5181_v21  ;;  %v5190_v47 = vpop.permute.xlu0 %5189  ;;  %v1038_v2 = vsel %vm1025_vm0, %v6043_v52, %v5182_v32  ;;  %v8447_v21 = vld [vmem:[#allocation8_spill] sm:$0xff]  ;;  %v8448_v32 = vld [vmem:[#allocation9_spill] sm:$0xff] }
  0xae   : > { %1424 = vmatmul.mubr.f32.gmra.mrb[12].mxu0 %v1032_v24  ;;  %4558 = vmatprep.mubr.msk.f32.mxu1 %vm1025_vm0, %v6395_v51  ;;  %v1208_v24 = vld [vmem:[%s8386_s1 + $0x1b0] sm:$0xff]  ;;  %v5191_v53 = vunpack.i.l.bf16 %v5190_v47  ;;  %v5192_v29 = vunpack.i.h.bf16 %v5190_v47 }
  0xaf   : > { %1428 = vmatprep.mubr.f32.mxu0 %v1065_v12  ;;  %4717 = vmatpush1.bf16.msra.mxu0 %v4716_v7  ;;  %v1209_v7 = vld [vmem:[%s8386_s1 + $0x1b8] sm:$0xff]  ;;  %v5195_v52 = vpop.permute.xlu1 %5194 }
  0xb0   : > { %4718 = vmatprep.subr.bf16.mxu0 %v8444_v63  ;;  %v4731_v12 = vpack.c.bf16 %v1209_v7, %v1208_v24  ;;  %v5197_v50 = vunpack.i.h.bf16 %v5195_v52 }
  0xb1   : > { %4559 = vmatmul.mubr.msk.f32.gmra.mrb[14].mxu1 %vm1025_vm0, %v6398_v55 }
  0xb2   : > { %1429 = vmatmul.mubr.f32.gmra.mrb[14].mxu0 %v1033_v17  ;;  %4561 = vmatprep.mubr.msk.f32.mxu1 %vm1025_vm0, %v6407_v60  ;;  %v5187_v17 = vunpack.i.h.bf16 %v5185_v43 }
  0xb3   : > { %1433 = vmatprep.mubr.f32.mxu0 %v1066_v19  ;;  %4720 = vmatpush1.bf16.msra.mxu0 %v4719_v35  ;;  %v4734_v35 = vpack.c.bf16 %v1211_v62, %v1210_v25  ;;  %v1071_v19 = vsel %vm1025_vm0, %v6362_v3, %v5186_v61  ;;  %v8449_v25 = vld [vmem:[#allocation10_spill] sm:$0xff] }
  0xb4   : > { %4721 = vmatprep.subr.bf16.mxu0 %v8444_v63  ;;  %v1039_v3 = vsel %vm1025_vm0, %v6052_v56, %v5187_v17  ;;  %v5200_v56 = vpop.permute.xlu0 %5199 }
  0xb5   : > { %4562 = vmatmul.mubr.msk.f32.gmra.mrb[16].mxu1 %vm1025_vm0, %v6410_v0  ;;  %v5201_v18 = vunpack.i.l.bf16 %v5200_v56  ;;  %v5202_v45 = vunpack.i.h.bf16 %v5200_v56 }
  0xb6   : > { %1434 = vmatmul.mubr.f32.gmra.mrb[16].mxu0 %v1034_v33  ;;  %4564 = vmatprep.mubr.msk.f32.mxu1 %vm1025_vm0, %v6419_v6  ;;  %v5196_v33 = vunpack.i.l.bf16 %v5195_v52  ;;  %v8451_v52 = vld [vmem:[#allocation12_spill] sm:$0xff] }
  0xb7   : > { %1438 = vmatprep.mubr.f32.mxu0 %v1067_v27  ;;  %4723 = vmatpush1.bf16.msra.mxu0 %v4722_v14  ;;  %v1072_v14 = vsel %vm1025_vm0, %v6371_v28, %v5191_v53  ;;  %v1215_v27 = vld [vmem:[%s8386_s1 + $0x1e8] sm:$0xff]  ;;  %v8445_v28 = vld [vmem:[#allocation6_spill] sm:$0xff] }
  0xb8   : > { %4724 = vmatprep.subr.bf16.mxu0 %v8444_v63  ;;  %v1040_v9 = vsel %vm1025_vm0, %v8445_v28, %v5192_v29  ;;  %v4740_v34 = vpack.c.bf16 %v1215_v27, %v1214_v20  ;;  %v8453_v28 = vld [vmem:[#allocation14_spill] sm:$0xff] }
  0xb9   : > { %4565 = vmatmul.mubr.msk.f32.gmra.mrb[18].mxu1 %vm1025_vm0, %v6422_v10 }
  0xba   : > { %1439 = vmatmul.mubr.f32.gmra.mrb[18].mxu0 %v1035_v22  ;;  %4567 = vmatprep.mubr.msk.f32.mxu1 %vm1025_vm0, %v6437_v26  ;;  %v1073_v22 = vsel %vm1025_vm0, %v6374_v37, %v5196_v33  ;;  %v8446_v37 = vld [vmem:[#allocation7_spill] sm:$0xff] }
  0xbb   : > { %1443 = vmatprep.mubr.f32.mxu0 %v1068_v13  ;;  %4726 = vmatpush1.bf16.msra.mxu0 %v4725_v11  ;;  %v1216_v11 = vld [vmem:[%s8386_s1 + $0x1f0] sm:$0xff]  ;;  %v5205_v13 = vpop.permute.xlu1 %5204  ;;  %v1041_v49 = vsel %vm1025_vm0, %v8446_v37, %v5197_v50 }
  0xbc   : > { %4727 = vmatprep.subr.bf16.mxu0 %v8444_v63  ;;  %v4743_v38 = vpack.c.bf16 %v1217_v15, %v1216_v11  ;;  %v5206_v36 = vunpack.i.l.bf16 %v5205_v13  ;;  %v8454_v11 = vld [vmem:[#allocation15_spill] sm:$0xff] }
  0xbd   : > { %4568 = vmatmul.mubr.msk.f32.gmra.mrb[20].mxu1 %vm1025_vm0, %v6440_v39 }
  0xbe   : > { %1444 = vmatmul.mubr.f32.gmra.mrb[20].mxu0 %v1036_v57  ;;  %4570 = vmatprep.mubr.msk.f32.mxu1 %vm1025_vm0, %v6455_v54  ;;  %v1074_v57 = vsel %vm1025_vm0, %v6383_v42, %v5201_v18  ;;  %v1075_v24 = vsel %vm1025_vm0, %v6386_v46, %v5206_v36 }
  0xbf   : > { %1448 = vmatprep.mubr.f32.mxu0 %v1069_v5  ;;  %4729 = vmatpush1.bf16.msra.mxu0 %v4728_v41  ;;  %v5210_v41 = vpop.permute.xlu0 %5209  ;;  %v5215_v7 = vpop.permute.xlu1 %5214 }
  0xc0   : > { %4730 = vmatprep.subr.bf16.mxu0 %v8444_v63  ;;  %v5211_v5 = vunpack.i.l.bf16 %v5210_v41  ;;  %v5212_v43 = vunpack.i.h.bf16 %v5210_v41 }
  0xc1   : > { %4571 = vmatmul.mubr.msk.f32.gmra.mrb[22].mxu1 %vm1025_vm0, %v6458_v4 }
  0xc2   : > { %1449 = vmatmul.mubr.f32.gmra.mrb[22].mxu0 %v1037_v44  ;;  %4573 = vmatprep.mubr.msk.f32.mxu1 %vm1025_vm0, %v6473_v30  ;;  %v5216_v44 = vunpack.i.l.bf16 %v5215_v7  ;;  %v1044_v62 = vsel %vm1025_vm0, %v8449_v25, %v5212_v43 }
  0xc3   : > { %1453 = vmatprep.mubr.f32.mxu0 %v1070_v1  ;;  %4732 = vmatpush1.bf16.msra.mxu0 %v4731_v12  ;;  %v1076_v12 = vsel %vm1025_vm0, %v6395_v51, %v5211_v5  ;;  %v5220_v61 = vpop.permute.xlu0 %5219  ;;  %v5217_v1 = vunpack.i.h.bf16 %v5215_v7  ;;  %v5225_v17 = vpop.permute.xlu1 %5224  ;;  %v8457_v7 = vld [vmem:[#allocation18_spill] sm:$0xff] }
  0xc4   : > { %4733 = vmatprep.subr.bf16.mxu0 %v8444_v63  ;;  %v5221_v47 = vunpack.i.l.bf16 %v5220_v61  ;;  %v1077_v46 = vsel %vm1025_vm0, %v6398_v55, %v5216_v44  ;;  %v5227_v8 = vunpack.i.h.bf16 %v5225_v17 }
  0xc5   : > { %4574 = vmatmul.mubr.msk.f32.gmra.mrb[24].mxu1 %vm1025_vm0, %v6476_v40 }
  0xc6   : > { %1454 = vmatmul.mubr.f32.gmra.mrb[24].mxu0 %v1038_v2  ;;  %4576 = vmatprep.mubr.msk.f32.mxu1 %vm1025_vm0, %v6498_v31  ;;  %v5222_v2 = vunpack.i.h.bf16 %v5220_v61  ;;  %v1078_v51 = vsel %vm1025_vm0, %v6407_v60, %v5221_v47  ;;  %v8459_v47 = vld [vmem:[#allocation20_spill] sm:$0xff] }
  0xc7   : > { %1458 = vmatprep.mubr.f32.mxu0 %v1071_v19  ;;  %4735 = vmatpush1.bf16.msra.mxu0 %v4734_v35  ;;  %v8450_v35 = vld [vmem:[#allocation11_spill] sm:$0xff]  ;;  %v5226_v19 = vunpack.i.l.bf16 %v5225_v17  ;;  %v5230_v16 = vpop.permute.xlu0 %5229 }
  0xc8   : > { %4736 = vmatprep.subr.bf16.mxu0 %v8444_v63  ;;  %v1045_v53 = vsel %vm1025_vm0, %v8450_v35, %v5217_v1  ;;  %v1046_v29 = vsel %vm1025_vm0, %v8451_v52, %v5222_v2  ;;  %v5232_v33 = vunpack.i.h.bf16 %v5230_v16 }
  0xc9   : > { %4577 = vmatmul.mubr.msk.f32.gmra.mrb[26].mxu1 %vm1025_vm0, %v6503_v58  ;;  %v1079_v55 = vsel %vm1025_vm0, %v6410_v0, %v5226_v19 }
  0xca   : > { %1459 = vmatmul.mubr.f32.gmra.mrb[26].mxu0 %v1039_v3  ;;  %4579 = vmatprep.mubr.msk.f32.mxu1 %vm1025_vm0, %v6522_v59  ;;  %v5207_v59 = vunpack.i.h.bf16 %v5205_v13  ;;  %v5231_v3 = vunpack.i.l.bf16 %v5230_v16 }
  0xcb   : > { %1463 = vmatprep.mubr.f32.mxu0 %v1072_v14  ;;  %4738 = vmatpush1.bf16.msra.mxu0 %v4737_v23  ;;  %v5235_v23 = vpop.permute.xlu1 %5234  ;;  %v8452_v14 = vld [vmem:[#allocation13_spill] sm:$0xff]  ;;  %v5240_v56 = vpop.permute.xlu0 %5239 }
  0xcc   : > { %4739 = vmatprep.subr.bf16.mxu0 %v8444_v63  ;;  %v1043_v42 = vsel %vm1025_vm0, %v8448_v32, %v5207_v59  ;;  %v1047_v20 = vsel %vm1025_vm0, %v8452_v14, %v5227_v8  ;;  %v5236_v27 = vunpack.i.l.bf16 %v5235_v23  ;;  %v1080_v60 = vsel %vm1025_vm0, %v6419_v6, %v5231_v3  ;;  %v8456_v59 = vld [vmem:[#allocation17_spill] sm:$0xff]  ;;  %v4335_v8 = vld [vmem:[%s5933_s30 + $0x19a] sm:$0xff] }
  0xcd   : > { %4580 = vmatmul.mubr.msk.f32.gmra.mrb[28].mxu1 %vm1025_vm0, %v6542_v48  ;;  %v1042_v48 = vsel %vm1025_vm0, %v8447_v21, %v5202_v45  ;;  %v5237_v50 = vunpack.i.h.bf16 %v5235_v23  ;;  %v4336_v14 = vld [vmem:[%s5933_s30 + $0x1a2] sm:$0xff] }
  0xce   : > { %1464 = vmatmul.mubr.f32.gmra.mrb[28].mxu0 %v1040_v9  ;;  %v1048_v9 = vsel %vm1025_vm0, %v8453_v28, %v5232_v33  ;;  %v1081_v0 = vsel %vm1025_vm0, %v6422_v10, %v5236_v27  ;;  %4582 = vmatprep.mubr.msk.f32.mxu1 %vm1025_vm0, %v4335_v8  ;;  %v4241_v33 = vld [vmem:[%s5933_s30 + $0x30] sm:$0xff] }
  0xcf   : > { %1468 = vmatprep.mubr.f32.mxu0 %v1073_v22  ;;  %4741 = vmatpush1.bf16.msra.mxu0 %v4740_v34  ;;  %v5241_v34 = vunpack.i.l.bf16 %v5240_v56  ;;  %v5245_v18 = vpop.permute.xlu1 %5244  ;;  %v5242_v22 = vunpack.i.h.bf16 %v5240_v56  ;;  %v1049_v15 = vsel %vm1025_vm0, %v8454_v11, %v5237_v50  ;;  %v5250_v45 = vpop.permute.xlu0 %5249  ;;  %v4177_v50 = vld [vmem:[%s5933_s30 + $0x19] sm:$0xff]  ;;  %v4184_v8 = vld [vmem:[%s5933_s30 + $0x69] sm:$0xff] }
  0xd0   : > { %4742 = vmatprep.subr.bf16.mxu0 %v8444_v63  ;;  %v5246_v13 = vunpack.i.l.bf16 %v5245_v18  ;;  %v5247_v37 = vunpack.i.h.bf16 %v5245_v18  ;;  %v5251_v36 = vunpack.i.l.bf16 %v5250_v45  ;;  %v5252_v41 = vunpack.i.h.bf16 %v5250_v45 }
  0xd1   : > { %v1082_v6 = vsel %vm1025_vm0, %v6437_v26, %v5241_v34  ;;  %4583 = vmatmul.mubr.msk.f32.gmra.mrb[30].mxu1 %vm1025_vm0, %v4336_v14 }
  0xd2   : > { %1469 = vmatmul.mubr.f32.gmra.mrb[30].mxu0 %v1041_v49  ;;  %v8455_v49 = vld [vmem:[#allocation16_spill] sm:$0xff]  ;;  %v1083_v10 = vsel %vm1025_vm0, %v6440_v39, %v5246_v13  ;;  %v1051_v21 = vsel %vm1025_vm0, %v8456_v59, %v5247_v37  ;;  %v1084_v26 = vsel %vm1025_vm0, %v6455_v54, %v5251_v36  ;;  %v1052_v43 = vsel %vm1025_vm0, %v8457_v7, %v5252_v41  ;;  %v4244_v36 = vld [vmem:[%s5933_s30 + $0x50] sm:$0xff] }
  0xd3   : > { %1473 = vmatprep.mubr.f32.mxu0 %v1074_v57  ;;  %4744 = vmatpush1.bf16.msra.mxu0 %v4743_v38  ;;  %v1050_v38 = vsel %vm1025_vm0, %v8455_v49, %v5242_v22  ;;  %v5255_v57 = vpop.permute.xlu1 %5254  ;;  %v5260_v5 = vpop.permute.xlu0 %5259  ;;  %v4178_v22 = vld [vmem:[%s5933_s30 + $0x21] sm:$0xff]  ;;  %v4179_v49 = vld [vmem:[%s5933_s30 + $0x31] sm:$0xff] }
  0xd4   : > { %v5261_v32 = vunpack.i.l.bf16 %v5260_v5  ;;  %v5262_v44 = vunpack.i.h.bf16 %v5260_v5 }
  0xd6   : > { %1474 = vmatmul.mubr.f32.gmra.mrb[32].mxu0 %v1042_v48  ;;  %v5256_v48 = vunpack.i.l.bf16 %v5255_v57  ;;  %v1086_v54 = vsel %vm1025_vm0, %v6473_v30, %v5261_v32  ;;  %v4181_v32 = vld [vmem:[%s5933_s30 + $0x49] sm:$0xff] }
  0xd7   : > { %1478 = vmatprep.mubr.f32.mxu0 %v1075_v24  ;;  %v5257_v24 = vunpack.i.h.bf16 %v5255_v57  ;;  %v5270_v25 = vpop.permute.xlu0 %5269 }
  0xd8   : > { %v1085_v39 = vsel %vm1025_vm0, %v6458_v4, %v5256_v48  ;;  %v5271_v4 = vunpack.i.l.bf16 %v5270_v25  ;;  %v5272_v35 = vunpack.i.h.bf16 %v5270_v25 }
  0xda   : > { %1479 = vmatmul.mubr.f32.gmra.mrb[34].mxu0 %v1043_v42  ;;  %v5265_v42 = vpop.permute.xlu1 %5264 }
  0xdb   : > { %1483 = vmatprep.mubr.f32.mxu0 %v1076_v12  ;;  %v8458_v12 = vld [vmem:[#allocation19_spill] sm:$0xff]  ;;  %v5266_v1 = vunpack.i.l.bf16 %v5265_v42  ;;  %v5280_v16 = vpop.permute.xlu0 %5279 }
  0xdc   : > { %v1053_v61 = vsel %vm1025_vm0, %v8458_v12, %v5257_v24  ;;  %v5281_v3 = vunpack.i.l.bf16 %v5280_v16 }
  0xdd   : > { %v1087_v17 = vsel %vm1025_vm0, %v6476_v40, %v5266_v1  ;;  %v8461_v40 = vld [vmem:[#allocation22_spill] sm:$0xff] }
  0xde   : > { %1484 = vmatmul.mubr.f32.gmra.mrb[36].mxu0 %v1044_v62  ;;  %v5267_v62 = vunpack.i.h.bf16 %v5265_v42  ;;  %v5275_v2 = vpop.permute.xlu1 %5274  ;;  %v1122_v56 = vsel %vm1025_vm0, %v4241_v33, %v5281_v3  ;;  %v4246_v42 = vld [vmem:[%s5933_s30 + $0x68] sm:$0xff]  ;;  %v4185_v33 = vld [vmem:[%s5933_s30 + $0x79] sm:$0xff] }
  0xdf   : > { %1488 = vmatprep.mubr.f32.mxu0 %v1077_v46  ;;  %v1054_v46 = vsel %vm1025_vm0, %v8459_v47, %v5262_v44  ;;  %v5276_v19 = vunpack.i.l.bf16 %v5275_v2  ;;  %v5277_v52 = vunpack.i.h.bf16 %v5275_v2  ;;  %v5290_v28 = vpop.permute.xlu0 %5289  ;;  %v4183_v2 = vld [vmem:[%s5933_s30 + $0x61] sm:$0xff] }
  0xe0   : > { %v5292_v13 = vunpack.i.h.bf16 %v5290_v28 }
  0xe2   : > { %1489 = vmatmul.mubr.f32.gmra.mrb[38].mxu0 %v1045_v53  ;;  %v8460_v53 = vld [vmem:[#allocation21_spill] sm:$0xff]  ;;  %v5285_v23 = vpop.permute.xlu1 %5284  ;;  %v1092_v57 = vsel %vm1025_vm0, %v4179_v49, %v5292_v13  ;;  %v4188_v49 = vld [vmem:[%s5933_s30 + $0x99] sm:$0xff] }
  0xe3   : > { %1493 = vmatprep.mubr.f32.mxu0 %v1078_v51  ;;  %v1055_v30 = vsel %vm1025_vm0, %v8460_v53, %v5267_v62  ;;  %v1088_v51 = vsel %vm1025_vm0, %v6498_v31, %v5271_v4  ;;  %v5282_v31 = vunpack.i.h.bf16 %v5280_v16  ;;  %v4247_v62 = vld [vmem:[%s5933_s30 + $0x78] sm:$0xff]  ;;  %v4248_v53 = vld [vmem:[%s5933_s30 + $0x80] sm:$0xff] }
  0xe5   : > { %v1090_v34 = vsel %vm1025_vm0, %v4177_v50, %v5282_v31  ;;  %v4250_v31 = vld [vmem:[%s5933_s30 + $0x98] sm:$0xff]  ;;  %v4186_v50 = vld [vmem:[%s5933_s30 + $0x81] sm:$0xff] }
  0xe6   : > { %1494 = vmatmul.mubr.f32.gmra.mrb[40].mxu0 %v1046_v29  ;;  %v1056_v29 = vsel %vm1025_vm0, %v8461_v40, %v5272_v35  ;;  %v5295_v11 = vpop.permute.xlu1 %5294  ;;  %v4249_v40 = vld [vmem:[%s5933_s30 + $0x90] sm:$0xff] }
  0xe7   : > { %1498 = vmatprep.mubr.f32.mxu0 %v1079_v55  ;;  %v1089_v55 = vsel %vm1025_vm0, %v6503_v58, %v5276_v19  ;;  %v5287_v58 = vunpack.i.h.bf16 %v5285_v23  ;;  %v5296_v45 = vunpack.i.l.bf16 %v5295_v11 }
  0xe9   : > { %v1125_v59 = vsel %vm1025_vm0, %v4244_v36, %v5296_v45  ;;  %v4253_v36 = vld [vmem:[%s5933_s30 + $0xc0] sm:$0xff] }
  0xea   : > { %1499 = vmatmul.mubr.f32.gmra.mrb[42].mxu0 %v1047_v20  ;;  %v8462_v20 = vld [vmem:[#allocation23_spill] sm:$0xff]  ;;  %v5305_v48 = vpop.permute.xlu1 %5304 }
  0xeb   : > { %1503 = vmatprep.mubr.f32.mxu0 %v1080_v60  ;;  %v1057_v27 = vsel %vm1025_vm0, %v8462_v20, %v5277_v52  ;;  %v5286_v60 = vunpack.i.l.bf16 %v5285_v23  ;;  %v5306_v7 = vunpack.i.l.bf16 %v5305_v48  ;;  %v5307_v44 = vunpack.i.h.bf16 %v5305_v48 }
  0xed   : > { %v1127_v1 = vsel %vm1025_vm0, %v4246_v42, %v5306_v7  ;;  %v4255_v42 = vld [vmem:[%s5933_s30 + $0xd8] sm:$0xff] }
  0xee   : > { %1504 = vmatmul.mubr.f32.gmra.mrb[44].mxu0 %v1048_v9  ;;  %v4242_v9 = vld [vmem:[%s5933_s30 + $0x38] sm:$0xff]  ;;  %v5315_v25 = vpop.permute.xlu1 %5314 }
  0xef   : > { %1508 = vmatprep.mubr.f32.mxu0 %v1081_v0  ;;  %v5291_v0 = vunpack.i.l.bf16 %v5290_v28  ;;  %v1123_v18 = vsel %vm1025_vm0, %v4242_v9, %v5286_v60  ;;  %v5316_v4 = vunpack.i.l.bf16 %v5315_v25  ;;  %v4251_v9 = vld [vmem:[%s5933_s30 + $0xa8] sm:$0xff] }
  0xf1   : > { %v1129_v16 = vsel %vm1025_vm0, %v4248_v53, %v5316_v4  ;;  %v4257_v53 = vld [vmem:[%s5933_s30 + $0xf0] sm:$0xff] }
  0xf2   : > { %1509 = vmatmul.mubr.f32.gmra.mrb[46].mxu0 %v1049_v15  ;;  %v4243_v15 = vld [vmem:[%s5933_s30 + $0x48] sm:$0xff]  ;;  %v5325_v52 = vpop.permute.xlu1 %5324 }
  0xf3   : > { %1513 = vmatprep.mubr.f32.mxu0 %v1082_v6  ;;  %v1091_v6 = vsel %vm1025_vm0, %v4178_v22, %v5287_v58  ;;  %v1124_v37 = vsel %vm1025_vm0, %v4243_v15, %v5291_v0  ;;  %v5327_v20 = vunpack.i.h.bf16 %v5325_v52  ;;  %v4187_v22 = vld [vmem:[%s5933_s30 + $0x91] sm:$0xff] }
  0xf4   : > { %v4252_v15 = vld [vmem:[%s5933_s30 + $0xb0] sm:$0xff] }
  0xf6   : > { %1514 = vmatmul.mubr.f32.gmra.mrb[48].mxu0 %v1050_v38  ;;  %v5300_v38 = vpop.permute.xlu0 %5299  ;;  %v5335_v28 = vpop.permute.xlu1 %5334 }
  0xf7   : > { %1518 = vmatprep.mubr.f32.mxu0 %v1083_v10  ;;  %v5297_v10 = vunpack.i.h.bf16 %v5295_v11  ;;  %v5301_v41 = vunpack.i.l.bf16 %v5300_v38  ;;  %v5302_v5 = vunpack.i.h.bf16 %v5300_v38  ;;  %v5336_v0 = vunpack.i.l.bf16 %v5335_v28 }
  0xf8   : > { %v5337_v13 = vunpack.i.h.bf16 %v5335_v28 }
  0xf9   : > { %v1094_v12 = vsel %vm1025_vm0, %v4181_v32, %v5302_v5  ;;  %v4190_v32 = vld [vmem:[%s5933_s30 + $0xb1] sm:$0xff] }
  0xfa   : > { %1519 = vmatmul.mubr.f32.gmra.mrb[50].mxu0 %v1051_v21  ;;  %v4180_v21 = vld [vmem:[%s5933_s30 + $0x39] sm:$0xff]  ;;  %v5345_v38 = vpop.permute.xlu1 %5344 }
  0xfb   : > { %1523 = vmatprep.mubr.f32.mxu0 %v1084_v26  ;;  %v4245_v26 = vld [vmem:[%s5933_s30 + $0x60] sm:$0xff]  ;;  %v1093_v24 = vsel %vm1025_vm0, %v4180_v21, %v5297_v10  ;;  %v4189_v21 = vld [vmem:[%s5933_s30 + $0xa9] sm:$0xff]  ;;  %v5347_v5 = vunpack.i.h.bf16 %v5345_v38 }
  0xfe   : > { %1524 = vmatmul.mubr.f32.gmra.mrb[52].mxu0 %v1052_v43  ;;  %v1126_v43 = vsel %vm1025_vm0, %v4245_v26, %v5301_v41  ;;  %v5346_v41 = vunpack.i.l.bf16 %v5345_v38  ;;  %v4254_v26 = vld [vmem:[%s5933_s30 + $0xc8] sm:$0xff] }
  0xff   : > { %1528 = vmatprep.mubr.f32.mxu0 %v1085_v39  ;;  %v5310_v39 = vpop.permute.xlu0 %5309 }
 0x100   : > { %v5312_v47 = vunpack.i.h.bf16 %v5310_v39 }
 0x102   : > { %1529 = vmatmul.mubr.f32.gmra.mrb[54].mxu0 %v1053_v61  ;;  %v5311_v61 = vunpack.i.l.bf16 %v5310_v39  ;;  %v1096_v19 = vsel %vm1025_vm0, %v4183_v2, %v5312_v47  ;;  %v5355_v39 = vpop.permute.xlu1 %5354  ;;  %v4192_v2 = vld [vmem:[%s5933_s30 + $0xc9] sm:$0xff] }
 0x103   : > { %1533 = vmatprep.mubr.f32.mxu0 %v1086_v54  ;;  %v4182_v54 = vld [vmem:[%s5933_s30 + $0x51] sm:$0xff]  ;;  %v5320_v35 = vpop.permute.xlu0 %5319  ;;  %v5357_v47 = vunpack.i.h.bf16 %v5355_v39 }
 0x106   : > { %1534 = vmatmul.mubr.f32.gmra.mrb[56].mxu0 %v1054_v46  ;;  %v1095_v46 = vsel %vm1025_vm0, %v4182_v54, %v5307_v44  ;;  %v4191_v54 = vld [vmem:[%s5933_s30 + $0xc1] sm:$0xff] }
 0x107   : > { %1538 = vmatprep.mubr.f32.mxu0 %v1087_v17  ;;  %v1128_v17 = vsel %vm1025_vm0, %v4247_v62, %v5311_v61  ;;  %v5330_v14 = vpop.permute.xlu0 %5329  ;;  %v5356_v61 = vunpack.i.l.bf16 %v5355_v39  ;;  %v4256_v62 = vld [vmem:[%s5933_s30 + $0xe0] sm:$0xff] }
 0x108   : > { %v5331_v60 = vunpack.i.l.bf16 %v5330_v14  ;;  %v5332_v58 = vunpack.i.h.bf16 %v5330_v14 }
 0x10a   : > { %1539 = vmatmul.mubr.f32.gmra.mrb[58].mxu0 %v1055_v30  ;;  %v5317_v30 = vunpack.i.h.bf16 %v5315_v25 }
 0x10b   : > { %1543 = vmatprep.mubr.f32.mxu0 %v1088_v51  ;;  %v5321_v51 = vunpack.i.l.bf16 %v5320_v35  ;;  %v5340_v11 = vpop.permute.xlu0 %5339 }
 0x10c   : > { %v1097_v3 = vsel %vm1025_vm0, %v4184_v8, %v5317_v30  ;;  %v5341_v45 = vunpack.i.l.bf16 %v5340_v11  ;;  %v5342_v10 = vunpack.i.h.bf16 %v5340_v11  ;;  %v4193_v8 = vld [vmem:[%s5933_s30 + $0xd9] sm:$0xff] }
 0x10d   : > { %v1130_v23 = vsel %vm1025_vm0, %v4249_v40, %v5321_v51  ;;  %v4258_v40 = vld [vmem:[%s5933_s30 + $0xf8] sm:$0xff] }
 0x10e   : > { %1544 = vmatmul.mubr.f32.gmra.mrb[60].mxu0 %v1056_v29  ;;  %v5322_v29 = vunpack.i.h.bf16 %v5320_v35  ;;  %v5365_v35 = vpop.permute.xlu1 %5364 }
 0x10f   : > { %1548 = vmatprep.mubr.f32.mxu0 %v1089_v55  ;;  %v5326_v55 = vunpack.i.l.bf16 %v5325_v52  ;;  %v5350_v48 = vpop.permute.xlu0 %5349  ;;  %v5366_v51 = vunpack.i.l.bf16 %v5365_v35 }
 0x110   : > { %v5351_v7 = vunpack.i.l.bf16 %v5350_v48  ;;  %v5352_v44 = vunpack.i.h.bf16 %v5350_v48 }
 0x112   : > { %1549 = vmatmul.mubr.f32.gmra.mrb[62].mxu0 %v1057_v27  ;;  %v1098_v27 = vsel %vm1025_vm0, %v4185_v33, %v5322_v29  ;;  %v5367_v29 = vunpack.i.h.bf16 %v5365_v35  ;;  %v4194_v33 = vld [vmem:[%s5933_s30 + $0xe1] sm:$0xff]  ;;  %v5375_v14 = vpop.permute.xlu1 %5374 }
 0x113   : > { %1618 = vmatprep.mubr.f32.mxu0 %v1122_v56  ;;  %v1131_v56 = vsel %vm1025_vm0, %v4250_v31, %v5326_v55  ;;  %v5360_v25 = vpop.permute.xlu0 %5359  ;;  %v4259_v31 = vld [vmem:[%s5933_s30 + $0x108] sm:$0xff] }
 0x114   : > { %v5361_v4 = vunpack.i.l.bf16 %v5360_v25  ;;  %v5362_v30 = vunpack.i.h.bf16 %v5360_v25 }
 0x116   : > { %1619 = vmatmul.mubr.f32.vlgmr.msra.gmra.mrb[0].mxu0 %v1090_v34  ;;  %v1099_v34 = vsel %vm1025_vm0, %v4186_v50, %v5327_v20  ;;  %v4195_v50 = vld [vmem:[%s5933_s30 + $0xf1] sm:$0xff]  ;;  %v5385_v11 = vpop.permute.xlu1 %5384 }
 0x117   : > { %1623 = vmatprep.mubr.f32.mxu0 %v1123_v18  ;;  %v1132_v18 = vsel %vm1025_vm0, %v4251_v9, %v5331_v60  ;;  %v5370_v52 = vpop.permute.xlu0 %5369  ;;  %v5376_v60 = vunpack.i.l.bf16 %v5375_v14  ;;  %v4260_v9 = vld [vmem:[%s5933_s30 + $0x110] sm:$0xff] }
 0x118   : > { %v5371_v55 = vunpack.i.l.bf16 %v5370_v52  ;;  %v5372_v20 = vunpack.i.h.bf16 %v5370_v52 }
 0x11a   : > { %1624 = vmatmul.mubr.f32.gmra.mrb[2].mxu0 %v1091_v6  ;;  %v1100_v6 = vsel %vm1025_vm0, %v4187_v22, %v5332_v58  ;;  %v5377_v58 = vunpack.i.h.bf16 %v5375_v14  ;;  %v4196_v22 = vld [vmem:[%s5933_s30 + $0xf9] sm:$0xff]  ;;  %v5395_v48 = vpop.permute.xlu1 %5394 }
 0x11b   : > { %1628 = vmatprep.mubr.f32.mxu0 %v1124_v37  ;;  %v1133_v37 = vsel %vm1025_vm0, %v4252_v15, %v5336_v0  ;;  %v5380_v28 = vpop.permute.xlu0 %5379  ;;  %v4261_v15 = vld [vmem:[%s5933_s30 + $0x120] sm:$0xff] }
 0x11c   : > { %v5381_v0 = vunpack.i.l.bf16 %v5380_v28 }
 0x11e   : > { %1629 = vmatmul.mubr.f32.gmra.mrb[4].mxu0 %v1092_v57  ;;  %v1101_v57 = vsel %vm1025_vm0, %v4188_v49, %v5337_v13  ;;  %v5382_v13 = vunpack.i.h.bf16 %v5380_v28  ;;  %v4197_v49 = vld [vmem:[%s5933_s30 + $0x109] sm:$0xff] }
 0x11f   : > { %1633 = vmatprep.mubr.f32.mxu0 %v1125_v59  ;;  %v1134_v59 = vsel %vm1025_vm0, %v4253_v36, %v5341_v45  ;;  %v5386_v45 = vunpack.i.l.bf16 %v5385_v11  ;;  %v5390_v38 = vpop.permute.xlu0 %5389  ;;  %v4262_v36 = vld [vmem:[%s5933_s30 + $0x128] sm:$0xff] }
 0x122   : > { %1634 = vmatmul.mubr.f32.gmra.mrb[6].mxu0 %v1093_v24  ;;  %v1102_v24 = vsel %vm1025_vm0, %v4189_v21, %v5342_v10  ;;  %v5387_v10 = vunpack.i.h.bf16 %v5385_v11  ;;  %v4198_v21 = vld [vmem:[%s5933_s30 + $0x111] sm:$0xff] }
 0x123   : > { %1638 = vmatprep.mubr.f32.mxu0 %v1126_v43  ;;  %v1135_v43 = vsel %vm1025_vm0, %v4254_v26, %v5346_v41  ;;  %v5391_v41 = vunpack.i.l.bf16 %v5390_v38  ;;  %v4263_v26 = vld [vmem:[%s5933_s30 + $0x138] sm:$0xff]  ;;  %v6909_v39 = vpop.permute.xlu0 %5399 }
 0x126   : > { %1639 = vmatmul.mubr.f32.gmra.mrb[8].mxu0 %v1094_v12  ;;  %v1103_v12 = vsel %vm1025_vm0, %v4190_v32, %v5347_v5  ;;  %v5392_v5 = vunpack.i.h.bf16 %v5390_v38  ;;  %v4199_v32 = vld [vmem:[%s5933_s30 + $0x121] sm:$0xff]  ;;  %v4204_v38 = vld [vmem:[%s5933_s30 + $0x159] sm:$0xff] }
 0x127   : > { %1643 = vmatprep.mubr.f32.mxu0 %v1127_v1  ;;  %v1136_v1 = vsel %vm1025_vm0, %v4255_v42, %v5351_v7  ;;  %v5396_v7 = vunpack.i.l.bf16 %v5395_v48  ;;  %v4264_v42 = vld [vmem:[%s5933_s30 + $0x140] sm:$0xff] }
 0x129   : > { %v1145_v25 = vsel %vm1025_vm0, %v4264_v42, %v5396_v7 }
 0x12a   : > { %1644 = vmatmul.mubr.f32.gmra.mrb[10].mxu0 %v1095_v46  ;;  %v1104_v46 = vsel %vm1025_vm0, %v4191_v54, %v5352_v44  ;;  %v5401_v54 = vunpack.i.l.bf16 %v6909_v39 }
 0x12b   : > { %1648 = vmatprep.mubr.f32.mxu0 %v1128_v17  ;;  %v1137_v17 = vsel %vm1025_vm0, %v4256_v62, %v5356_v61  ;;  %v5397_v61 = vunpack.i.h.bf16 %v5395_v48  ;;  %v4200_v62 = vld [vmem:[%s5933_s30 + $0x129] sm:$0xff]  ;;  %v3188_v48 = vld [vmem:[%s8388_s3 + $0x238] sm:$0xff] }
 0x12e   : > { %1649 = vmatmul.mubr.f32.gmra.mrb[12].mxu0 %v1096_v19  ;;  %v1105_v19 = vsel %vm1025_vm0, %v4192_v2, %v5357_v47  ;;  %v6920_v47 = vpop.permute.xlu1 %5404 }
 0x12f   : > { %1653 = vmatprep.mubr.f32.mxu0 %v1129_v16  ;;  %v1138_v16 = vsel %vm1025_vm0, %v4257_v53, %v5361_v4  ;;  %v5402_v4 = vunpack.i.h.bf16 %v6909_v39  ;;  %v5406_v2 = vunpack.i.l.bf16 %v6920_v47  ;;  %v4201_v53 = vld [vmem:[%s5933_s30 + $0x139] sm:$0xff]  ;;  %v5407_v52 = vunpack.i.h.bf16 %v6920_v47 }
 0x132   : > { %1654 = vmatmul.mubr.f32.gmra.mrb[14].mxu0 %v1097_v3  ;;  %v1106_v3 = vsel %vm1025_vm0, %v4193_v8, %v5362_v30  ;;  %v5826_v30 = vmov 0.0  }
 0x133   : > { %1658 = vmatprep.mubr.f32.mxu0 %v1130_v23  ;;  %v1139_v23 = vsel %vm1025_vm0, %v4258_v40, %v5366_v51  ;;  %2104 = vst.msk [vmem:[#allocation2 + $0x18] sm:$0xff] %vm1025_vm0, %v5826_v30  ;;  %2105 = vst.msk [vmem:[#allocation2 + $0x20] sm:$0xff] %vm1025_vm0, %v5826_v30  ;;  %v4266_v51 = vld [vmem:[%s5933_s30 + $0x158] sm:$0xff]  ;;  %v1114_v40 = vsel %vm1025_vm0, %v4201_v53, %v5402_v4  ;;  %v4272_v53 = vld [vmem:[%s5933_s30 + $0x1a0] sm:$0xff] }
 0x134   : > { %2100 = vst.msk [vmem:[#allocation2] sm:$0xff] %vm1025_vm0, %v5826_v30  ;;  %2101 = vst.msk [vmem:[#allocation2 + $0x8] sm:$0xff] %vm1025_vm0, %v5826_v30 }
 0x135   : > { %2107 = vst.msk [vmem:[#allocation2 + $0x30] sm:$0xff] %vm1025_vm0, %v5826_v30  ;;  %2108 = vst.msk [vmem:[#allocation2 + $0x38] sm:$0xff] %vm1025_vm0, %v5826_v30 }
 0x136   : > { %1659 = vmatmul.mubr.f32.gmra.mrb[16].mxu0 %v1098_v27  ;;  %v1107_v27 = vsel %vm1025_vm0, %v4194_v33, %v5367_v29  ;;  %2110 = vst.msk [vmem:[#allocation2 + $0x48] sm:$0xff] %vm1025_vm0, %v5826_v30  ;;  %2111 = vst.msk [vmem:[#allocation2 + $0x50] sm:$0xff] %vm1025_vm0, %v5826_v30  ;;  %v3181_v29 = vld [vmem:[%s8388_s3 + $0x200] sm:$0xff] }
 0x137   : > { %1663 = vmatprep.mubr.f32.mxu0 %v1131_v56  ;;  %v1140_v56 = vsel %vm1025_vm0, %v4259_v31, %v5371_v55  ;;  %2113 = vst.msk [vmem:[#allocation2 + $0x60] sm:$0xff] %vm1025_vm0, %v5826_v30  ;;  %2114 = vst.msk [vmem:[#allocation2 + $0x68] sm:$0xff] %vm1025_vm0, %v5826_v30  ;;  %v4202_v33 = vld [vmem:[%s5933_s30 + $0x141] sm:$0xff]  ;;  %v5415_v31 = vpop.permute.xlu1 %5414 }
 0x138   : > { %2116 = vst.msk [vmem:[#allocation2 + $0x78] sm:$0xff] %vm1025_vm0, %v5826_v30  ;;  %2117 = vst.msk [vmem:[#allocation2 + $0x80] sm:$0xff] %vm1025_vm0, %v5826_v30  ;;  %v5416_v28 = vunpack.i.l.bf16 %v5415_v31 }
 0x139   : > { %2119 = vst.msk [vmem:[#allocation2 + $0x90] sm:$0xff] %vm1025_vm0, %v5826_v30  ;;  %2120 = vst.msk [vmem:[#allocation2 + $0x98] sm:$0xff] %vm1025_vm0, %v5826_v30 }
 0x13a   : > { %1664 = vmatmul.mubr.f32.gmra.mrb[18].mxu0 %v1099_v34  ;;  %v1108_v34 = vsel %vm1025_vm0, %v4195_v50, %v5372_v20  ;;  %2122 = vst.msk [vmem:[#allocation2 + $0xa8] sm:$0xff] %vm1025_vm0, %v5826_v30  ;;  %2123 = vst.msk [vmem:[#allocation2 + $0xb0] sm:$0xff] %vm1025_vm0, %v5826_v30  ;;  %v4267_v20 = vld [vmem:[%s5933_s30 + $0x168] sm:$0xff]  ;;  %v3184_v50 = vld [vmem:[%s8388_s3 + $0x218] sm:$0xff] }
 0x13b   : > { %1668 = vmatprep.mubr.f32.mxu0 %v1132_v18  ;;  %v1141_v18 = vsel %vm1025_vm0, %v4260_v9, %v5376_v60  ;;  %2125 = vst.msk [vmem:[#allocation2 + $0xc0] sm:$0xff] %vm1025_vm0, %v5826_v30  ;;  %2126 = vst.msk [vmem:[#allocation2 + $0xc8] sm:$0xff] %vm1025_vm0, %v5826_v30  ;;  %v1115_v60 = vsel %vm1025_vm0, %v4202_v33, %v5407_v52  ;;  %v5758_v52 = vld [vmem:[%s5933_s30 + $0x181] sm:$0xff] }
 0x13c   : > { %2128 = vst.msk [vmem:[#allocation2 + $0xd8] sm:$0xff] %vm1025_vm0, %v5826_v30  ;;  %2129 = vst.msk [vmem:[#allocation2 + $0xe0] sm:$0xff] %vm1025_vm0, %v5826_v30 }
 0x13d   : > { %2131 = vst.msk [vmem:[#allocation2 + $0xf0] sm:$0xff] %vm1025_vm0, %v5826_v30  ;;  %2132 = vst.msk [vmem:[#allocation2 + $0xf8] sm:$0xff] %vm1025_vm0, %v5826_v30 }
 0x13e   : > { %1669 = vmatmul.mubr.f32.gmra.mrb[20].mxu0 %v1100_v6  ;;  %v1109_v6 = vsel %vm1025_vm0, %v4196_v22, %v5377_v58  ;;  %2134 = vst.msk [vmem:[#allocation2 + $0x108] sm:$0xff] %vm1025_vm0, %v5826_v30  ;;  %2135 = vst.msk [vmem:[#allocation2 + $0x110] sm:$0xff] %vm1025_vm0, %v5826_v30  ;;  %v4203_v58 = vld [vmem:[%s5933_s30 + $0x151] sm:$0xff] }
 0x13f   : > { %1673 = vmatprep.mubr.f32.mxu0 %v1133_v37  ;;  %v1142_v37 = vsel %vm1025_vm0, %v4261_v15, %v5381_v0  ;;  %2137 = vst.msk [vmem:[#allocation2 + $0x120] sm:$0xff] %vm1025_vm0, %v5826_v30  ;;  %2138 = vst.msk [vmem:[#allocation2 + $0x128] sm:$0xff] %vm1025_vm0, %v5826_v30  ;;  %v5417_v15 = vunpack.i.h.bf16 %v5415_v31 }
 0x140   : > { %2140 = vst.msk [vmem:[#allocation2 + $0x138] sm:$0xff] %vm1025_vm0, %v5826_v30  ;;  %2141 = vst.msk [vmem:[#allocation2 + $0x140] sm:$0xff] %vm1025_vm0, %v5826_v30 }
 0x141   : > { %2143 = vst.msk [vmem:[#allocation2 + $0x150] sm:$0xff] %vm1025_vm0, %v5826_v30  ;;  %2144 = vst.msk [vmem:[#allocation2 + $0x158] sm:$0xff] %vm1025_vm0, %v5826_v30 }
 0x142   : > { %1674 = vmatmul.mubr.f32.gmra.mrb[22].mxu0 %v1101_v57  ;;  %v1110_v57 = vsel %vm1025_vm0, %v4197_v49, %v5382_v13  ;;  %2146 = vst.msk [vmem:[#allocation2 + $0x168] sm:$0xff] %vm1025_vm0, %v5826_v30  ;;  %2147 = vst.msk [vmem:[#allocation2 + $0x170] sm:$0xff] %vm1025_vm0, %v5826_v30 }
 0x143   : > { %1678 = vmatprep.mubr.f32.mxu0 %v1134_v59  ;;  %v1143_v59 = vsel %vm1025_vm0, %v4262_v36, %v5386_v45  ;;  %2149 = vst.msk [vmem:[#allocation2 + $0x180] sm:$0xff] %vm1025_vm0, %v5826_v30  ;;  %2150 = vst.msk [vmem:[#allocation2 + $0x188] sm:$0xff] %vm1025_vm0, %v5826_v30  ;;  %v3186_v45 = vld [vmem:[%s8388_s3 + $0x228] sm:$0xff] }
 0x144   : > { %2152 = vst.msk [vmem:[#allocation2 + $0x198] sm:$0xff] %vm1025_vm0, %v5826_v30  ;;  %2153 = vst.msk [vmem:[#allocation2 + $0x1a0] sm:$0xff] %vm1025_vm0, %v5826_v30 }
 0x145   : > { %2106 = vst.msk [vmem:[#allocation2 + $0x28] sm:$0x3] %vm2102_vm1, %v5826_v30  ;;  %2103 = vst.msk [vmem:[#allocation2 + $0x10] sm:$0x3] %vm2102_vm1, %v5826_v30 }
 0x146   : > { %1679 = vmatmul.mubr.f32.gmra.mrb[24].mxu0 %v1102_v24  ;;  %v1111_v24 = vsel %vm1025_vm0, %v4198_v21, %v5387_v10  ;;  %2109 = vst.msk [vmem:[#allocation2 + $0x40] sm:$0x3] %vm2102_vm1, %v5826_v30  ;;  %2112 = vst.msk [vmem:[#allocation2 + $0x58] sm:$0x3] %vm2102_vm1, %v5826_v30  ;;  %v5425_v10 = vpop.permute.xlu1 %5424  ;;  %v3187_v21 = vld [vmem:[%s8388_s3 + $0x230] sm:$0xff] }
 0x147   : > { %1683 = vmatprep.mubr.f32.mxu0 %v1135_v43  ;;  %v1144_v43 = vsel %vm1025_vm0, %v4263_v26, %v5391_v41  ;;  %2115 = vst.msk [vmem:[#allocation2 + $0x70] sm:$0x3] %vm2102_vm1, %v5826_v30  ;;  %2118 = vst.msk [vmem:[#allocation2 + $0x88] sm:$0x3] %vm2102_vm1, %v5826_v30  ;;  %v5426_v26 = vunpack.i.l.bf16 %v5425_v10  ;;  %v7097_v7 = vpack.c.bf16 %v3188_v48, %v3187_v21  ;;  %v3125_v21 = vld [vmem:[%s8388_s3 + $0x40] sm:$0xff]  ;;  %v3126_v48 = vld [vmem:[%s8388_s3 + $0x48] sm:$0xff] }
 0x148   : > { %2121 = vst.msk [vmem:[#allocation2 + $0xa0] sm:$0x3] %vm2102_vm1, %v5826_v30  ;;  %2124 = vst.msk [vmem:[#allocation2 + $0xb8] sm:$0x3] %vm2102_vm1, %v5826_v30 }
 0x149   : > { %2127 = vst.msk [vmem:[#allocation2 + $0xd0] sm:$0x3] %vm2102_vm1, %v5826_v30  ;;  %2130 = vst.msk [vmem:[#allocation2 + $0xe8] sm:$0x3] %vm2102_vm1, %v5826_v30 }
 0x14a   : > { %1684 = vmatmul.mubr.f32.gmra.mrb[26].mxu0 %v1103_v12  ;;  %2133 = vst.msk [vmem:[#allocation2 + $0x100] sm:$0x3] %vm2102_vm1, %v5826_v30  ;;  %2136 = vst.msk [vmem:[#allocation2 + $0x118] sm:$0x3] %vm2102_vm1, %v5826_v30  ;;  %v5435_v47 = vpop.permute.xlu1 %5434 }
 0x14b   : > { %1688 = vmatprep.mubr.f32.mxu0 %v1136_v1  ;;  %v1112_v1 = vsel %vm1025_vm0, %v4199_v32, %v5392_v5  ;;  %2139 = vst.msk [vmem:[#allocation2 + $0x130] sm:$0x3] %vm2102_vm1, %v5826_v30  ;;  %2142 = vst.msk [vmem:[#allocation2 + $0x148] sm:$0x3] %vm2102_vm1, %v5826_v30  ;;  %v4270_v32 = vld [vmem:[%s5933_s30 + $0x188] sm:$0xff] }
 0x14c   : > { %2145 = vst.msk [vmem:[#allocation2 + $0x160] sm:$0x3] %vm2102_vm1, %v5826_v30  ;;  %2148 = vst.msk [vmem:[#allocation2 + $0x178] sm:$0x3] %vm2102_vm1, %v5826_v30 }
 0x14d   : > { %2151 = vst.msk [vmem:[#allocation2 + $0x190] sm:$0x3] %vm2102_vm1, %v5826_v30  ;;  %2154 = vst.msk [vmem:[#allocation2 + $0x1a8] sm:$0x3] %vm2102_vm1, %v5826_v30 }
 0x14e   : > { %1689 = vmatmul.mubr.f32.gmra.mrb[28].mxu0 %v1104_v46  ;;  %v4265_v46 = vld [vmem:[%s5933_s30 + $0x150] sm:$0xff]  ;;  %8466 = vst [vmem:[#allocation9_spill] sm:$0xff] %v7097_v7 }
 0x14f   : > { %1693 = vmatprep.mubr.f32.mxu0 %v1137_v17  ;;  %v1113_v17 = vsel %vm1025_vm0, %v4200_v62, %v5397_v61  ;;  %v1146_v35 = vsel %vm1025_vm0, %v4265_v46, %v5401_v54  ;;  %v5427_v61 = vunpack.i.h.bf16 %v5425_v10  ;;  %v4206_v62 = vld [vmem:[%s5933_s30 + $0x171] sm:$0xff] }
 0x150   : > { %v4271_v46 = vld [vmem:[%s5933_s30 + $0x198] sm:$0xff] }
 0x152   : > { %1694 = vmatmul.mubr.f32.gmra.mrb[30].mxu0 %v1105_v19  ;;  %v5410_v19 = vpop.permute.xlu0 %5409 }
 0x153   : > { %1698 = vmatprep.mubr.f32.mxu0 %v1138_v16  ;;  %v5411_v55 = vunpack.i.l.bf16 %v5410_v19 }
 0x155   : > { %v1148_v9 = vsel %vm1025_vm0, %v4267_v20, %v5411_v55 }
 0x156   : > { %1699 = vmatmul.mubr.f32.gmra.mrb[32].mxu0 %v1106_v3  ;;  %v3182_v3 = vld [vmem:[%s8388_s3 + $0x208] sm:$0xff]  ;;  %v5420_v0 = vpop.permute.xlu0 %5419 }
 0x157   : > { %1703 = vmatprep.mubr.f32.mxu0 %v1139_v23  ;;  %v1147_v23 = vsel %vm1025_vm0, %v4266_v51, %v5406_v2  ;;  %v7051_v14 = vpack.c.bf16 %v3182_v3, %v3181_v29  ;;  %v5422_v41 = vunpack.i.h.bf16 %v5420_v0  ;;  %v5436_v2 = vunpack.i.l.bf16 %v5435_v47  ;;  %v5759_v3 = vld [vmem:[%s5933_s30 + $0x189] sm:$0xff] }
 0x158   : > { %v5437_v51 = vunpack.i.h.bf16 %v5435_v47 }
 0x159   : > { %8463 = vst [vmem:[#allocation6_spill] sm:$0xff] %v7051_v14  ;;  %4858 = vmatprep.subr.bf16.mxu0 %v7051_v14  ;;  %v1153_v29 = vsel %vm1025_vm0, %v4272_v53, %v5436_v2  ;;  %v3133_v2 = vld [vmem:[%s8388_s3 + $0x80] sm:$0xff] }
 0x15a   : > { %1704 = vmatmul.mubr.f32.gmra.mrb[34].mxu0 %v1107_v27  ;;  %v5412_v27 = vunpack.i.h.bf16 %v5410_v19  ;;  %v1121_v55 = vsel %vm1025_vm0, %v5759_v3, %v5437_v51 }
 0x15b   : > { %1708 = vmatprep.mubr.f32.mxu0 %v1140_v56  ;;  %4860 = vmatpush3.bf16.msra.mxu0 %v7051_v14  ;;  %v3183_v56 = vld [vmem:[%s8388_s3 + $0x210] sm:$0xff] }
 0x15c   : > { %v1116_v13 = vsel %vm1025_vm0, %v4203_v58, %v5412_v27 }
 0x15e   : > { %1709 = vmatmul.mubr.f32.gmra.mrb[36].mxu0 %v1108_v34  ;;  %v7065_v34 = vpack.c.bf16 %v3184_v50, %v3183_v56 }
 0x15f   : > { %1713 = vmatprep.mubr.f32.mxu0 %v1141_v18  ;;  %v4268_v18 = vld [vmem:[%s5933_s30 + $0x170] sm:$0xff] }
 0x160   : > { %8464 = vst [vmem:[#allocation7_spill] sm:$0xff] %v7065_v34  ;;  %4862 = vmatprep.subr.bf16.mxu0 %v7065_v34  ;;  %v1149_v49 = vsel %vm1025_vm0, %v4268_v18, %v5416_v28  ;;  %v3117_v28 = vld [vmem:[%s8388_s3] sm:$0xff] }
 0x161   : > { %4864 = vmatpush3.bf16.msra.mxu0 %v7065_v34 }
 0x162   : > { %1714 = vmatmul.mubr.f32.gmra.mrb[38].mxu0 %v1109_v6  ;;  %v3185_v6 = vld [vmem:[%s8388_s3 + $0x220] sm:$0xff] }
 0x163   : > { %1718 = vmatprep.mubr.f32.mxu0 %v1142_v37  ;;  %v5421_v37 = vunpack.i.l.bf16 %v5420_v0  ;;  %v7083_v36 = vpack.c.bf16 %v3186_v45, %v3185_v6  ;;  %v3121_v45 = vld [vmem:[%s8388_s3 + $0x20] sm:$0xff] }
 0x165   : > { %8465 = vst [vmem:[#allocation8_spill] sm:$0xff] %v7083_v36  ;;  %4866 = vmatprep.subr.bf16.mxu0 %v7083_v36 }
 0x166   : > { %1719 = vmatmul.mubr.f32.gmra.mrb[40].mxu0 %v1110_v57  ;;  %v4269_v57 = vld [vmem:[%s5933_s30 + $0x180] sm:$0xff] }
 0x167   : > { %1723 = vmatprep.mubr.f32.mxu0 %v1143_v59  ;;  %v6912_v44 = vpop.f32.mrb[0].mxu1  ;;  %v1117_v59 = vsel %vm1025_vm0, %v4204_v38, %v5417_v15  ;;  %4868 = vmatpush3.bf16.msra.mxu0 %v7083_v36  ;;  %v1150_v5 = vsel %vm1025_vm0, %v4269_v57, %v5421_v37  ;;  %v3119_v15 = vld [vmem:[%s8388_s3 + $0x10] sm:$0xff]  ;;  %v3122_v37 = vld [vmem:[%s8388_s3 + $0x28] sm:$0xff] }
 0x168   : > { %v6914_v12 = vpop.f32.mrb[1].mxu1  ;;  %4870 = vmatprep.subr.bf16.mxu0 %v7097_v7  ;;  %v4768_v38 = vpack.c.bf16 %v3122_v37, %v3121_v45  ;;  %v3123_v57 = vld [vmem:[%s8388_s3 + $0x30] sm:$0xff]  ;;  %v3141_v37 = vld [vmem:[%s8388_s3 + $0xc0] sm:$0xff] }
 0x16a   : > { %1724 = vmatmul.mubr.f32.gmra.mrb[42].mxu0 %v1111_v24  ;;  %v4205_v24 = vld [vmem:[%s5933_s30 + $0x169] sm:$0xff] }
 0x16b   : > { %1728 = vmatprep.mubr.f32.mxu0 %v1144_v43  ;;  %v7001_v16 = vpop.f32.mrb[2].mxu1  ;;  %v5430_v43 = vpop.permute.xlu0 %5429  ;;  %4872 = vmatpush3.bf16.msra.mxu0 %v7097_v7 }
 0x16c   : > { %v7003_v8 = vpop.f32.mrb[3].mxu1  ;;  %v5431_v54 = vunpack.i.l.bf16 %v5430_v43  ;;  %v5432_v4 = vunpack.i.h.bf16 %v5430_v43  ;;  %v3127_v43 = vld [vmem:[%s8388_s3 + $0x50] sm:$0xff] }
 0x16e   : > { %1729 = vmatmul.mubr.f32.gmra.mrb[44].mxu0 %v1112_v1  ;;  %v1118_v1 = vsel %vm1025_vm0, %v4205_v24, %v5422_v41  ;;  %v3124_v41 = vld [vmem:[%s8388_s3 + $0x38] sm:$0xff] }
 0x16f   : > { %1733 = vmatprep.mubr.f32.mxu0 %v1145_v25  ;;  %v1151_v25 = vsel %vm1025_vm0, %v4270_v32, %v5426_v26  ;;  %v3128_v32 = vld [vmem:[%s8388_s3 + $0x58] sm:$0xff] }
 0x170   : > { %v7068_v22 = vpop.f32.mrb[4].mxu1 }
 0x171   : > { %v7070_v11 = vpop.f32.mrb[5].mxu1 }
 0x172   : > { %1734 = vmatmul.mubr.f32.gmra.mrb[46].mxu0 %v1113_v17  ;;  %v1119_v17 = vsel %vm1025_vm0, %v4206_v62, %v5427_v61  ;;  %v4777_v61 = vpack.c.bf16 %v3128_v32, %v3127_v43  ;;  %v7266_v43 = vld [vmem:[%s8387_s2] ss:$0 sm:$0xff] }
 0x173   : > { %1738 = vmatprep.mubr.f32.mxu0 %v1146_v35  ;;  %v1152_v35 = vsel %vm1025_vm0, %v4271_v46, %v5431_v54  ;;  %v3130_v54 = vld [vmem:[%s8388_s3 + $0x68] sm:$0xff]  ;;  %v3131_v46 = vld [vmem:[%s8388_s3 + $0x70] sm:$0xff] }
 0x174   : > { %v7100_v39 = vpop.f32.mrb[6].mxu1 }
 0x175   : > { %v7102_v42 = vpop.f32.mrb[7].mxu1 }
 0x176   : > { %1739 = vmatmul.mubr.f32.gmra.mrb[48].mxu0 %v1114_v40  ;;  %v1120_v40 = vsel %vm1025_vm0, %v5758_v52, %v5432_v4  ;;  %v3132_v4 = vld [vmem:[%s8388_s3 + $0x78] sm:$0xff] }
 0x177   : > { %1743 = vmatprep.mubr.f32.mxu0 %v1147_v23 }
 0x178   : > { %v7113_v30 = vpop.f32.mrb[8].mxu1 }
 0x179   : > { %v7115_v19 = vpop.f32.mrb[9].mxu1 }
 0x17a   : > { %1744 = vmatmul.mubr.f32.gmra.mrb[50].mxu0 %v1115_v60 }
 0x17b   : > { %1748 = vmatprep.mubr.f32.mxu0 %v1148_v9  ;;  %v3118_v9 = vld [vmem:[%s8388_s3 + $0x8] sm:$0xff] }
 0x17c   : > { %v7122_v23 = vpop.f32.mrb[10].mxu1  ;;  %v4762_v0 = vpack.c.bf16 %v3118_v9, %v3117_v28  ;;  %v3138_v28 = vld [vmem:[%s8388_s3 + $0xa8] sm:$0xff] }
 0x17d   : > { %v7124_v33 = vpop.f32.mrb[11].mxu1 }
 0x17e   : > { %1749 = vmatmul.mubr.f32.gmra.mrb[52].mxu0 %v1116_v13  ;;  %4763 = vmatpush1.bf16.msra.mxu1 %v4762_v0  ;;  %v3120_v13 = vld [vmem:[%s8388_s3 + $0x18] sm:$0xff] }
 0x17f   : > { %1753 = vmatprep.mubr.f32.mxu0 %v1149_v49  ;;  %4764 = vmatprep.subr.bf16.mxu1 %v8444_v63  ;;  %v4765_v6 = vpack.c.bf16 %v3120_v13, %v3119_v15  ;;  %v3139_v13 = vld [vmem:[%s8388_s3 + $0xb0] sm:$0xff] }
 0x180   : > { %v7126_v31 = vpop.f32.mrb[12].mxu1 }
 0x181   : > { %v7128_v20 = vpop.f32.mrb[13].mxu1 }
 0x182   : > { %1754 = vmatmul.mubr.f32.gmra.mrb[54].mxu0 %v1117_v59  ;;  %4766 = vmatpush1.bf16.msra.mxu1 %v4765_v6  ;;  %v4771_v59 = vpack.c.bf16 %v3124_v41, %v3123_v57  ;;  %v3140_v6 = vld [vmem:[%s8388_s3 + $0xb8] sm:$0xff] }
 0x183   : > { %1758 = vmatprep.mubr.f32.mxu0 %v1150_v5  ;;  %4767 = vmatprep.subr.bf16.mxu1 %v8444_v63  ;;  %v4774_v5 = vpack.c.bf16 %v3126_v48, %v3125_v21  ;;  %v4795_v45 = vpack.c.bf16 %v3140_v6, %v3139_v13  ;;  %v3143_v21 = vld [vmem:[%s8388_s3 + $0xd0] sm:$0xff]  ;;  %v3144_v48 = vld [vmem:[%s8388_s3 + $0xd8] sm:$0xff] }
 0x184   : > { %v7130_v27 = vpop.f32.mrb[14].mxu1 }
 0x185   : > { %v7132_v60 = vpop.f32.mrb[15].mxu1 }
 0x186   : > { %1759 = vmatmul.mubr.f32.gmra.mrb[56].mxu0 %v1118_v1  ;;  %4769 = vmatpush1.bf16.msra.mxu1 %v4768_v38  ;;  %v3129_v1 = vld [vmem:[%s8388_s3 + $0x60] sm:$0xff]  ;;  %v3142_v38 = vld [vmem:[%s8388_s3 + $0xc8] sm:$0xff] }
 0x187   : > { %1763 = vmatprep.mubr.f32.mxu0 %v1151_v25  ;;  %4770 = vmatprep.subr.bf16.mxu1 %v8444_v63  ;;  %v4780_v62 = vpack.c.bf16 %v3130_v54, %v3129_v1  ;;  %v4798_v41 = vpack.c.bf16 %v3142_v38, %v3141_v37  ;;  %v3146_v1 = vld [vmem:[%s8388_s3 + $0xe8] sm:$0xff] }
 0x188   : > { %v7134_v56 = vpop.f32.mrb[16].mxu1 }
 0x189   : > { %v7136_v50 = vpop.f32.mrb[17].mxu1 }
 0x18a   : > { %1764 = vmatmul.mubr.f32.gmra.mrb[58].mxu0 %v1119_v17  ;;  %4772 = vmatpush1.bf16.msra.mxu1 %v4771_v59  ;;  %v4783_v17 = vpack.c.bf16 %v3132_v4, %v3131_v46 }
 0x18b   : > { %1768 = vmatprep.mubr.f32.mxu0 %v1152_v35  ;;  %4773 = vmatprep.subr.bf16.mxu1 %v8444_v63  ;;  %v3134_v35 = vld [vmem:[%s8388_s3 + $0x88] sm:$0xff] }
 0x18c   : > { %v7144_v58 = vpop.f32.mrb[18].mxu1  ;;  %v4786_v51 = vpack.c.bf16 %v3134_v35, %v3133_v2  ;;  %v3147_v2 = vld [vmem:[%s8388_s3 + $0xf0] sm:$0xff]  ;;  %v3148_v35 = vld [vmem:[%s8388_s3 + $0xf8] sm:$0xff] }
 0x18d   : > { %v7146_v18 = vpop.f32.mrb[19].mxu1 }
 0x18e   : > { %1769 = vmatmul.mubr.f32.gmra.mrb[60].mxu0 %v1120_v40  ;;  %4775 = vmatpush1.bf16.msra.mxu1 %v4774_v5  ;;  %v3135_v40 = vld [vmem:[%s8388_s3 + $0x90] sm:$0xff]  ;;  %v4801_v5 = vpack.c.bf16 %v3144_v48, %v3143_v21  ;;  %v2220_v48 = vld [vmem:[#allocation2 + $0x1] sm:$0xff] }
 0x18f   : > { %1773 = vmatprep.mubr.f32.mxu0 %v1153_v29  ;;  %4776 = vmatprep.subr.bf16.mxu1 %v8444_v63  ;;  %v3136_v29 = vld [vmem:[%s8388_s3 + $0x98] sm:$0xff] }
 0x190   : > { %v7162_v49 = vpop.f32.mrb[20].mxu1  ;;  %v4789_v3 = vpack.c.bf16 %v3136_v29, %v3135_v40 }
 0x191   : > { %v7164_v10 = vpop.f32.mrb[21].mxu1 }
 0x192   : > { %1774 = vmatmul.mubr.f32.gmra.mrb[62].mxu0 %v1121_v55  ;;  %4778 = vmatpush1.bf16.msra.mxu1 %v4777_v61  ;;  %v3137_v55 = vld [vmem:[%s8388_s3 + $0xa0] sm:$0xff] }
 0x193   : > { %4779 = vmatprep.subr.bf16.mxu1 %v8444_v63  ;;  %v4792_v0 = vpack.c.bf16 %v3138_v28, %v3137_v55  ;;  %v3145_v61 = vld [vmem:[%s8388_s3 + $0xe0] sm:$0xff] }
 0x194   : > { %v7180_v26 = vpop.f32.mrb[22].mxu1  ;;  %v4804_v46 = vpack.c.bf16 %v3146_v1, %v3145_v61 }
 0x195   : > { %v7182_v24 = vpop.f32.mrb[23].mxu1 }
 0x196   : > { %4781 = vmatpush1.bf16.msra.mxu1 %v4780_v62 }
 0x197   : > { %4782 = vmatprep.subr.bf16.mxu1 %v8444_v63 }
 0x198   : > { %v7198_v25 = vpop.f32.mrb[24].mxu1 }
 0x199   : > { %v7200_v47 = vpop.f32.mrb[25].mxu1 }
 0x19a   : > { %4784 = vmatpush1.bf16.msra.mxu1 %v4783_v17 }
 0x19b   : > { %4785 = vmatprep.subr.bf16.mxu1 %v8444_v63 }
 0x19c   : > { %v7216_v53 = vpop.f32.mrb[26].mxu1 }
 0x19d   : > { %v7218_v52 = vpop.f32.mrb[27].mxu1 }
 0x19e   : > { %4787 = vmatpush1.bf16.msra.mxu1 %v4786_v51 }
 0x19f   : > { %4788 = vmatprep.subr.bf16.mxu1 %v8444_v63 }
 0x1a0   : > { %v7234_v9 = vpop.f32.mrb[28].mxu1 }
 0x1a1   : > { %v7236_v15 = vpop.f32.mrb[29].mxu1 }
 0x1a2   : > { %4790 = vmatpush1.bf16.msra.mxu1 %v4789_v3  ;;  %v4807_v3 = vpack.c.bf16 %v3148_v35, %v3147_v2 }
 0x1a3   : > { %4791 = vmatprep.subr.bf16.mxu1 %v8444_v63 }
 0x1a4   : > { %v7252_v57 = vpop.f32.mrb[30].mxu1 }
 0x1a5   : > { %v7254_v59 = vpop.f32.mrb[31].mxu1 }
 0x1a6   : > { %4793 = vmatpush1.bf16.msra.mxu1 %v4792_v0 }
 0x1a7   : > { %4794 = vmatprep.subr.bf16.mxu1 %v8444_v63 }
 0x1aa   : > { %4796 = vmatpush1.bf16.msra.mxu1 %v4795_v45 }
 0x1ab   : > { %4797 = vmatprep.subr.bf16.mxu1 %v8444_v63 }
 0x1ae   : > { %4799 = vmatpush1.bf16.msra.mxu1 %v4798_v41 }
 0x1af   : > { %4800 = vmatprep.subr.bf16.mxu1 %v8444_v63 }
 0x1b2   : > { %4802 = vmatpush1.bf16.msra.mxu1 %v4801_v5 }
 0x1b3   : > { %4803 = vmatprep.subr.bf16.mxu1 %v8444_v63 }
 0x1b6   : > { %4805 = vmatpush1.bf16.msra.mxu1 %v4804_v46 }
 0x1b7   : > { %4806 = vmatprep.subr.bf16.mxu1 %v8444_v63 }
 0x1ba   : > { %4808 = vmatpush1.bf16.msra.mxu1 %v4807_v3 }
 0x1bb   : > { %4809 = vmatprep.subr.bf16.mxu1 %v8444_v63 }
 0x1e9   : > { %v1620_v32 = vpop.f32.mrb[0].mxu0 }
 0x1ea   : > { %v4881_v54 = vadd.f32 %v7266_v43, %v1620_v32  ;;  %v1622_v62 = vpop.f32.mrb[1].mxu0 }
 0x1ec   : > { %v1846_v4 = vadd.f32 %v4881_v54, %v6914_v12 }
 0x1ed   : > { %v1625_v17 = vpop.f32.mrb[2].mxu0 }
 0x1ee   : > { %vm2004_vm2 = vcmp.ge.f32.partialorder %v1846_v4, 0.0  ;;  %v2036_v51 = vmul.f32 0.2, %v1846_v4  ;;  %v4882_v40 = vadd.f32 %v7266_v43, %v1625_v17  ;;  %v1627_v29 = vpop.f32.mrb[3].mxu0 }
 0x1f0   : > { %v2068_v55 = vsel %vm2004_vm2, %v1846_v4, %v2036_v51  ;;  %v1851_v12 = vadd.f32 %v4882_v40, %v6912_v44  ;;  %v2221_v4 = vld [vmem:[#allocation2 + $0x9] sm:$0xff] }
 0x1f1   : > { %2156 = vst.msk [vmem:[#allocation2 + $0x19] sm:$0xff] %vm1025_vm0, %v2068_v55  ;;  %v1630_v28 = vpop.f32.mrb[4].mxu0 }
 0x1f2   : > { %vm2005_vm3 = vcmp.ge.f32.partialorder %v1851_v12, 0.0  ;;  %v2037_v0 = vmul.f32 0.2, %v1851_v12  ;;  %v4883_v13 = vadd.f32 %v7266_v43, %v1630_v28  ;;  %v1632_v6 = vpop.f32.mrb[5].mxu0 }
 0x1f4   : > { %v2069_v45 = vsel %vm2005_vm3, %v1851_v12, %v2037_v0  ;;  %v1856_v37 = vadd.f32 %v4883_v13, %v7003_v8 }
 0x1f5   : > { %2157 = vst.msk [vmem:[#allocation2 + $0x21] sm:$0xff] %vm1025_vm0, %v2069_v45  ;;  %v1635_v38 = vpop.f32.mrb[6].mxu0 }
 0x1f6   : > { %vm2006_vm4 = vcmp.ge.f32.partialorder %v1856_v37, 0.0  ;;  %v2038_v41 = vmul.f32 0.2, %v1856_v37  ;;  %v4884_v44 = vadd.f32 %v7266_v43, %v1635_v38  ;;  %v1637_v21 = vpop.f32.mrb[7].mxu0 }
 0x1f8   : > { %v2070_v5 = vsel %vm2006_vm4, %v1856_v37, %v2038_v41  ;;  %v1861_v32 = vadd.f32 %v4884_v44, %v7001_v16  ;;  %v2284_v61 = vld [vmem:[#allocation2 + $0x18] sm:$0xff] }
 0x1f9   : > { %2158 = vst.msk [vmem:[#allocation2 + $0x31] sm:$0xff] %vm1025_vm0, %v2070_v5  ;;  %v1640_v1 = vpop.f32.mrb[8].mxu0  ;;  %v5438_v54 = vpack.i.bf16 %v2220_v48, %v2284_v61  ;;  %v2222_v28 = vld [vmem:[#allocation2 + $0x19] sm:$0xff] }
 0x1fa   : > { %vm2007_vm5 = vcmp.ge.f32.partialorder %v1861_v32, 0.0  ;;  %v2039_v62 = vmul.f32 0.2, %v1861_v32  ;;  %v4885_v8 = vadd.f32 %v7266_v43, %v1640_v1  ;;  %v1642_v46 = vpop.f32.mrb[9].mxu0 }
 0x1fb   : > { %5439 = vrot.lane.b32.xlu0 %v5438_v54, %s5825_s10 }
 0x1fc   : > { %v2071_v17 = vsel %vm2007_vm5, %v1861_v32, %v2039_v62  ;;  %v1866_v2 = vadd.f32 %v4885_v8, %v7070_v11  ;;  %v2285_v35 = vld [vmem:[#allocation2 + $0x20] sm:$0xff] }
 0x1fd   : > { %2159 = vst.msk [vmem:[#allocation2 + $0x39] sm:$0xff] %vm1025_vm0, %v2071_v17  ;;  %v1645_v16 = vpop.f32.mrb[10].mxu0  ;;  %v5443_v51 = vpack.i.bf16 %v2221_v4, %v2285_v35  ;;  %v2223_v38 = vld [vmem:[#allocation2 + $0x21] sm:$0xff] }
 0x1fe   : > { %vm2008_vm6 = vcmp.ge.f32.partialorder %v1866_v2, 0.0  ;;  %v2040_v40 = vmul.f32 0.2, %v1866_v2  ;;  %v4886_v29 = vadd.f32 %v7266_v43, %v1645_v16  ;;  %v1647_v3 = vpop.f32.mrb[11].mxu0 }
 0x1ff   : > { %5444 = vrot.lane.b32.xlu1 %v5443_v51, %s5825_s10 }
 0x200   : > { %v2072_v55 = vsel %vm2008_vm6, %v1866_v2, %v2040_v40  ;;  %v1871_v12 = vadd.f32 %v4886_v29, %v7068_v22  ;;  %v2286_v0 = vld [vmem:[#allocation2 + $0x30] sm:$0xff] }
 0x201   : > { %2160 = vst.msk [vmem:[#allocation2 + $0x49] sm:$0xff] %vm1025_vm0, %v2072_v55  ;;  %v1650_v11 = vpop.f32.mrb[12].mxu0  ;;  %v5448_v13 = vpack.i.bf16 %v2222_v28, %v2286_v0  ;;  %v7317_v8 = vld [vmem:[#allocation2 + $0x31] sm:$0xff] }
 0x202   : > { %vm2009_vm7 = vcmp.ge.f32.partialorder %v1871_v12, 0.0  ;;  %v2041_v6 = vmul.f32 0.2, %v1871_v12  ;;  %v4887_v45 = vadd.f32 %v7266_v43, %v1650_v11  ;;  %v1652_v37 = vpop.f32.mrb[13].mxu0 }
 0x203   : > { %5449 = vrot.lane.b32.xlu0 %v5448_v13, %s5825_s10 }
 0x204   : > { %v2073_v41 = vsel %vm2009_vm7, %v1871_v12, %v2041_v6  ;;  %v1876_v44 = vadd.f32 %v4887_v45, %v7102_v42  ;;  %v7305_v21 = vld [vmem:[#allocation2 + $0x32] sm:$0xff]  ;;  %v7307_v22 = vld [vmem:[#allocation2 + $0x3a] sm:$0xff] }
 0x205   : > { %v2287_v48 = vld [vmem:[#allocation2 + $0x38] sm:$0xff]  ;;  %2161 = vst.msk [vmem:[#allocation2 + $0x51] sm:$0xff] %vm1025_vm0, %v2073_v41  ;;  %v1655_v5 = vpop.f32.mrb[14].mxu0  ;;  %4601 = vmatprep.mubr.msk.f32.mxu0 %vm1025_vm0, %v7305_v21 }
 0x206   : > { %v5453_v32 = vpack.i.bf16 %v2223_v38, %v2287_v48  ;;  %vm2010_vm8 = vcmp.ge.f32.partialorder %v1876_v44, 0.0  ;;  %v2042_v61 = vmul.f32 0.2, %v1876_v44  ;;  %v4888_v1 = vadd.f32 %v7266_v43, %v1655_v5  ;;  %v1657_v54 = vpop.f32.mrb[15].mxu0  ;;  %4602 = vmatmul.mubr.msk.f32.vlgmr.msra.gmra.mrb[64].mxu0 %vm1025_vm0, %v7307_v22 }
 0x208   : > { %5454 = vrot.lane.b32.xlu1 %v5453_v32, %s5825_s10  ;;  %v2074_v42 = vsel %vm2010_vm8, %v1876_v44, %v2042_v61  ;;  %v1881_v62 = vadd.f32 %v4888_v1, %v7100_v39  ;;  %v2288_v46 = vld [vmem:[#allocation2 + $0x48] sm:$0xff]  ;;  %v7327_v39 = vld [vmem:[#allocation2 + $0x39] sm:$0xff] }
 0x209   : > { %v7319_v4 = vld [vmem:[#allocation2 + $0x49] sm:$0xff]  ;;  %2162 = vst.msk [vmem:[#allocation2 + $0x61] sm:$0xff] %vm1025_vm0, %v2074_v42  ;;  %v1660_v17 = vpop.f32.mrb[16].mxu0  ;;  %v5458_v2 = vpack.i.bf16 %v7317_v8, %v2288_v46 }
 0x20a   : > { %vm2011_vm9 = vcmp.ge.f32.partialorder %v1881_v62, 0.0  ;;  %v2043_v16 = vmul.f32 0.2, %v1881_v62  ;;  %v4889_v51 = vadd.f32 %v7266_v43, %v1660_v17  ;;  %v1662_v40 = vpop.f32.mrb[17].mxu0 }
 0x20b   : > { %5459 = vrot.lane.b32.xlu0 %v5458_v2, %s5825_s10 }
 0x20c   : > { %v2075_v29 = vsel %vm2011_vm9, %v1881_v62, %v2043_v16  ;;  %v1886_v3 = vadd.f32 %v4889_v51, %v7115_v19  ;;  %v7330_v55 = vld [vmem:[#allocation2 + $0x4a] sm:$0xff]  ;;  %v7332_v12 = vld [vmem:[#allocation2 + $0x52] sm:$0xff] }
 0x20d   : > { %v2289_v28 = vld [vmem:[#allocation2 + $0x50] sm:$0xff]  ;;  %2163 = vst.msk [vmem:[#allocation2 + $0x69] sm:$0xff] %vm1025_vm0, %v2075_v29  ;;  %v1665_v0 = vpop.f32.mrb[18].mxu0  ;;  %4604 = vmatprep.mubr.msk.f32.mxu0 %vm1025_vm0, %v7330_v55 }
 0x20e   : > { %v5463_v11 = vpack.i.bf16 %v7327_v39, %v2289_v28  ;;  %v7338_v13 = vld [vmem:[#allocation2 + $0x51] sm:$0xff]  ;;  %vm2012_vm10 = vcmp.ge.f32.partialorder %v1886_v3, 0.0  ;;  %v2044_v6 = vmul.f32 0.2, %v1886_v3  ;;  %v4890_v45 = vadd.f32 %v7266_v43, %v1665_v0  ;;  %v1667_v19 = vpop.f32.mrb[19].mxu0  ;;  %4605 = vmatmul.mubr.msk.f32.gmra.mrb[66].mxu0 %vm1025_vm0, %v7332_v12 }
 0x210   : > { %5464 = vrot.lane.b32.xlu1 %v5463_v11, %s5825_s10  ;;  %v2076_v38 = vsel %vm2012_vm10, %v1886_v3, %v2044_v6  ;;  %v1891_v41 = vadd.f32 %v4890_v45, %v7113_v30  ;;  %v2290_v44 = vld [vmem:[#allocation2 + $0x60] sm:$0xff] }
 0x211   : > { %v7347_v48 = vld [vmem:[#allocation2 + $0x61] sm:$0xff]  ;;  %2164 = vst.msk [vmem:[#allocation2 + $0x79] sm:$0xff] %vm1025_vm0, %v2076_v38  ;;  %v1670_v5 = vpop.f32.mrb[20].mxu0  ;;  %v5468_v32 = vpack.i.bf16 %v7319_v4, %v2290_v44 }
 0x212   : > { %vm2013_vm11 = vcmp.ge.f32.partialorder %v1891_v41, 0.0  ;;  %v2045_v1 = vmul.f32 0.2, %v1891_v41  ;;  %v4891_v54 = vadd.f32 %v7266_v43, %v1670_v5  ;;  %v1672_v42 = vpop.f32.mrb[21].mxu0 }
 0x213   : > { %5469 = vrot.lane.b32.xlu0 %v5468_v32, %s5825_s10 }
 0x214   : > { %v2077_v62 = vsel %vm2013_vm11, %v1891_v41, %v2045_v1  ;;  %v1896_v30 = vadd.f32 %v4891_v54, %v7124_v33  ;;  %v7356_v46 = vld [vmem:[#allocation2 + $0x62] sm:$0xff]  ;;  %v7358_v17 = vld [vmem:[#allocation2 + $0x6a] sm:$0xff] }
 0x215   : > { %v2291_v2 = vld [vmem:[#allocation2 + $0x68] sm:$0xff]  ;;  %2165 = vst.msk [vmem:[#allocation2 + $0x81] sm:$0xff] %vm1025_vm0, %v2077_v62  ;;  %v1675_v16 = vpop.f32.mrb[22].mxu0  ;;  %4607 = vmatprep.mubr.msk.f32.mxu0 %vm1025_vm0, %v7356_v46 }
 0x216   : > { %v5473_v51 = vpack.i.bf16 %v7338_v13, %v2291_v2  ;;  %v7364_v40 = vld [vmem:[#allocation2 + $0x69] sm:$0xff]  ;;  %vm2014_vm12 = vcmp.ge.f32.partialorder %v1896_v30, 0.0  ;;  %v2046_v29 = vmul.f32 0.2, %v1896_v30  ;;  %v4892_v3 = vadd.f32 %v7266_v43, %v1675_v16  ;;  %v1677_v33 = vpop.f32.mrb[23].mxu0  ;;  %4608 = vmatmul.mubr.msk.f32.gmra.mrb[68].mxu0 %vm1025_vm0, %v7358_v17 }
 0x218   : > { %5474 = vrot.lane.b32.xlu1 %v5473_v51, %s5825_s10  ;;  %v2078_v0 = vsel %vm2014_vm12, %v1896_v30, %v2046_v29  ;;  %v1901_v11 = vadd.f32 %v4892_v3, %v7122_v23  ;;  %v2292_v6 = vld [vmem:[#allocation2 + $0x78] sm:$0xff] }
 0x219   : > { %v7373_v45 = vld [vmem:[#allocation2 + $0x79] sm:$0xff]  ;;  %2166 = vst.msk [vmem:[#allocation2 + $0x91] sm:$0xff] %vm1025_vm0, %v2078_v0  ;;  %v1680_v19 = vpop.f32.mrb[24].mxu0  ;;  %v5478_v38 = vpack.i.bf16 %v7347_v48, %v2292_v6 }
 0x21a   : > { %vm2015_vm13 = vcmp.ge.f32.partialorder %v1901_v11, 0.0  ;;  %v2047_v44 = vmul.f32 0.2, %v1901_v11  ;;  %v4893_v5 = vadd.f32 %v7266_v43, %v1680_v19  ;;  %v1682_v32 = vpop.f32.mrb[25].mxu0 }
 0x21b   : > { %5479 = vrot.lane.b32.xlu0 %v5478_v38, %s5825_s10 }
 0x21c   : > { %v2079_v1 = vsel %vm2015_vm13, %v1901_v11, %v2047_v44  ;;  %v1906_v23 = vadd.f32 %v4893_v5, %v7128_v20  ;;  %v7382_v54 = vld [vmem:[#allocation2 + $0x7a] sm:$0xff]  ;;  %v7384_v42 = vld [vmem:[#allocation2 + $0x82] sm:$0xff] }
 0x21d   : > { %v2293_v62 = vld [vmem:[#allocation2 + $0x80] sm:$0xff]  ;;  %2167 = vst.msk [vmem:[#allocation2 + $0x99] sm:$0xff] %vm1025_vm0, %v2079_v1  ;;  %v1685_v30 = vpop.f32.mrb[26].mxu0  ;;  %4610 = vmatprep.mubr.msk.f32.mxu0 %vm1025_vm0, %v7382_v54 }
 0x21e   : > { %v5483_v2 = vpack.i.bf16 %v7364_v40, %v2293_v62  ;;  %v7390_v16 = vld [vmem:[#allocation2 + $0x81] sm:$0xff]  ;;  %vm2016_vm14 = vcmp.ge.f32.partialorder %v1906_v23, 0.0  ;;  %v2048_v51 = vmul.f32 0.2, %v1906_v23  ;;  %v4894_v29 = vadd.f32 %v7266_v43, %v1685_v30  ;;  %v1687_v20 = vpop.f32.mrb[27].mxu0  ;;  %4611 = vmatmul.mubr.msk.f32.gmra.mrb[70].mxu0 %vm1025_vm0, %v7384_v42 }
 0x220   : > { %5484 = vrot.lane.b32.xlu1 %v5483_v2, %s5825_s10  ;;  %v2080_v33 = vsel %vm2016_vm14, %v1906_v23, %v2048_v51  ;;  %v1911_v0 = vadd.f32 %v4894_v29, %v7126_v31  ;;  %v2294_v11 = vld [vmem:[#allocation2 + $0x90] sm:$0xff] }
 0x221   : > { %v7399_v6 = vld [vmem:[#allocation2 + $0x91] sm:$0xff]  ;;  %2168 = vst.msk [vmem:[#allocation2 + $0xa9] sm:$0xff] %vm1025_vm0, %v2080_v33  ;;  %v1690_v19 = vpop.f32.mrb[28].mxu0  ;;  %v5488_v38 = vpack.i.bf16 %v7373_v45, %v2294_v11 }
 0x222   : > { %vm2017_vm15 = vcmp.ge.f32.partialorder %v1911_v0, 0.0  ;;  %v2049_v5 = vmul.f32 0.2, %v1911_v0  ;;  %v4895_v32 = vadd.f32 %v7266_v43, %v1690_v19  ;;  %v1692_v1 = vpop.f32.mrb[29].mxu0 }
 0x223   : > { %5489 = vrot.lane.b32.xlu0 %v5488_v38, %s5825_s10 }
 0x224   : > { %v2081_v23 = vsel %vm2017_vm15, %v1911_v0, %v2049_v5  ;;  %v1916_v31 = vadd.f32 %v4895_v32, %v7132_v60  ;;  %v7408_v62 = vld [vmem:[#allocation2 + $0x92] sm:$0xff]  ;;  %v7410_v30 = vld [vmem:[#allocation2 + $0x9a] sm:$0xff] }
 0x225   : > { %v2295_v2 = vld [vmem:[#allocation2 + $0x98] sm:$0xff]  ;;  %2169 = vst.msk [vmem:[#allocation2 + $0xb1] sm:$0xff] %vm1025_vm0, %v2081_v23  ;;  %v1695_v51 = vpop.f32.mrb[30].mxu0  ;;  %4613 = vmatprep.mubr.msk.f32.mxu0 %vm1025_vm0, %v7408_v62 }
 0x226   : > { %v5493_v29 = vpack.i.bf16 %v7390_v16, %v2295_v2  ;;  %v7416_v20 = vld [vmem:[#allocation2 + $0x99] sm:$0xff]  ;;  %vm2018_vm1 = vcmp.ge.f32.partialorder %v1916_v31, 0.0  ;;  %v2050_v33 = vmul.f32 0.2, %v1916_v31  ;;  %v4896_v0 = vadd.f32 %v7266_v43, %v1695_v51  ;;  %v1697_v60 = vpop.f32.mrb[31].mxu0  ;;  %4614 = vmatmul.mubr.msk.f32.gmra.mrb[72].mxu0 %vm1025_vm0, %v7410_v30 }
 0x228   : > { %5494 = vrot.lane.b32.xlu1 %v5493_v29, %s5825_s10  ;;  %v2082_v19 = vsel %vm2018_vm1, %v1916_v31, %v2050_v33  ;;  %v1921_v38 = vadd.f32 %v4896_v0, %v7130_v27  ;;  %v2296_v5 = vld [vmem:[#allocation2 + $0xa8] sm:$0xff] }
 0x229   : > { %v7425_v32 = vld [vmem:[#allocation2 + $0xa9] sm:$0xff]  ;;  %2170 = vst.msk [vmem:[#allocation2 + $0xc1] sm:$0xff] %vm1025_vm0, %v2082_v19  ;;  %v1700_v1 = vpop.f32.mrb[32].mxu0  ;;  %v5498_v23 = vpack.i.bf16 %v7399_v6, %v2296_v5 }
 0x22a   : > { %vm2019_vm2 = vcmp.ge.f32.partialorder %v1921_v38, 0.0  ;;  %v2051_v51 = vmul.f32 0.2, %v1921_v38  ;;  %v4897_v60 = vadd.f32 %v7266_v43, %v1700_v1  ;;  %v1702_v11 = vpop.f32.mrb[33].mxu0 }
 0x22b   : > { %5499 = vrot.lane.b32.xlu0 %v5498_v23, %s5825_s10 }
 0x22c   : > { %v2083_v31 = vsel %vm2019_vm2, %v1921_v38, %v2051_v51  ;;  %v1926_v27 = vadd.f32 %v4897_v60, %v7136_v50  ;;  %v7434_v29 = vld [vmem:[#allocation2 + $0xaa] sm:$0xff]  ;;  %v7436_v33 = vld [vmem:[#allocation2 + $0xb2] sm:$0xff] }
 0x22d   : > { %v2297_v0 = vld [vmem:[#allocation2 + $0xb0] sm:$0xff]  ;;  %2171 = vst.msk [vmem:[#allocation2 + $0xc9] sm:$0xff] %vm1025_vm0, %v2083_v31  ;;  %v1705_v19 = vpop.f32.mrb[34].mxu0  ;;  %4616 = vmatprep.mubr.msk.f32.mxu0 %vm1025_vm0, %v7434_v29 }
 0x22e   : > { %v5503_v5 = vpack.i.bf16 %v7416_v20, %v2297_v0  ;;  %v7442_v1 = vld [vmem:[#allocation2 + $0xb1] sm:$0xff]  ;;  %vm2020_vm3 = vcmp.ge.f32.partialorder %v1926_v27, 0.0  ;;  %v2052_v11 = vmul.f32 0.2, %v1926_v27  ;;  %v4898_v38 = vadd.f32 %v7266_v43, %v1705_v19  ;;  %v1707_v50 = vpop.f32.mrb[35].mxu0  ;;  %4617 = vmatmul.mubr.msk.f32.gmra.mrb[74].mxu0 %vm1025_vm0, %v7436_v33 }
 0x230   : > { %5504 = vrot.lane.b32.xlu1 %v5503_v5, %s5825_s10  ;;  %v2084_v51 = vsel %vm2020_vm3, %v1926_v27, %v2052_v11  ;;  %v1931_v60 = vadd.f32 %v4898_v38, %v7134_v56  ;;  %v2298_v31 = vld [vmem:[#allocation2 + $0xc0] sm:$0xff] }
 0x231   : > { %v7451_v0 = vld [vmem:[#allocation2 + $0xc1] sm:$0xff]  ;;  %2172 = vst.msk [vmem:[#allocation2 + $0xd9] sm:$0xff] %vm1025_vm0, %v2084_v51  ;;  %v1710_v2 = vpop.f32.mrb[36].mxu0  ;;  %v5508_v19 = vpack.i.bf16 %v7425_v32, %v2298_v31 }
 0x232   : > { %vm2021_vm4 = vcmp.ge.f32.partialorder %v1931_v60, 0.0  ;;  %v2053_v44 = vmul.f32 0.2, %v1931_v60  ;;  %v4899_v23 = vadd.f32 %v7266_v43, %v1710_v2  ;;  %v1712_v3 = vpop.f32.mrb[37].mxu0 }
 0x233   : > { %5509 = vrot.lane.b32.xlu0 %v5508_v19, %s5825_s10 }
 0x234   : > { %v2085_v27 = vsel %vm2021_vm4, %v1931_v60, %v2053_v44  ;;  %v1936_v56 = vadd.f32 %v4899_v23, %v7146_v18  ;;  %v7460_v5 = vld [vmem:[#allocation2 + $0xc2] sm:$0xff]  ;;  %v7462_v11 = vld [vmem:[#allocation2 + $0xca] sm:$0xff] }
 0x235   : > { %v2299_v38 = vld [vmem:[#allocation2 + $0xc8] sm:$0xff]  ;;  %2173 = vst.msk [vmem:[#allocation2 + $0xe1] sm:$0xff] %vm1025_vm0, %v2085_v27  ;;  %v1715_v51 = vpop.f32.mrb[38].mxu0  ;;  %4619 = vmatprep.mubr.msk.f32.mxu0 %vm1025_vm0, %v7460_v5 }
 0x236   : > { %v5513_v31 = vpack.i.bf16 %v7442_v1, %v2299_v38  ;;  %v7468_v2 = vld [vmem:[#allocation2 + $0xc9] sm:$0xff]  ;;  %vm2022_vm5 = vcmp.ge.f32.partialorder %v1936_v56, 0.0  ;;  %v2054_v3 = vmul.f32 0.2, %v1936_v56  ;;  %v4900_v44 = vadd.f32 %v7266_v43, %v1715_v51  ;;  %v1717_v18 = vpop.f32.mrb[39].mxu0  ;;  %4620 = vmatmul.mubr.msk.f32.gmra.mrb[76].mxu0 %vm1025_vm0, %v7462_v11 }
 0x238   : > { %5514 = vrot.lane.b32.xlu1 %v5513_v31, %s5825_s10  ;;  %v2086_v60 = vsel %vm2022_vm5, %v1936_v56, %v2054_v3  ;;  %v1941_v19 = vadd.f32 %v4900_v44, %v7144_v58  ;;  %v2300_v27 = vld [vmem:[#allocation2 + $0xd8] sm:$0xff] }
 0x239   : > { %v7477_v38 = vld [vmem:[#allocation2 + $0xd9] sm:$0xff]  ;;  %2174 = vst.msk [vmem:[#allocation2 + $0xf1] sm:$0xff] %vm1025_vm0, %v2086_v60  ;;  %v1720_v50 = vpop.f32.mrb[40].mxu0  ;;  %v5518_v51 = vpack.i.bf16 %v7451_v0, %v2300_v27 }
 0x23a   : > { %vm2023_vm6 = vcmp.ge.f32.partialorder %v1941_v19, 0.0  ;;  %v2055_v41 = vmul.f32 0.2, %v1941_v19  ;;  %v4901_v23 = vadd.f32 %v7266_v43, %v1720_v50  ;;  %v1722_v28 = vpop.f32.mrb[41].mxu0 }
 0x23b   : > { %5519 = vrot.lane.b32.xlu0 %v5518_v51, %s5825_s10 }
 0x23c   : > { %v2087_v56 = vsel %vm2023_vm6, %v1941_v19, %v2055_v41  ;;  %v1946_v58 = vadd.f32 %v4901_v23, %v7164_v10  ;;  %v7486_v31 = vld [vmem:[#allocation2 + $0xda] sm:$0xff]  ;;  %v7488_v3 = vld [vmem:[#allocation2 + $0xe2] sm:$0xff] }
 0x23d   : > { %v2301_v44 = vld [vmem:[#allocation2 + $0xe0] sm:$0xff]  ;;  %2175 = vst.msk [vmem:[#allocation2 + $0xf9] sm:$0xff] %vm1025_vm0, %v2087_v56  ;;  %v1725_v60 = vpop.f32.mrb[42].mxu0  ;;  %4622 = vmatprep.mubr.msk.f32.mxu0 %vm1025_vm0, %v7486_v31 }
 0x23e   : > { %v5523_v27 = vpack.i.bf16 %v7468_v2, %v2301_v44  ;;  %v7494_v50 = vld [vmem:[#allocation2 + $0xe1] sm:$0xff]  ;;  %vm2024_vm7 = vcmp.ge.f32.partialorder %v1946_v58, 0.0  ;;  %v2056_v28 = vmul.f32 0.2, %v1946_v58  ;;  %v4902_v41 = vadd.f32 %v7266_v43, %v1725_v60  ;;  %v1727_v10 = vpop.f32.mrb[43].mxu0  ;;  %4623 = vmatmul.mubr.msk.f32.gmra.mrb[78].mxu0 %vm1025_vm0, %v7488_v3 }
 0x240   : > { %5524 = vrot.lane.b32.xlu1 %v5523_v27, %s5825_s10  ;;  %v2088_v19 = vsel %vm2024_vm7, %v1946_v58, %v2056_v28  ;;  %v1951_v51 = vadd.f32 %v4902_v41, %v7162_v49  ;;  %v2302_v56 = vld [vmem:[#allocation2 + $0xf0] sm:$0xff] }
 0x241   : > { %v7503_v44 = vld [vmem:[#allocation2 + $0xf1] sm:$0xff]  ;;  %2176 = vst.msk [vmem:[#allocation2 + $0x109] sm:$0xff] %vm1025_vm0, %v2088_v19  ;;  %v1730_v18 = vpop.f32.mrb[44].mxu0  ;;  %v5528_v60 = vpack.i.bf16 %v7477_v38, %v2302_v56 }
 0x242   : > { %vm2025_vm8 = vcmp.ge.f32.partialorder %v1951_v51, 0.0  ;;  %v2057_v61 = vmul.f32 0.2, %v1951_v51  ;;  %v4903_v23 = vadd.f32 %v7266_v43, %v1730_v18  ;;  %v1732_v37 = vpop.f32.mrb[45].mxu0 }
 0x243   : > { %5529 = vrot.lane.b32.xlu0 %v5528_v60, %s5825_s10 }
 0x244   : > { %v2089_v58 = vsel %vm2025_vm8, %v1951_v51, %v2057_v61  ;;  %v1956_v49 = vadd.f32 %v4903_v23, %v7182_v24  ;;  %v7512_v27 = vld [vmem:[#allocation2 + $0xf2] sm:$0xff]  ;;  %v7514_v28 = vld [vmem:[#allocation2 + $0xfa] sm:$0xff] }
 0x245   : > { %v2303_v41 = vld [vmem:[#allocation2 + $0xf8] sm:$0xff]  ;;  %2177 = vst.msk [vmem:[#allocation2 + $0x111] sm:$0xff] %vm1025_vm0, %v2089_v58  ;;  %v1735_v19 = vpop.f32.mrb[46].mxu0  ;;  %4625 = vmatprep.mubr.msk.f32.mxu0 %vm1025_vm0, %v7512_v27 }
 0x246   : > { %v5533_v56 = vpack.i.bf16 %v7494_v50, %v2303_v41  ;;  %v7520_v18 = vld [vmem:[#allocation2 + $0xf9] sm:$0xff]  ;;  %vm2026_vm9 = vcmp.ge.f32.partialorder %v1956_v49, 0.0  ;;  %v2058_v37 = vmul.f32 0.2, %v1956_v49  ;;  %v4904_v61 = vadd.f32 %v7266_v43, %v1735_v19  ;;  %v1737_v24 = vpop.f32.mrb[47].mxu0  ;;  %4626 = vmatmul.mubr.msk.f32.gmra.mrb[80].mxu0 %vm1025_vm0, %v7514_v28 }
 0x248   : > { %5534 = vrot.lane.b32.xlu1 %v5533_v56, %s5825_s10  ;;  %v2090_v51 = vsel %vm2026_vm9, %v1956_v49, %v2058_v37  ;;  %v1961_v60 = vadd.f32 %v4904_v61, %v7180_v26  ;;  %v2304_v58 = vld [vmem:[#allocation2 + $0x108] sm:$0xff] }
 0x249   : > { %v7529_v41 = vld [vmem:[#allocation2 + $0x109] sm:$0xff]  ;;  %2178 = vst.msk [vmem:[#allocation2 + $0x121] sm:$0xff] %vm1025_vm0, %v2090_v51  ;;  %v1740_v10 = vpop.f32.mrb[48].mxu0  ;;  %v5538_v19 = vpack.i.bf16 %v7503_v44, %v2304_v58 }
 0x24a   : > { %vm2027_vm10 = vcmp.ge.f32.partialorder %v1961_v60, 0.0  ;;  %v2059_v35 = vmul.f32 0.2, %v1961_v60  ;;  %v4905_v23 = vadd.f32 %v7266_v43, %v1740_v10  ;;  %v1742_v7 = vpop.f32.mrb[49].mxu0 }
 0x24b   : > { %5539 = vrot.lane.b32.xlu0 %v5538_v19, %s5825_s10 }
 0x24c   : > { %v2091_v49 = vsel %vm2027_vm10, %v1961_v60, %v2059_v35  ;;  %v1966_v26 = vadd.f32 %v4905_v23, %v7200_v47  ;;  %v7538_v56 = vld [vmem:[#allocation2 + $0x10a] sm:$0xff]  ;;  %v7540_v37 = vld [vmem:[#allocation2 + $0x112] sm:$0xff] }
 0x24d   : > { %v2305_v61 = vld [vmem:[#allocation2 + $0x110] sm:$0xff]  ;;  %2179 = vst.msk [vmem:[#allocation2 + $0x129] sm:$0xff] %vm1025_vm0, %v2091_v49  ;;  %v1745_v51 = vpop.f32.mrb[50].mxu0  ;;  %4628 = vmatprep.mubr.msk.f32.mxu0 %vm1025_vm0, %v7538_v56 }
 0x24e   : > { %v5543_v58 = vpack.i.bf16 %v7520_v18, %v2305_v61  ;;  %v7546_v10 = vld [vmem:[#allocation2 + $0x111] sm:$0xff]  ;;  %vm2028_vm11 = vcmp.ge.f32.partialorder %v1966_v26, 0.0  ;;  %v2060_v7 = vmul.f32 0.2, %v1966_v26  ;;  %v4906_v35 = vadd.f32 %v7266_v43, %v1745_v51  ;;  %v1747_v47 = vpop.f32.mrb[51].mxu0  ;;  %4629 = vmatmul.mubr.msk.f32.gmra.mrb[82].mxu0 %vm1025_vm0, %v7540_v37 }
 0x250   : > { %5544 = vrot.lane.b32.xlu1 %v5543_v58, %s5825_s10  ;;  %v2092_v60 = vsel %vm2028_vm11, %v1966_v26, %v2060_v7  ;;  %v1971_v19 = vadd.f32 %v4906_v35, %v7198_v25  ;;  %v2306_v49 = vld [vmem:[#allocation2 + $0x120] sm:$0xff] }
 0x251   : > { %v7555_v61 = vld [vmem:[#allocation2 + $0x121] sm:$0xff]  ;;  %2180 = vst.msk [vmem:[#allocation2 + $0x139] sm:$0xff] %vm1025_vm0, %v2092_v60  ;;  %v1750_v24 = vpop.f32.mrb[52].mxu0  ;;  %v5548_v51 = vpack.i.bf16 %v7529_v41, %v2306_v49 }
 0x252   : > { %vm2029_vm12 = vcmp.ge.f32.partialorder %v1971_v19, 0.0  ;;  %v2061_v36 = vmul.f32 0.2, %v1971_v19  ;;  %v4907_v23 = vadd.f32 %v7266_v43, %v1750_v24  ;;  %v1752_v34 = vpop.f32.mrb[53].mxu0 }
 0x253   : > { %5549 = vrot.lane.b32.xlu0 %v5548_v51, %s5825_s10 }
 0x254   : > { %v2093_v26 = vsel %vm2029_vm12, %v1971_v19, %v2061_v36  ;;  %v1976_v25 = vadd.f32 %v4907_v23, %v7218_v52  ;;  %v2307_v58 = vld [vmem:[#allocation2 + $0x128] sm:$0xff] }
 0x255   : > { %v7564_v7 = vld [vmem:[#allocation2 + $0x129] sm:$0xff]  ;;  %2181 = vst.msk [vmem:[#allocation2 + $0x141] sm:$0xff] %vm1025_vm0, %v2093_v26  ;;  %v1755_v35 = vpop.f32.mrb[54].mxu0  ;;  %v5553_v60 = vpack.i.bf16 %v7546_v10, %v2307_v58 }
 0x256   : > { %vm2030_vm13 = vcmp.ge.f32.partialorder %v1976_v25, 0.0  ;;  %v2062_v47 = vmul.f32 0.2, %v1976_v25  ;;  %v4908_v34 = vadd.f32 %v7266_v43, %v1755_v35  ;;  %v1757_v24 = vpop.f32.mrb[55].mxu0 }
 0x257   : > { %5554 = vrot.lane.b32.xlu1 %v5553_v60, %s5825_s10 }
 0x258   : > { %v2094_v36 = vsel %vm2030_vm13, %v1976_v25, %v2062_v47  ;;  %v1981_v52 = vadd.f32 %v4908_v34, %v7216_v53  ;;  %v2308_v23 = vld [vmem:[#allocation2 + $0x138] sm:$0xff] }
 0x259   : > { %2182 = vst.msk [vmem:[#allocation2 + $0x151] sm:$0xff] %vm1025_vm0, %v2094_v36  ;;  %v1760_v19 = vpop.f32.mrb[56].mxu0  ;;  %v5558_v51 = vpack.i.bf16 %v7555_v61, %v2308_v23 }
 0x25a   : > { %vm2031_vm14 = vcmp.ge.f32.partialorder %v1981_v52, 0.0  ;;  %v2063_v26 = vmul.f32 0.2, %v1981_v52  ;;  %v4909_v58 = vadd.f32 %v7266_v43, %v1760_v19  ;;  %v1762_v49 = vpop.f32.mrb[57].mxu0  ;;  %v7583_v19 = vld [vmem:[#allocation2 + $0x139] sm:$0xff] }
 0x25b   : > { %5559 = vrot.lane.b32.xlu0 %v5558_v51, %s5825_s10 }
 0x25c   : > { %v2095_v35 = vsel %vm2031_vm14, %v1981_v52, %v2063_v26  ;;  %v1986_v24 = vadd.f32 %v4909_v58, %v7236_v15  ;;  %v2309_v60 = vld [vmem:[#allocation2 + $0x140] sm:$0xff] }
 0x25d   : > { %2183 = vst.msk [vmem:[#allocation2 + $0x159] sm:$0xff] %vm1025_vm0, %v2095_v35  ;;  %v1765_v53 = vpop.f32.mrb[58].mxu0  ;;  %v5563_v47 = vpack.i.bf16 %v7564_v7, %v2309_v60  ;;  %v7593_v60 = vld [vmem:[#allocation2 + $0x141] sm:$0xff] }
 0x25e   : > { %vm2032_vm15 = vcmp.ge.f32.partialorder %v1986_v24, 0.0  ;;  %v2064_v25 = vmul.f32 0.2, %v1986_v24  ;;  %v4910_v34 = vadd.f32 %v7266_v43, %v1765_v53  ;;  %v1767_v36 = vpop.f32.mrb[59].mxu0 }
 0x25f   : > { %5564 = vrot.lane.b32.xlu1 %v5563_v47, %s5825_s10 }
 0x260   : > { %v2096_v23 = vsel %vm2032_vm15, %v1986_v24, %v2064_v25  ;;  %v1991_v49 = vadd.f32 %v4910_v34, %v7234_v9  ;;  %v7585_v52 = vld [vmem:[#allocation2 + $0x150] sm:$0xff] }
 0x261   : > { %8467 = vst [vmem:[#allocation10_spill] sm:$0xff] %v7585_v52  ;;  %2184 = vst.msk [vmem:[#allocation2 + $0x169] sm:$0xff] %vm1025_vm0, %v2096_v23  ;;  %v1770_v15 = vpop.f32.mrb[60].mxu0  ;;  %v5568_v51 = vpack.i.bf16 %v7583_v19, %v7585_v52  ;;  %v2253_v52 = vld [vmem:[#allocation2 + $0xa] sm:$0xff] }
 0x262   : > { %vm2033_vm1 = vcmp.ge.f32.partialorder %v1991_v49, 0.0  ;;  %v2065_v26 = vmul.f32 0.2, %v1991_v49  ;;  %v4911_v58 = vadd.f32 %v7266_v43, %v1770_v15  ;;  %v1772_v35 = vpop.f32.mrb[61].mxu0  ;;  %v7603_v15 = vld [vmem:[#allocation2 + $0x151] sm:$0xff] }
 0x263   : > { %5569 = vrot.lane.b32.xlu0 %v5568_v51, %s5825_s10 }
 0x264   : > { %v2097_v24 = vsel %vm2033_vm1, %v1991_v49, %v2065_v26  ;;  %v1996_v9 = vadd.f32 %v4911_v58, %v7254_v59  ;;  %v7595_v53 = vld [vmem:[#allocation2 + $0x158] sm:$0xff] }
 0x265   : > { %8468 = vst [vmem:[#allocation11_spill] sm:$0xff] %v7595_v53  ;;  %2185 = vst.msk [vmem:[#allocation2 + $0x171] sm:$0xff] %vm1025_vm0, %v2097_v24  ;;  %v1775_v47 = vpop.f32.mrb[62].mxu0  ;;  %v5573_v25 = vpack.i.bf16 %v7593_v60, %v7595_v53  ;;  %v7614_v24 = vld [vmem:[#allocation2 + $0x159] sm:$0xff] }
 0x266   : > { %vm2034_vm2 = vcmp.ge.f32.partialorder %v1996_v9, 0.0  ;;  %v2066_v34 = vmul.f32 0.2, %v1996_v9  ;;  %v4912_v36 = vadd.f32 %v7266_v43, %v1775_v47  ;;  %v1777_v23 = vpop.f32.mrb[63].mxu0  ;;  %v3149_v43 = vld [vmem:[%s8388_s3 + $0x100] sm:$0xff]  ;;  %8470 = vst [vmem:[#allocation13_spill] sm:$0xff] %v7614_v24 }
 0x267   : > { %5574 = vrot.lane.b32.xlu1 %v5573_v25, %s5825_s10 }
 0x268   : > { %v2098_v49 = vsel %vm2034_vm2, %v1996_v9, %v2066_v34  ;;  %v2001_v59 = vadd.f32 %v4912_v36, %v7252_v57  ;;  %v7605_v51 = vld [vmem:[#allocation2 + $0x168] sm:$0xff]  ;;  %v2188_v36 = vld [vmem:[#allocation2] sm:$0xff] }
 0x269   : > { %8469 = vst [vmem:[#allocation12_spill] sm:$0xff] %v7605_v51  ;;  %2186 = vst.msk [vmem:[#allocation2 + $0x181] sm:$0xff] %vm1025_vm0, %v2098_v49  ;;  %v5578_v26 = vpack.i.bf16 %v7603_v15, %v7605_v51  ;;  %v3150_v9 = vld [vmem:[%s8388_s3 + $0x108] sm:$0xff] }
 0x26a   : > { %vm2035_vm3 = vcmp.ge.f32.partialorder %v2001_v59, 0.0  ;;  %v2067_v58 = vmul.f32 0.2, %v2001_v59  ;;  %v2252_v34 = vld [vmem:[#allocation2 + $0x2] sm:$0xff] }
 0x26b   : > { %5579 = vrot.lane.b32.xlu0 %v5578_v26, %s5825_s10  ;;  %v4810_v26 = vpack.c.bf16 %v3150_v9, %v3149_v43  ;;  %v7624_v51 = vld [vmem:[#allocation2 + $0x169] sm:$0xff]  ;;  %v3152_v43 = vld [vmem:[%s8388_s3 + $0x118] sm:$0xff] }
 0x26c   : > { %v2099_v35 = vsel %vm2035_vm3, %v2001_v59, %v2067_v58  ;;  %v2313_v57 = vld [vmem:[#allocation2 + $0x170] sm:$0xff]  ;;  %8471 = vst [vmem:[#allocation14_spill] sm:$0xff] %v7624_v51 }
 0x26d   : > { %2187 = vst.msk [vmem:[#allocation2 + $0x189] sm:$0xff] %vm1025_vm0, %v2099_v35  ;;  %v5440_v47 = vpop.permute.xlu0 %5439  ;;  %v5583_v25 = vpack.i.bf16 %v7614_v24, %v2313_v57  ;;  %v2189_v57 = vld [vmem:[#allocation2 + $0x8] sm:$0xff] }
 0x26e   : > { %v5442_v23 = vunpack.i.h.bf16 %v5440_v47  ;;  %v5441_v49 = vunpack.i.l.bf16 %v5440_v47  ;;  %v3151_v47 = vld [vmem:[%s8388_s3 + $0x110] sm:$0xff] }
 0x26f   : > { %5584 = vrot.lane.b32.xlu1 %v5583_v25, %s5825_s10 }
 0x270   : > { %v3021_v59 = vsel %vm1025_vm0, %v2252_v34, %v5441_v49  ;;  %v2989_v58 = vsel %vm1025_vm0, %v2188_v36, %v5442_v23  ;;  %v2314_v53 = vld [vmem:[#allocation2 + $0x180] sm:$0xff] }
 0x271   : > { %v5445_v14 = vpop.permute.xlu1 %5444  ;;  %3356 = vmatprep.mubr.f32.mxu1 %v3021_v59  ;;  %v5588_v35 = vpack.i.bf16 %v7624_v51, %v2314_v53  ;;  %v7636_v53 = vld [vmem:[#allocation2 + $0x171] sm:$0xff]  ;;  %v2348_v49 = vld [vmem:[#allocation2 + $0x1a] sm:$0xff]  ;;  %v4813_v59 = vpack.c.bf16 %v3152_v43, %v3151_v47  ;;  %v2349_v43 = vld [vmem:[#allocation2 + $0x22] sm:$0xff] }
 0x272   : > { %v5447_v9 = vunpack.i.h.bf16 %v5445_v14  ;;  %v5446_v25 = vunpack.i.l.bf16 %v5445_v14  ;;  %3357 = vmatmul.mubr.f32.vlgmr.msra.gmra.mrb[32].mxu1 %v2989_v58  ;;  %v5598_v14 = vpack.i.bf16 %v2348_v49, %v7317_v8 }
 0x273   : > { %4811 = vmatpush1.bf16.msra.mxu1 %v4810_v26  ;;  %5589 = vrot.lane.b32.xlu0 %v5588_v35, %s5825_s10  ;;  %v3153_v26 = vld [vmem:[%s8388_s3 + $0x120] sm:$0xff] }
 0x274   : > { %v3022_v34 = vsel %vm1025_vm0, %v2253_v52, %v5446_v25  ;;  %v2990_v36 = vsel %vm1025_vm0, %v2189_v57, %v5447_v9  ;;  %v2315_v23 = vld [vmem:[#allocation2 + $0x188] sm:$0xff]  ;;  %4812 = vmatprep.subr.bf16.mxu1 %v8444_v63  ;;  %v2190_v57 = vld [vmem:[#allocation2 + $0x18] sm:$0xff] }
 0x275   : > { %3361 = vmatprep.mubr.f32.mxu1 %v3022_v34  ;;  %v5450_v51 = vpop.permute.xlu0 %5449  ;;  %v5593_v24 = vpack.i.bf16 %v7636_v53, %v2315_v23  ;;  %v3154_v52 = vld [vmem:[%s8388_s3 + $0x128] sm:$0xff]  ;;  %v5603_v34 = vpack.i.bf16 %v2349_v43, %v7327_v39  ;;  %v2191_v39 = vld [vmem:[#allocation2 + $0x20] sm:$0xff] }
 0x276   : > { %v5452_v58 = vunpack.i.h.bf16 %v5450_v51  ;;  %v5451_v35 = vunpack.i.l.bf16 %v5450_v51  ;;  %3362 = vmatmul.mubr.f32.gmra.mrb[34].mxu1 %v2990_v36  ;;  %v4816_v9 = vpack.c.bf16 %v3154_v52, %v3153_v26  ;;  %v3155_v51 = vld [vmem:[%s8388_s3 + $0x130] sm:$0xff] }
 0x277   : > { %5594 = vrot.lane.b32.xlu1 %v5593_v24, %s5825_s10  ;;  %5599 = vrot.lane.b32.xlu0 %v5598_v14, %s5825_s10  ;;  %v3156_v24 = vld [vmem:[%s8388_s3 + $0x138] sm:$0xff] }
 0x278   : > { %v3023_v47 = vsel %vm1025_vm0, %v2348_v49, %v5451_v35  ;;  %v2991_v8 = vsel %vm1025_vm0, %v2190_v57, %v5452_v58  ;;  %4814 = vmatpush1.bf16.msra.mxu1 %v4813_v59  ;;  %v8472_v49 = vpack.i.bf16 %v7305_v21, %v7319_v4  ;;  %v4819_v26 = vpack.c.bf16 %v3156_v24, %v3155_v51  ;;  %v3157_v58 = vld [vmem:[%s8388_s3 + $0x140] sm:$0xff]  ;;  %v3158_v21 = vld [vmem:[%s8388_s3 + $0x148] sm:$0xff] }
 0x279   : > { %3366 = vmatprep.mubr.f32.mxu1 %v3023_v47  ;;  %4815 = vmatprep.subr.bf16.mxu1 %v8444_v63  ;;  %v8473_v57 = vpack.i.bf16 %v7307_v22, %v7338_v13  ;;  %v8474_v47 = vpack.i.bf16 %v7330_v55, %v7347_v48  ;;  %v3159_v22 = vld [vmem:[%s8388_s3 + $0x150] sm:$0xff]  ;;  %v3160_v55 = vld [vmem:[%s8388_s3 + $0x158] sm:$0xff]  ;;  %v8475_v24 = vpack.i.bf16 %v7332_v12, %v7364_v40  ;;  %v3161_v12 = vld [vmem:[%s8388_s3 + $0x160] sm:$0xff] }
 0x27a   : > { %v5455_v25 = vpop.permute.xlu1 %5454  ;;  %3367 = vmatmul.mubr.f32.gmra.mrb[36].mxu1 %v2991_v8  ;;  %v2256_v8 = vld [vmem:[#allocation2 + $0x32] sm:$0xff] }
 0x27b   : > { %v5457_v36 = vunpack.i.h.bf16 %v5455_v25  ;;  %v5456_v23 = vunpack.i.l.bf16 %v5455_v25  ;;  %5604 = vrot.lane.b32.xlu1 %v5603_v34, %s5825_s10  ;;  %5609 = vrot.lane.b32.xlu0 %v8472_v49, %s5825_s10  ;;  %v4822_v34 = vpack.c.bf16 %v3158_v21, %v3157_v58  ;;  %v7701_v49 = vld [vmem:[#allocation2 + $0x38] sm:$0xff]  ;;  %v8478_v58 = vpack.i.bf16 %v7382_v54, %v7399_v6  ;;  %v2258_v21 = vld [vmem:[#allocation2 + $0x4a] sm:$0xff] }
 0x27c   : > { %4817 = vmatpush1.bf16.msra.mxu1 %v4816_v9  ;;  %v3164_v54 = vld [vmem:[%s8388_s3 + $0x178] sm:$0xff] }
 0x27d   : > { %v3024_v59 = vsel %vm1025_vm0, %v2349_v43, %v5456_v23  ;;  %v2992_v14 = vsel %vm1025_vm0, %v2191_v39, %v5457_v36  ;;  %v5460_v52 = vpop.permute.xlu0 %5459  ;;  %4818 = vmatprep.subr.bf16.mxu1 %v8444_v63  ;;  %v7681_v43 = vld [vmem:[#allocation2 + $0x30] sm:$0xff]  ;;  %v8476_v36 = vpack.i.bf16 %v7356_v46, %v7373_v45  ;;  %v2257_v23 = vld [vmem:[#allocation2 + $0x3a] sm:$0xff]  ;;  %v3162_v46 = vld [vmem:[%s8388_s3 + $0x168] sm:$0xff] }
 0x27e   : > { %3371 = vmatprep.mubr.f32.mxu1 %v3024_v59  ;;  %v5462_v4 = vunpack.i.h.bf16 %v5460_v52  ;;  %v5461_v35 = vunpack.i.l.bf16 %v5460_v52  ;;  %v8477_v52 = vpack.i.bf16 %v7358_v17, %v7390_v16  ;;  %v3163_v17 = vld [vmem:[%s8388_s3 + $0x170] sm:$0xff] }
 0x27f   : > { %3372 = vmatmul.mubr.f32.gmra.mrb[38].mxu1 %v2992_v14  ;;  %5614 = vrot.lane.b32.xlu1 %v8473_v57, %s5825_s10  ;;  %v4825_v14 = vpack.c.bf16 %v3160_v55, %v3159_v22 }
 0x280   : > { %5619 = vrot.lane.b32.xlu0 %v8474_v47, %s5825_s10  ;;  %v3025_v9 = vsel %vm1025_vm0, %v2256_v8, %v5461_v35  ;;  %v2993_v25 = vsel %vm1025_vm0, %v7681_v43, %v5462_v4  ;;  %4820 = vmatpush1.bf16.msra.mxu1 %v4819_v26  ;;  %v7721_v4 = vld [vmem:[#allocation2 + $0x48] sm:$0xff]  ;;  %v4828_v47 = vpack.c.bf16 %v3162_v46, %v3161_v12 }
 0x281   : > { %3376 = vmatprep.mubr.f32.mxu1 %v3025_v9  ;;  %4821 = vmatprep.subr.bf16.mxu1 %v8444_v63  ;;  %v8479_v9 = vpack.i.bf16 %v7384_v42, %v7416_v20  ;;  %v3165_v42 = vld [vmem:[%s8388_s3 + $0x180] sm:$0xff]  ;;  %v8483_v46 = vpack.i.bf16 %v7436_v33, %v7468_v2 }
 0x282   : > { %v5465_v51 = vpop.permute.xlu1 %5464  ;;  %v3169_v33 = vld [vmem:[%s8388_s3 + $0x1a0] sm:$0xff] }
 0x283   : > { %v5467_v13 = vunpack.i.h.bf16 %v5465_v51  ;;  %v5466_v48 = vunpack.i.l.bf16 %v5465_v51  ;;  %3377 = vmatmul.mubr.f32.gmra.mrb[40].mxu1 %v2993_v25  ;;  %5624 = vrot.lane.b32.xlu1 %v8475_v24, %s5825_s10  ;;  %v8480_v25 = vpack.i.bf16 %v7408_v62, %v7425_v32  ;;  %v7741_v51 = vld [vmem:[#allocation2 + $0x50] sm:$0xff]  ;;  %v3166_v62 = vld [vmem:[%s8388_s3 + $0x188] sm:$0xff]  ;;  %v8481_v24 = vpack.i.bf16 %v7410_v30, %v7442_v1 }
 0x284   : > { %5629 = vrot.lane.b32.xlu0 %v8476_v36, %s5825_s10  ;;  %4823 = vmatpush1.bf16.msra.mxu1 %v4822_v34  ;;  %v2259_v34 = vld [vmem:[#allocation2 + $0x52] sm:$0xff]  ;;  %v8482_v36 = vpack.i.bf16 %v7434_v29, %v7451_v0 }
 0x285   : > { %v3026_v39 = vsel %vm1025_vm0, %v2257_v23, %v5466_v48  ;;  %v2994_v59 = vsel %vm1025_vm0, %v7701_v49, %v5467_v13  ;;  %v5470_v26 = vpop.permute.xlu0 %5469  ;;  %4824 = vmatprep.subr.bf16.mxu1 %v8444_v63  ;;  %v4831_v13 = vpack.c.bf16 %v3164_v54, %v3163_v17  ;;  %v2260_v23 = vld [vmem:[#allocation2 + $0x62] sm:$0xff]  ;;  %v3167_v30 = vld [vmem:[%s8388_s3 + $0x190] sm:$0xff]  ;;  %v3168_v29 = vld [vmem:[%s8388_s3 + $0x198] sm:$0xff] }
 0x286   : > { %3381 = vmatprep.mubr.f32.mxu1 %v3026_v39  ;;  %v5472_v40 = vunpack.i.h.bf16 %v5470_v26  ;;  %v5471_v45 = vunpack.i.l.bf16 %v5470_v26  ;;  %v7761_v39 = vld [vmem:[#allocation2 + $0x60] sm:$0xff]  ;;  %v4834_v26 = vpack.c.bf16 %v3166_v62, %v3165_v42  ;;  %v7801_v54 = vld [vmem:[#allocation2 + $0x78] sm:$0xff] }
 0x287   : > { %3382 = vmatmul.mubr.f32.gmra.mrb[42].mxu1 %v2994_v59  ;;  %5634 = vrot.lane.b32.xlu1 %v8477_v52, %s5825_s10  ;;  %v7781_v52 = vld [vmem:[#allocation2 + $0x68] sm:$0xff]  ;;  %v2262_v17 = vld [vmem:[#allocation2 + $0x7a] sm:$0xff] }
 0x288   : > { %5639 = vrot.lane.b32.xlu0 %v8478_v58, %s5825_s10  ;;  %v3027_v35 = vsel %vm1025_vm0, %v2258_v21, %v5471_v45  ;;  %v2995_v57 = vsel %vm1025_vm0, %v7721_v4, %v5472_v40  ;;  %4826 = vmatpush1.bf16.msra.mxu1 %v4825_v14  ;;  %v8484_v40 = vpack.i.bf16 %v7460_v5, %v7477_v38  ;;  %v2261_v45 = vld [vmem:[#allocation2 + $0x6a] sm:$0xff] }
 0x289   : > { %3386 = vmatprep.mubr.f32.mxu1 %v3027_v35  ;;  %4827 = vmatprep.subr.bf16.mxu1 %v8444_v63  ;;  %v4837_v35 = vpack.c.bf16 %v3168_v29, %v3167_v30  ;;  %v3170_v5 = vld [vmem:[%s8388_s3 + $0x1a8] sm:$0xff] }
 0x28a   : > { %v5475_v8 = vpop.permute.xlu1 %5474 }
 0x28b   : > { %v5477_v16 = vunpack.i.h.bf16 %v5475_v8  ;;  %v5476_v6 = vunpack.i.l.bf16 %v5475_v8  ;;  %3387 = vmatmul.mubr.f32.gmra.mrb[44].mxu1 %v2995_v57  ;;  %5644 = vrot.lane.b32.xlu1 %v8479_v9, %s5825_s10  ;;  %v8486_v8 = vpack.i.bf16 %v7486_v31, %v7503_v44  ;;  %v4840_v9 = vpack.c.bf16 %v3170_v5, %v3169_v33  ;;  %v3172_v31 = vld [vmem:[%s8388_s3 + $0x1b8] sm:$0xff]  ;;  %v3178_v33 = vld [vmem:[%s8388_s3 + $0x1e8] sm:$0xff] }
 0x28c   : > { %5649 = vrot.lane.b32.xlu0 %v8480_v25, %s5825_s10  ;;  %4829 = vmatpush1.bf16.msra.mxu1 %v4828_v47  ;;  %v8485_v47 = vpack.i.bf16 %v7462_v11, %v7494_v50  ;;  %v3171_v11 = vld [vmem:[%s8388_s3 + $0x1b0] sm:$0xff] }
 0x28d   : > { %v3028_v22 = vsel %vm1025_vm0, %v2259_v34, %v5476_v6  ;;  %v2996_v55 = vsel %vm1025_vm0, %v7741_v51, %v5477_v16  ;;  %v5480_v48 = vpop.permute.xlu0 %5479  ;;  %4830 = vmatprep.subr.bf16.mxu1 %v8444_v63  ;;  %v8487_v34 = vpack.i.bf16 %v7488_v3, %v7520_v18  ;;  %v4843_v62 = vpack.c.bf16 %v3172_v31, %v3171_v11  ;;  %v3173_v3 = vld [vmem:[%s8388_s3 + $0x1c0] sm:$0xff]  ;;  %v8493_v11 = vld [vmem:[#allocation14_spill] sm:$0xff] }
 0x28e   : > { %3391 = vmatprep.mubr.f32.mxu1 %v3028_v22  ;;  %v5482_v20 = vunpack.i.h.bf16 %v5480_v48  ;;  %v5481_v32 = vunpack.i.l.bf16 %v5480_v48  ;;  %v8488_v22 = vpack.i.bf16 %v7512_v27, %v7529_v41  ;;  %v3174_v27 = vld [vmem:[%s8388_s3 + $0x1c8] sm:$0xff] }
 0x28f   : > { %3392 = vmatmul.mubr.f32.gmra.mrb[46].mxu1 %v2996_v55  ;;  %5654 = vrot.lane.b32.xlu1 %v8481_v24, %s5825_s10  ;;  %v2263_v55 = vld [vmem:[#allocation2 + $0x82] sm:$0xff]  ;;  %v8490_v24 = vpack.i.bf16 %v7538_v56, %v7555_v61  ;;  %v3175_v56 = vld [vmem:[%s8388_s3 + $0x1d0] sm:$0xff] }
 0x290   : > { %5659 = vrot.lane.b32.xlu0 %v8482_v36, %s5825_s10  ;;  %v3029_v59 = vsel %vm1025_vm0, %v2260_v23, %v5481_v32  ;;  %v2997_v14 = vsel %vm1025_vm0, %v7761_v39, %v5482_v20  ;;  %4832 = vmatpush1.bf16.msra.mxu1 %v4831_v13  ;;  %v7821_v13 = vld [vmem:[#allocation2 + $0x80] sm:$0xff]  ;;  %v8489_v32 = vpack.i.bf16 %v7514_v28, %v7546_v10  ;;  %v2264_v36 = vld [vmem:[#allocation2 + $0x92] sm:$0xff] }
 0x291   : > { %3396 = vmatprep.mubr.f32.mxu1 %v3029_v59  ;;  %4833 = vmatprep.subr.bf16.mxu1 %v8444_v63  ;;  %v7841_v23 = vld [vmem:[#allocation2 + $0x90] sm:$0xff]  ;;  %v3176_v10 = vld [vmem:[%s8388_s3 + $0x1d8] sm:$0xff] }
 0x292   : > { %v5485_v12 = vpop.permute.xlu1 %5484 }
 0x293   : > { %v5487_v1 = vunpack.i.h.bf16 %v5485_v12  ;;  %v5486_v0 = vunpack.i.l.bf16 %v5485_v12  ;;  %3397 = vmatmul.mubr.f32.gmra.mrb[48].mxu1 %v2997_v14  ;;  %5664 = vrot.lane.b32.xlu1 %v8483_v46, %s5825_s10  ;;  %v4846_v12 = vpack.c.bf16 %v3174_v27, %v3173_v3  ;;  %v7913_v3 = vld [vmem:[#allocation2 + $0x15a] sm:$0xff]  ;;  %v7915_v27 = vld [vmem:[#allocation2 + $0x16a] sm:$0xff] }
 0x294   : > { %5669 = vrot.lane.b32.xlu0 %v8484_v40, %s5825_s10  ;;  %4835 = vmatpush1.bf16.msra.mxu1 %v4834_v26  ;;  %v7846_v26 = vld [vmem:[#allocation2 + $0x122] sm:$0xff] }
 0x295   : > { %v3030_v58 = vsel %vm1025_vm0, %v2261_v45, %v5486_v0  ;;  %v2998_v21 = vsel %vm1025_vm0, %v7781_v52, %v5487_v1  ;;  %v5490_v57 = vpop.permute.xlu0 %5489  ;;  %4836 = vmatprep.subr.bf16.mxu1 %v8444_v63  ;;  %v5708_v28 = vpack.i.bf16 %v7846_v26, %v7583_v19  ;;  %v8491_v1 = vpack.i.bf16 %v7540_v37, %v7564_v7  ;;  %v2265_v19 = vld [vmem:[#allocation2 + $0x9a] sm:$0xff]  ;;  %v7867_v45 = vld [vmem:[#allocation2 + $0x12a] sm:$0xff] }
 0x296   : > { %3401 = vmatprep.mubr.f32.mxu1 %v3030_v58  ;;  %v5492_v2 = vunpack.i.h.bf16 %v5490_v57  ;;  %v5491_v38 = vunpack.i.l.bf16 %v5490_v57  ;;  %v7862_v0 = vld [vmem:[#allocation2 + $0x98] sm:$0xff]  ;;  %v5713_v37 = vpack.i.bf16 %v7867_v45, %v7593_v60  ;;  %v3177_v57 = vld [vmem:[%s8388_s3 + $0x1e0] sm:$0xff]  ;;  %v2266_v60 = vld [vmem:[#allocation2 + $0xaa] sm:$0xff] }
 0x297   : > { %3402 = vmatmul.mubr.f32.gmra.mrb[50].mxu1 %v2998_v21  ;;  %5674 = vrot.lane.b32.xlu1 %v8485_v47, %s5825_s10  ;;  %v7869_v58 = vld [vmem:[#allocation2 + $0x13a] sm:$0xff]  ;;  %v4849_v21 = vpack.c.bf16 %v3176_v10, %v3175_v56  ;;  %v7933_v10 = vld [vmem:[#allocation2 + $0x172] sm:$0xff] }
 0x298   : > { %5679 = vrot.lane.b32.xlu0 %v8486_v8, %s5825_s10  ;;  %v3031_v16 = vsel %vm1025_vm0, %v2262_v17, %v5491_v38  ;;  %v2999_v6 = vsel %vm1025_vm0, %v7801_v54, %v5492_v2  ;;  %4838 = vmatpush1.bf16.msra.mxu1 %v4837_v35  ;;  %v5718_v7 = vpack.i.bf16 %v7869_v58, %v7603_v15  ;;  %v7884_v38 = vld [vmem:[#allocation2 + $0xa8] sm:$0xff]  ;;  %v7891_v17 = vld [vmem:[#allocation2 + $0x152] sm:$0xff]  ;;  %v7928_v56 = vld [vmem:[#allocation2 + $0xc0] sm:$0xff] }
 0x299   : > { %3406 = vmatprep.mubr.f32.mxu1 %v3031_v16  ;;  %4839 = vmatprep.subr.bf16.mxu1 %v8444_v63  ;;  %v7889_v8 = vld [vmem:[#allocation2 + $0x142] sm:$0xff]  ;;  %v4852_v16 = vpack.c.bf16 %v3178_v33, %v3177_v57  ;;  %v5728_v31 = vpack.i.bf16 %v7891_v17, %v8493_v11 }
 0x29a   : > { %v5495_v25 = vpop.permute.xlu1 %5494 }
 0x29b   : > { %v5497_v50 = vunpack.i.h.bf16 %v5495_v25  ;;  %v5496_v44 = vunpack.i.l.bf16 %v5495_v25  ;;  %3407 = vmatmul.mubr.f32.gmra.mrb[52].mxu1 %v2999_v6  ;;  %5684 = vrot.lane.b32.xlu1 %v8487_v34, %s5825_s10 }
 0x29c   : > { %5689 = vrot.lane.b32.xlu0 %v8488_v22, %s5825_s10  ;;  %4841 = vmatpush1.bf16.msra.mxu1 %v4840_v9  ;;  %v8492_v9 = vld [vmem:[#allocation13_spill] sm:$0xff] }
 0x29d   : > { %v3032_v48 = vsel %vm1025_vm0, %v2263_v55, %v5496_v44  ;;  %v3000_v42 = vsel %vm1025_vm0, %v7821_v13, %v5497_v50  ;;  %v5500_v20 = vpop.permute.xlu0 %5499  ;;  %4842 = vmatprep.subr.bf16.mxu1 %v8444_v63  ;;  %v5723_v25 = vpack.i.bf16 %v7889_v8, %v8492_v9  ;;  %v3179_v50 = vld [vmem:[%s8388_s3 + $0x1f0] sm:$0xff]  ;;  %v3180_v44 = vld [vmem:[%s8388_s3 + $0x1f8] sm:$0xff]  ;;  %v7904_v55 = vld [vmem:[#allocation2 + $0x181] sm:$0xff] }
 0x29e   : > { %3411 = vmatprep.mubr.f32.mxu1 %v3032_v48  ;;  %v5502_v18 = vunpack.i.h.bf16 %v5500_v20  ;;  %v5501_v41 = vunpack.i.l.bf16 %v5500_v20  ;;  %v2267_v48 = vld [vmem:[#allocation2 + $0xb2] sm:$0xff] }
 0x29f   : > { %3412 = vmatmul.mubr.f32.gmra.mrb[54].mxu1 %v3000_v42  ;;  %5694 = vrot.lane.b32.xlu1 %v8489_v32, %s5825_s10  ;;  %v7908_v42 = vld [vmem:[#allocation2 + $0xb0] sm:$0xff]  ;;  %v5733_v32 = vpack.i.bf16 %v7913_v3, %v7636_v53 }
 0x2a0   : > { %5699 = vrot.lane.b32.xlu0 %v8490_v24, %s5825_s10  ;;  %v3033_v59 = vsel %vm1025_vm0, %v2264_v36, %v5501_v41  ;;  %v3001_v14 = vsel %vm1025_vm0, %v7841_v23, %v5502_v18  ;;  %4844 = vmatpush1.bf16.msra.mxu1 %v4843_v62  ;;  %v4855_v18 = vpack.c.bf16 %v3180_v44, %v3179_v50  ;;  %v2271_v50 = vld [vmem:[#allocation2 + $0xe2] sm:$0xff] }
 0x2a1   : > { %3416 = vmatprep.mubr.f32.mxu1 %v3033_v59  ;;  %4845 = vmatprep.subr.bf16.mxu1 %v8444_v63  ;;  %v5738_v24 = vpack.i.bf16 %v7915_v27, %v7904_v55  ;;  %v7955_v44 = vld [vmem:[#allocation2 + $0xe0] sm:$0xff] }
 0x2a2   : > { %v5505_v30 = vpop.permute.xlu1 %5504 }
 0x2a3   : > { %v5507_v61 = vunpack.i.h.bf16 %v5505_v30  ;;  %v5506_v29 = vunpack.i.l.bf16 %v5505_v30  ;;  %3417 = vmatmul.mubr.f32.gmra.mrb[56].mxu1 %v3001_v14  ;;  %5704 = vrot.lane.b32.xlu1 %v8491_v1, %s5825_s10  ;;  %v7922_v14 = vld [vmem:[#allocation2 + $0x189] sm:$0xff]  ;;  %v2443_v30 = vld [vmem:[#allocation2 + $0x199] sm:$0xff] }
 0x2a4   : > { %5709 = vrot.lane.b32.xlu0 %v5708_v28, %s5825_s10  ;;  %4847 = vmatpush1.bf16.msra.mxu1 %v4846_v12  ;;  %v7924_v12 = vld [vmem:[#allocation2 + $0x182] sm:$0xff] }
 0x2a5   : > { %v3034_v46 = vsel %vm1025_vm0, %v2265_v19, %v5506_v29  ;;  %v3002_v40 = vsel %vm1025_vm0, %v7862_v0, %v5507_v61  ;;  %v5510_v35 = vpop.permute.xlu0 %5509  ;;  %4848 = vmatprep.subr.bf16.mxu1 %v8444_v63  ;;  %v2268_v28 = vld [vmem:[#allocation2 + $0xc2] sm:$0xff]  ;;  %v5743_v29 = vpack.i.bf16 %v7933_v10, %v7922_v14  ;;  %v5748_v1 = vpack.i.bf16 %v7924_v12, %v2443_v30  ;;  %v8494_v19 = vld [vmem:[#allocation6_spill] sm:$0xff] }
 0x2a6   : > { %3421 = vmatprep.mubr.f32.mxu1 %v3034_v46  ;;  %v5512_v5 = vunpack.i.h.bf16 %v5510_v35  ;;  %v5511_v2 = vunpack.i.l.bf16 %v5510_v35  ;;  %v2444_v35 = vld [vmem:[#allocation2 + $0x1a1] sm:$0xff] }
 0x2a7   : > { %3422 = vmatmul.mubr.f32.gmra.mrb[58].mxu1 %v3002_v40  ;;  %5714 = vrot.lane.b32.xlu1 %v5713_v37, %s5825_s10  ;;  %v2269_v37 = vld [vmem:[#allocation2 + $0xca] sm:$0xff] }
 0x2a8   : > { %5719 = vrot.lane.b32.xlu0 %v5718_v7, %s5825_s10  ;;  %v3035_v15 = vsel %vm1025_vm0, %v2266_v60, %v5511_v2  ;;  %v3003_v47 = vsel %vm1025_vm0, %v7884_v38, %v5512_v5  ;;  %4850 = vmatpush1.bf16.msra.mxu1 %v4849_v21  ;;  %v7939_v21 = vld [vmem:[#allocation2 + $0x18a] sm:$0xff] }
 0x2a9   : > { %3426 = vmatprep.mubr.f32.mxu1 %v3035_v15  ;;  %4851 = vmatprep.subr.bf16.mxu1 %v8444_v63  ;;  %v7943_v7 = vld [vmem:[#allocation2 + $0xc8] sm:$0xff]  ;;  %v5753_v2 = vpack.i.bf16 %v7939_v21, %v2444_v35 }
 0x2aa   : > { %v5515_v6 = vpop.permute.xlu1 %5514  ;;  %v7970_v35 = vld [vmem:[#allocation2 + $0x108] sm:$0xff] }
 0x2ab   : > { %v5517_v34 = vunpack.i.h.bf16 %v5515_v6  ;;  %v5516_v22 = vunpack.i.l.bf16 %v5515_v6  ;;  %3427 = vmatmul.mubr.f32.gmra.mrb[60].mxu1 %v3003_v47  ;;  %5724 = vrot.lane.b32.xlu1 %v5723_v25, %s5825_s10  ;;  %v2270_v47 = vld [vmem:[#allocation2 + $0xda] sm:$0xff] }
 0x2ac   : > { %5729 = vrot.lane.b32.xlu0 %v5728_v31, %s5825_s10  ;;  %4853 = vmatpush1.bf16.msra.mxu1 %v4852_v16  ;;  %v7950_v16 = vld [vmem:[#allocation2 + $0xd8] sm:$0xff] }
 0x2ad   : > { %v3036_v62 = vsel %vm1025_vm0, %v2267_v48, %v5516_v22  ;;  %v3004_v20 = vsel %vm1025_vm0, %v7908_v42, %v5517_v34  ;;  %v5520_v41 = vpop.permute.xlu0 %5519  ;;  %4854 = vmatprep.subr.bf16.mxu1 %v8444_v63 }
 0x2ae   : > { %3431 = vmatprep.mubr.f32.mxu1 %v3036_v62  ;;  %v5522_v36 = vunpack.i.h.bf16 %v5520_v41  ;;  %v5521_v59 = vunpack.i.l.bf16 %v5520_v41  ;;  %v7960_v41 = vld [vmem:[#allocation2 + $0xf0] sm:$0xff] }
 0x2af   : > { %3432 = vmatmul.mubr.f32.gmra.mrb[62].mxu1 %v3004_v20  ;;  %5734 = vrot.lane.b32.xlu1 %v5733_v32, %s5825_s10 }
 0x2b0   : > { %5739 = vrot.lane.b32.xlu0 %v5738_v24, %s5825_s10  ;;  %v3037_v53 = vsel %vm1025_vm0, %v2268_v28, %v5521_v59  ;;  %v3005_v63 = vsel %vm1025_vm0, %v7928_v56, %v5522_v36  ;;  %4856 = vmatpush1.bf16.msra.mxu1 %v4855_v18  ;;  %v2272_v18 = vld [vmem:[#allocation2 + $0xf2] sm:$0xff]  ;;  %v2273_v28 = vld [vmem:[#allocation2 + $0xfa] sm:$0xff] }
 0x2b1   : > { %3436 = vmatprep.mubr.f32.mxu1 %v3037_v53  ;;  %4873 = vmatprep.subr.bf16.mxu1 %v8494_v19  ;;  %v7965_v53 = vld [vmem:[#allocation2 + $0xf8] sm:$0xff] }
 0x2b2   : > { %v5525_v61 = vpop.permute.xlu1 %5524 }
 0x2b3   : > { %v5527_v46 = vunpack.i.h.bf16 %v5525_v61  ;;  %v5526_v40 = vunpack.i.l.bf16 %v5525_v61  ;;  %3437 = vmatmul.mubr.f32.gmra.mrb[64].mxu1 %v3005_v63  ;;  %5744 = vrot.lane.b32.xlu1 %v5743_v29, %s5825_s10 }
 0x2b4   : > { %5749 = vrot.lane.b32.xlu0 %v5748_v1, %s5825_s10 }
 0x2b5   : > { %v3038_v57 = vsel %vm1025_vm0, %v2269_v37, %v5526_v40  ;;  %v3006_v33 = vsel %vm1025_vm0, %v7943_v7, %v5527_v46  ;;  %v5530_v5 = vpop.permute.xlu0 %5529  ;;  %v2274_v40 = vld [vmem:[#allocation2 + $0x10a] sm:$0xff] }
 0x2b6   : > { %3441 = vmatprep.mubr.f32.mxu1 %v3038_v57  ;;  %v5532_v60 = vunpack.i.h.bf16 %v5530_v5  ;;  %v5531_v15 = vunpack.i.l.bf16 %v5530_v5 }
 0x2b7   : > { %3442 = vmatmul.mubr.f32.gmra.mrb[66].mxu1 %v3006_v33  ;;  %5754 = vrot.lane.b32.xlu1 %v5753_v2, %s5825_s10  ;;  %s215_s10 = sand.u32 1, %s5814_s19  }
 0x2b8   : > { %v3039_v6 = vsel %vm1025_vm0, %v2270_v47, %v5531_v15  ;;  %v3007_v9 = vsel %vm1025_vm0, %v7950_v16, %v5532_v60  ;;  %v2275_v60 = vld [vmem:[#allocation2 + $0x112] sm:$0xff]  ;;  %s4143_s6 = sshll.u32 %s215_s10, 8  ;;  %s8344_s22 = scalar_lea.sflag [#allocation4], %s215_s10 }
 0x2b9   : > { %3446 = vmatprep.mubr.f32.mxu1 %v3039_v6  ;;  %v7975_v15 = vld [vmem:[#allocation2 + $0x110] sm:$0xff]  ;;  %s8188_s7 = scalar_lea.vmem [#allocation3], %s4143_s6 }
 0x2ba   : > { %v5535_v25 = vpop.permute.xlu1 %5534  ;;  %s4077_s9 = sshll.u32 %s8188_s7, 4  ;;  %s8336_s9 = int_to_ptr.vmem [resolvable:$true] %s4077_s9 }
 0x2bb   : > { %v5537_v11 = vunpack.i.h.bf16 %v5535_v25  ;;  %v5536_v31 = vunpack.i.l.bf16 %v5535_v25  ;;  %3447 = vmatmul.mubr.f32.gmra.mrb[68].mxu1 %v3007_v9  ;;  %p5767_p0 = scmp.lt.s32.totalorder %s8336_s9, %s5765_s15 }
 0x2bd   : > { %v3040_v34 = vsel %vm1025_vm0, %v2271_v50, %v5536_v31  ;;  %v3008_v22 = vsel %vm1025_vm0, %v7955_v44, %v5537_v11  ;;  %v5540_v48 = vpop.permute.xlu0 %5539  ;;  %v7980_v31 = vld [vmem:[#allocation2 + $0x120] sm:$0xff] }
 0x2be   : > { %3451 = vmatprep.mubr.f32.mxu1 %v3040_v34  ;;  %v5542_v62 = vunpack.i.h.bf16 %v5540_v48  ;;  %v5541_v20 = vunpack.i.l.bf16 %v5540_v48 }
 0x2bf   : > { %3452 = vmatmul.mubr.f32.gmra.mrb[70].mxu1 %v3008_v22 }
 0x2c0   : > { %v3041_v32 = vsel %vm1025_vm0, %v2272_v18, %v5541_v20  ;;  %v3009_v24 = vsel %vm1025_vm0, %v7960_v41, %v5542_v62  ;;  %v7986_v20 = vld [vmem:[#allocation2 + $0x128] sm:$0xff] }
 0x2c1   : > { %3456 = vmatprep.mubr.f32.mxu1 %v3041_v32 }
 0x2c2   : > { %v5545_v36 = vpop.permute.xlu1 %5544 }
 0x2c3   : > { %v5547_v59 = vunpack.i.h.bf16 %v5545_v36  ;;  %v5546_v30 = vunpack.i.l.bf16 %v5545_v36  ;;  %3457 = vmatmul.mubr.f32.gmra.mrb[72].mxu1 %v3009_v24 }
 0x2c5   : > { %v3042_v63 = vsel %vm1025_vm0, %v2273_v28, %v5546_v30  ;;  %v3010_v61 = vsel %vm1025_vm0, %v7965_v53, %v5547_v59  ;;  %v5550_v29 = vpop.permute.xlu0 %5549  ;;  %v7992_v59 = vld [vmem:[#allocation2 + $0x138] sm:$0xff] }
 0x2c6   : > { %3461 = vmatprep.mubr.f32.mxu1 %v3042_v63  ;;  %v5552_v1 = vunpack.i.h.bf16 %v5550_v29  ;;  %v5551_v46 = vunpack.i.l.bf16 %v5550_v29 }
 0x2c7   : > { %3462 = vmatmul.mubr.f32.gmra.mrb[74].mxu1 %v3010_v61 }
 0x2c8   : > { %v3043_v37 = vsel %vm1025_vm0, %v2274_v40, %v5551_v46  ;;  %v3011_v57 = vsel %vm1025_vm0, %v7970_v35, %v5552_v1  ;;  %v8002_v46 = vld [vmem:[#allocation2 + $0x140] sm:$0xff] }
 0x2c9   : > { %v5555_v33 = vpop.permute.xlu1 %5554  ;;  %3466 = vmatprep.mubr.f32.mxu1 %v3043_v37 }
 0x2ca   : > { %v5557_v5 = vunpack.i.h.bf16 %v5555_v33  ;;  %v5556_v2 = vunpack.i.l.bf16 %v5555_v33 }
 0x2cb   : > { %3467 = vmatmul.mubr.f32.gmra.mrb[76].mxu1 %v3011_v57 }
 0x2cc   : > { %v3044_v47 = vsel %vm1025_vm0, %v2275_v60, %v5556_v2  ;;  %v3012_v6 = vsel %vm1025_vm0, %v7975_v15, %v5557_v5  ;;  %v8495_v2 = vld [vmem:[#allocation10_spill] sm:$0xff] }
 0x2cd   : > { %v5560_v9 = vpop.permute.xlu0 %5559  ;;  %3471 = vmatprep.mubr.f32.mxu1 %v3044_v47 }
 0x2ce   : > { %v5562_v25 = vunpack.i.h.bf16 %v5560_v9  ;;  %v5561_v11 = vunpack.i.l.bf16 %v5560_v9 }
 0x2cf   : > { %3472 = vmatmul.mubr.f32.gmra.mrb[78].mxu1 %v3012_v6 }
 0x2d0   : > { %v3045_v50 = vsel %vm1025_vm0, %v7846_v26, %v5561_v11  ;;  %v3013_v34 = vsel %vm1025_vm0, %v7980_v31, %v5562_v25 }
 0x2d1   : > { %v5565_v22 = vpop.permute.xlu1 %5564  ;;  %3476 = vmatprep.mubr.f32.mxu1 %v3045_v50  ;;  %v8496_v50 = vld [vmem:[#allocation11_spill] sm:$0xff] }
 0x2d2   : > { %v5567_v48 = vunpack.i.h.bf16 %v5565_v22  ;;  %v5566_v62 = vunpack.i.l.bf16 %v5565_v22 }
 0x2d3   : > { %3477 = vmatmul.mubr.f32.gmra.mrb[80].mxu1 %v3013_v34 }
 0x2d4   : > { %v3046_v18 = vsel %vm1025_vm0, %v7867_v45, %v5566_v62  ;;  %v3014_v32 = vsel %vm1025_vm0, %v7986_v20, %v5567_v48 }
 0x2d5   : > { %v5570_v24 = vpop.permute.xlu0 %5569  ;;  %3481 = vmatprep.mubr.f32.mxu1 %v3046_v18  ;;  %v8497_v18 = vld [vmem:[#allocation12_spill] sm:$0xff] }
 0x2d6   : > { %v5572_v36 = vunpack.i.h.bf16 %v5570_v24  ;;  %v5571_v26 = vunpack.i.l.bf16 %v5570_v24 }
 0x2d7   : > { %3482 = vmatmul.mubr.f32.gmra.mrb[82].mxu1 %v3014_v32 }
 0x2d8   : > { %v3047_v30 = vsel %vm1025_vm0, %v7869_v58, %v5571_v26  ;;  %v3015_v28 = vsel %vm1025_vm0, %v7992_v59, %v5572_v36 }
 0x2d9   : > { %v7998_v63 = vpop.f32.mrb[64].mxu0  ;;  %v5575_v61 = vpop.permute.xlu1 %5574  ;;  %3486 = vmatprep.mubr.f32.mxu1 %v3047_v30 }
 0x2da   : > { %v5577_v45 = vunpack.i.h.bf16 %v5575_v61  ;;  %v5576_v29 = vunpack.i.l.bf16 %v5575_v61  ;;  %v8000_v1 = vpop.f32.mrb[65].mxu0 }
 0x2db   : > { %3487 = vmatmul.mubr.f32.gmra.mrb[84].mxu1 %v3015_v28 }
 0x2dc   : > { %v3048_v40 = vsel %vm1025_vm0, %v7889_v8, %v5576_v29  ;;  %v3016_v58 = vsel %vm1025_vm0, %v8002_v46, %v5577_v45  ;;  %v8028_v45 = vld [vmem:[#allocation2 + $0x170] sm:$0xff] }
 0x2dd   : > { %v5580_v37 = vpop.permute.xlu0 %5579  ;;  %3491 = vmatprep.mubr.f32.mxu1 %v3048_v40 }
 0x2de   : > { %v5582_v57 = vunpack.i.h.bf16 %v5580_v37  ;;  %v5581_v33 = vunpack.i.l.bf16 %v5580_v37 }
 0x2df   : > { %3492 = vmatmul.mubr.f32.gmra.mrb[86].mxu1 %v3016_v58 }
 0x2e0   : > { %v3049_v5 = vsel %vm1025_vm0, %v7891_v17, %v5581_v33  ;;  %v3017_v60 = vsel %vm1025_vm0, %v8495_v2, %v5582_v57 }
 0x2e1   : > { %v8012_v47 = vpop.f32.mrb[66].mxu0  ;;  %v5585_v6 = vpop.permute.xlu1 %5584  ;;  %3496 = vmatprep.mubr.f32.mxu1 %v3049_v5  ;;  %v2316_v5 = vld [vmem:[#allocation2 + $0x19] sm:$0xff] }
 0x2e2   : > { %v5587_v9 = vunpack.i.h.bf16 %v5585_v6  ;;  %v5586_v8 = vunpack.i.l.bf16 %v5585_v6  ;;  %v8014_v25 = vpop.f32.mrb[67].mxu0 }
 0x2e3   : > { %3497 = vmatmul.mubr.f32.gmra.mrb[88].mxu1 %v3017_v60 }
 0x2e4   : > { %v3050_v11 = vsel %vm1025_vm0, %v7913_v3, %v5586_v8  ;;  %v3018_v34 = vsel %vm1025_vm0, %v8496_v50, %v5587_v9 }
 0x2e5   : > { %v5590_v22 = vpop.permute.xlu0 %5589  ;;  %3501 = vmatprep.mubr.f32.mxu1 %v3050_v11 }
 0x2e6   : > { %v5592_v17 = vunpack.i.h.bf16 %v5590_v22  ;;  %v5591_v48 = vunpack.i.l.bf16 %v5590_v22 }
 0x2e7   : > { %3502 = vmatmul.mubr.f32.gmra.mrb[90].mxu1 %v3018_v34  ;;  %v8498_v34 = vld [vmem:[#allocation7_spill] sm:$0xff] }
 0x2e8   : > { %v3051_v62 = vsel %vm1025_vm0, %v7915_v27, %v5591_v48  ;;  %v3019_v32 = vsel %vm1025_vm0, %v8497_v18, %v5592_v17 }
 0x2e9   : > { %v8024_v24 = vpop.f32.mrb[68].mxu0  ;;  %v5595_v36 = vpop.permute.xlu1 %5594  ;;  %3506 = vmatprep.mubr.f32.mxu1 %v3051_v62 }
 0x2ea   : > { %v5597_v26 = vunpack.i.h.bf16 %v5595_v36  ;;  %v5596_v3 = vunpack.i.l.bf16 %v5595_v36  ;;  %v5600_v30 = vpop.permute.xlu0 %5599  ;;  %v8026_v28 = vpop.f32.mrb[69].mxu0 }
 0x2eb   : > { %3507 = vmatmul.mubr.f32.gmra.mrb[92].mxu1 %v3019_v32  ;;  %v5601_v61 = vunpack.i.l.bf16 %v5600_v30  ;;  %v5602_v40 = vunpack.i.h.bf16 %v5600_v30  ;;  %v8499_v32 = vld [vmem:[#allocation8_spill] sm:$0xff] }
 0x2ec   : > { %v3052_v29 = vsel %vm1025_vm0, %v7933_v10, %v5596_v3  ;;  %v3020_v27 = vsel %vm1025_vm0, %v8028_v45, %v5597_v26 }
 0x2ed   : > { %v5605_v58 = vpop.permute.xlu1 %5604  ;;  %3511 = vmatprep.mubr.f32.mxu1 %v3052_v29  ;;  %v3085_v57 = vsel %vm1025_vm0, %v7681_v43, %v5601_v61  ;;  %v3053_v6 = vsel %vm1025_vm0, %v2316_v5, %v5602_v40  ;;  %v2317_v43 = vld [vmem:[#allocation2 + $0x21] sm:$0xff]  ;;  %v2319_v29 = vld [vmem:[#allocation2 + $0x39] sm:$0xff] }
 0x2ee   : > { %v5606_v37 = vunpack.i.l.bf16 %v5605_v58  ;;  %v5610_v33 = vpop.permute.xlu0 %5609  ;;  %v5607_v2 = vunpack.i.h.bf16 %v5605_v58 }
 0x2ef   : > { %3512 = vmatmul.mubr.f32.gmra.mrb[94].mxu1 %v3020_v27  ;;  %v5611_v9 = vunpack.i.l.bf16 %v5610_v33  ;;  %v5612_v22 = vunpack.i.h.bf16 %v5610_v33  ;;  %v8500_v27 = vld [vmem:[#allocation9_spill] sm:$0xff] }
 0x2f0   : > { %3581 = vmatprep.mubr.f32.mxu1 %v3085_v57  ;;  %v3086_v11 = vsel %vm1025_vm0, %v7701_v49, %v5606_v37  ;;  %v3054_v17 = vsel %vm1025_vm0, %v2317_v43, %v5607_v2  ;;  %v2318_v49 = vld [vmem:[#allocation2 + $0x31] sm:$0xff] }
 0x2f1   : > { %v8036_v60 = vpop.f32.mrb[70].mxu0  ;;  %v5615_v50 = vpop.permute.xlu1 %5614  ;;  %v3087_v62 = vsel %vm1025_vm0, %v7721_v4, %v5611_v9  ;;  %v3055_v26 = vsel %vm1025_vm0, %v2318_v49, %v5612_v22 }
 0x2f2   : > { %v8039_v8 = vpop.f32.mrb[71].mxu0  ;;  %v5616_v48 = vunpack.i.l.bf16 %v5615_v50  ;;  %v5620_v18 = vpop.permute.xlu0 %5619 }
 0x2f3   : > { %3582 = vmatmul.mubr.f32.vlgmr.msra.gmra.mrb[32].mxu1 %v3053_v6  ;;  %v5621_v3 = vunpack.i.l.bf16 %v5620_v18  ;;  %v5622_v40 = vunpack.i.h.bf16 %v5620_v18  ;;  %v2322_v18 = vld [vmem:[#allocation2 + $0x61] sm:$0xff] }
 0x2f4   : > { %4877 = vmatpush3.bf16.msra.mxu1 %v8494_v19  ;;  %3586 = vmatprep.mubr.f32.mxu1 %v3086_v11  ;;  %v5617_v19 = vunpack.i.h.bf16 %v5615_v50  ;;  %v3088_v61 = vsel %vm1025_vm0, %v7741_v51, %v5616_v48  ;;  %v2320_v51 = vld [vmem:[#allocation2 + $0x49] sm:$0xff] }
 0x2f5   : > { %4874 = vmatprep.subr.bf16.mxu1 %v8498_v34  ;;  %v5625_v4 = vpop.permute.xlu1 %5624  ;;  %v3089_v57 = vsel %vm1025_vm0, %v7761_v39, %v5621_v3  ;;  %v3057_v6 = vsel %vm1025_vm0, %v2320_v51, %v5622_v40  ;;  %v2321_v39 = vld [vmem:[#allocation2 + $0x51] sm:$0xff] }
 0x2f6   : > { %v3056_v58 = vsel %vm1025_vm0, %v2319_v29, %v5617_v19  ;;  %v5626_v37 = vunpack.i.l.bf16 %v5625_v4  ;;  %v5630_v33 = vpop.permute.xlu0 %5629  ;;  %v5627_v5 = vunpack.i.h.bf16 %v5625_v4  ;;  %v2323_v4 = vld [vmem:[#allocation2 + $0x69] sm:$0xff] }
 0x2f7   : > { %3587 = vmatmul.mubr.f32.gmra.mrb[34].mxu1 %v3054_v17  ;;  %v5631_v9 = vunpack.i.l.bf16 %v5630_v33 }
 0x2f8   : > { %3591 = vmatprep.mubr.f32.mxu1 %v3087_v62  ;;  %4878 = vmatpush3.bf16.msra.mxu1 %v8498_v34  ;;  %v3090_v50 = vsel %vm1025_vm0, %v7781_v52, %v5626_v37  ;;  %v5632_v34 = vunpack.i.h.bf16 %v5630_v33  ;;  %v3058_v22 = vsel %vm1025_vm0, %v2321_v39, %v5627_v5  ;;  %v2324_v37 = vld [vmem:[#allocation2 + $0x79] sm:$0xff] }
 0x2f9   : > { %4875 = vmatprep.subr.bf16.mxu1 %v8499_v32  ;;  %v8050_v36 = vpop.f32.mrb[72].mxu0  ;;  %v5635_v43 = vpop.permute.xlu1 %5634  ;;  %v3091_v48 = vsel %vm1025_vm0, %v7801_v54, %v5631_v9 }
 0x2fa   : > { %v8053_v30 = vpop.f32.mrb[73].mxu0  ;;  %v5636_v17 = vunpack.i.l.bf16 %v5635_v43  ;;  %v5640_v62 = vpop.permute.xlu0 %5639  ;;  %v5637_v49 = vunpack.i.h.bf16 %v5635_v43  ;;  %v3059_v19 = vsel %vm1025_vm0, %v2322_v18, %v5632_v34 }
 0x2fb   : > { %3592 = vmatmul.mubr.f32.gmra.mrb[36].mxu1 %v3055_v26  ;;  %v5641_v52 = vunpack.i.l.bf16 %v5640_v62  ;;  %v5642_v29 = vunpack.i.h.bf16 %v5640_v62 }
 0x2fc   : > { %3596 = vmatprep.mubr.f32.mxu1 %v3088_v61  ;;  %4879 = vmatpush3.bf16.msra.mxu1 %v8499_v32  ;;  %v3092_v3 = vsel %vm1025_vm0, %v7821_v13, %v5636_v17  ;;  %v3060_v54 = vsel %vm1025_vm0, %v2323_v4, %v5637_v49  ;;  %v2326_v17 = vld [vmem:[#allocation2 + $0x91] sm:$0xff] }
 0x2fd   : > { %4876 = vmatprep.subr.bf16.mxu1 %v8500_v27  ;;  %v5645_v61 = vpop.permute.xlu1 %5644  ;;  %v3093_v40 = vsel %vm1025_vm0, %v7841_v23, %v5641_v52  ;;  %v3061_v51 = vsel %vm1025_vm0, %v2324_v37, %v5642_v29 }
 0x2ff   : > { %3597 = vmatmul.mubr.f32.gmra.mrb[38].mxu1 %v3056_v58  ;;  %v5650_v58 = vpop.permute.xlu0 %5649 }
 0x300   : > { %3601 = vmatprep.mubr.f32.mxu1 %v3089_v57  ;;  %4880 = vmatpush3.bf16.msra.mxu1 %v8500_v27  ;;  %v5646_v27 = vunpack.i.l.bf16 %v5645_v61  ;;  %v5647_v57 = vunpack.i.h.bf16 %v5645_v61  ;;  %v5651_v13 = vunpack.i.l.bf16 %v5650_v58  ;;  %v5652_v43 = vunpack.i.h.bf16 %v5650_v58 }
 0x301   : > { %v8063_v2 = vpop.f32.mrb[74].mxu0  ;;  %v5655_v9 = vpop.permute.xlu1 %5654 }
 0x302   : > { %v8066_v11 = vpop.f32.mrb[75].mxu0  ;;  %v5656_v39 = vunpack.i.l.bf16 %v5655_v9  ;;  %v3095_v34 = vsel %vm1025_vm0, %v7884_v38, %v5651_v13  ;;  %v3063_v18 = vsel %vm1025_vm0, %v2326_v17, %v5652_v43 }
 0x303   : > { %3602 = vmatmul.mubr.f32.gmra.mrb[40].mxu1 %v3057_v6  ;;  %v3094_v6 = vsel %vm1025_vm0, %v7862_v0, %v5646_v27  ;;  %v2328_v27 = vld [vmem:[#allocation2 + $0xa9] sm:$0xff] }
 0x304   : > { %3606 = vmatprep.mubr.f32.mxu1 %v3090_v50  ;;  %v2325_v50 = vld [vmem:[#allocation2 + $0x81] sm:$0xff] }
 0x305   : > { %v3062_v23 = vsel %vm1025_vm0, %v2325_v50, %v5647_v57  ;;  %v5665_v52 = vpop.permute.xlu1 %5664 }
 0x306   : > { %v5666_v4 = vunpack.i.l.bf16 %v5665_v52 }
 0x307   : > { %3607 = vmatmul.mubr.f32.gmra.mrb[42].mxu1 %v3058_v22  ;;  %v5660_v22 = vpop.permute.xlu0 %5659 }
 0x308   : > { %3611 = vmatprep.mubr.f32.mxu1 %v3091_v48  ;;  %v5657_v48 = vunpack.i.h.bf16 %v5655_v9  ;;  %v5661_v0 = vunpack.i.l.bf16 %v5660_v22  ;;  %v5662_v61 = vunpack.i.h.bf16 %v5660_v22 }
 0x309   : > { %v8073_v32 = vpop.f32.mrb[76].mxu0  ;;  %v5675_v13 = vpop.permute.xlu1 %5674 }
 0x30a   : > { %v8076_v26 = vpop.f32.mrb[77].mxu0  ;;  %v3097_v29 = vsel %vm1025_vm0, %v7928_v56, %v5661_v0  ;;  %v3065_v37 = vsel %vm1025_vm0, %v2328_v27, %v5662_v61  ;;  %v5676_v50 = vunpack.i.l.bf16 %v5675_v13  ;;  %v2332_v61 = vld [vmem:[#allocation2 + $0xd9] sm:$0xff]  ;;  %v2333_v27 = vld [vmem:[#allocation2 + $0xe1] sm:$0xff] }
 0x30b   : > { %3612 = vmatmul.mubr.f32.gmra.mrb[44].mxu1 %v3059_v19  ;;  %v3096_v19 = vsel %vm1025_vm0, %v7908_v42, %v5656_v39  ;;  %v2330_v39 = vld [vmem:[#allocation2 + $0xc1] sm:$0xff] }
 0x30c   : > { %3616 = vmatprep.mubr.f32.mxu1 %v3092_v3  ;;  %v2327_v3 = vld [vmem:[#allocation2 + $0x99] sm:$0xff] }
 0x30d   : > { %v3064_v38 = vsel %vm1025_vm0, %v2327_v3, %v5657_v48  ;;  %v5685_v48 = vpop.permute.xlu1 %5684 }
 0x30f   : > { %3617 = vmatmul.mubr.f32.gmra.mrb[46].mxu1 %v3060_v54  ;;  %v5670_v54 = vpop.permute.xlu0 %5669 }
 0x310   : > { %3621 = vmatprep.mubr.f32.mxu1 %v3093_v40  ;;  %v5667_v40 = vunpack.i.h.bf16 %v5665_v52  ;;  %v5671_v42 = vunpack.i.l.bf16 %v5670_v54  ;;  %v5672_v9 = vunpack.i.h.bf16 %v5670_v54  ;;  %v5686_v52 = vunpack.i.l.bf16 %v5685_v48 }
 0x311   : > { %v8083_v33 = vpop.f32.mrb[78].mxu0  ;;  %v5695_v54 = vpop.permute.xlu1 %5694 }
 0x312   : > { %v8086_v5 = vpop.f32.mrb[79].mxu0  ;;  %v3099_v43 = vsel %vm1025_vm0, %v7950_v16, %v5671_v42  ;;  %v3067_v22 = vsel %vm1025_vm0, %v2330_v39, %v5672_v9  ;;  %v5696_v42 = vunpack.i.l.bf16 %v5695_v54 }
 0x313   : > { %3622 = vmatmul.mubr.f32.gmra.mrb[48].mxu1 %v3061_v51  ;;  %v3098_v51 = vsel %vm1025_vm0, %v7943_v7, %v5666_v4  ;;  %v3100_v7 = vsel %vm1025_vm0, %v7955_v44, %v5676_v50  ;;  %v3102_v44 = vsel %vm1025_vm0, %v7965_v53, %v5686_v52 }
 0x314   : > { %3626 = vmatprep.mubr.f32.mxu1 %v3094_v6  ;;  %v2329_v6 = vld [vmem:[#allocation2 + $0xb1] sm:$0xff]  ;;  %v3104_v53 = vsel %vm1025_vm0, %v7975_v15, %v5696_v42 }
 0x315   : > { %v3066_v56 = vsel %vm1025_vm0, %v2329_v6, %v5667_v40  ;;  %v5697_v6 = vunpack.i.h.bf16 %v5695_v54  ;;  %v5705_v50 = vpop.permute.xlu1 %5704  ;;  %v2405_v42 = vld [vmem:[#allocation2 + $0x150] sm:$0xff] }
 0x317   : > { %3627 = vmatmul.mubr.f32.gmra.mrb[50].mxu1 %v3062_v23  ;;  %v5680_v23 = vpop.permute.xlu0 %5679 }
 0x318   : > { %3631 = vmatprep.mubr.f32.mxu1 %v3095_v34  ;;  %v5677_v34 = vunpack.i.h.bf16 %v5675_v13  ;;  %v5681_v17 = vunpack.i.l.bf16 %v5680_v23  ;;  %v5682_v0 = vunpack.i.h.bf16 %v5680_v23  ;;  %v2334_v13 = vld [vmem:[#allocation2 + $0xf1] sm:$0xff] }
 0x319   : > { %v8093_v62 = vpop.f32.mrb[80].mxu0 }
 0x31a   : > { %v8096_v49 = vpop.f32.mrb[81].mxu0  ;;  %v3101_v16 = vsel %vm1025_vm0, %v7960_v41, %v5681_v17  ;;  %v3069_v4 = vsel %vm1025_vm0, %v2332_v61, %v5682_v0  ;;  %v2336_v17 = vld [vmem:[#allocation2 + $0x109] sm:$0xff]  ;;  %v5715_v0 = vpop.permute.xlu1 %5714 }
 0x31b   : > { %3632 = vmatmul.mubr.f32.gmra.mrb[52].mxu1 %v3063_v18  ;;  %v2331_v18 = vld [vmem:[#allocation2 + $0xc9] sm:$0xff]  ;;  %v5690_v3 = vpop.permute.xlu0 %5689 }
 0x31c   : > { %3636 = vmatprep.mubr.f32.mxu1 %v3096_v19  ;;  %v3068_v19 = vsel %vm1025_vm0, %v2331_v18, %v5677_v34  ;;  %v5692_v40 = vunpack.i.h.bf16 %v5690_v3  ;;  %v5706_v34 = vunpack.i.l.bf16 %v5705_v50 }
 0x31e   : > { %v3071_v9 = vsel %vm1025_vm0, %v2334_v13, %v5692_v40  ;;  %v3106_v15 = vsel %vm1025_vm0, %v7986_v20, %v5706_v34  ;;  %v5725_v54 = vpop.permute.xlu1 %5724  ;;  %v2340_v13 = vld [vmem:[#allocation2 + $0x139] sm:$0xff]  ;;  %v2407_v34 = vld [vmem:[#allocation2 + $0x168] sm:$0xff] }
 0x31f   : > { %3637 = vmatmul.mubr.f32.gmra.mrb[54].mxu1 %v3064_v38  ;;  %v5687_v38 = vunpack.i.h.bf16 %v5685_v48 }
 0x320   : > { %3641 = vmatprep.mubr.f32.mxu1 %v3097_v29  ;;  %v5691_v29 = vunpack.i.l.bf16 %v5690_v3  ;;  %v5716_v3 = vunpack.i.l.bf16 %v5715_v0 }
 0x321   : > { %v8103_v58 = vpop.f32.mrb[82].mxu0 }
 0x322   : > { %v8106_v57 = vpop.f32.mrb[83].mxu0  ;;  %v3103_v41 = vsel %vm1025_vm0, %v7970_v35, %v5691_v29  ;;  %v3108_v20 = vsel %vm1025_vm0, %v8002_v46, %v5716_v3 }
 0x323   : > { %3642 = vmatmul.mubr.f32.gmra.mrb[56].mxu1 %v3065_v37  ;;  %v3070_v37 = vsel %vm1025_vm0, %v2333_v27, %v5687_v38  ;;  %v2338_v38 = vld [vmem:[#allocation2 + $0x121] sm:$0xff]  ;;  %v2339_v27 = vld [vmem:[#allocation2 + $0x129] sm:$0xff] }
 0x324   : > { %3646 = vmatprep.mubr.f32.mxu1 %v3098_v51  ;;  %v5700_v51 = vpop.permute.xlu0 %5699 }
 0x325   : > { %v5702_v23 = vunpack.i.h.bf16 %v5700_v51 }
 0x327   : > { %3647 = vmatmul.mubr.f32.gmra.mrb[58].mxu1 %v3066_v56  ;;  %v5701_v56 = vunpack.i.l.bf16 %v5700_v51  ;;  %v3073_v48 = vsel %vm1025_vm0, %v2336_v17, %v5702_v23 }
 0x328   : > { %3651 = vmatprep.mubr.f32.mxu1 %v3099_v43  ;;  %v2335_v43 = vld [vmem:[#allocation2 + $0xf9] sm:$0xff] }
 0x329   : > { %v3072_v39 = vsel %vm1025_vm0, %v2335_v43, %v5697_v6  ;;  %v3105_v35 = vsel %vm1025_vm0, %v7980_v31, %v5701_v56  ;;  %v5727_v6 = vunpack.i.h.bf16 %v5725_v54  ;;  %v2406_v56 = vld [vmem:[#allocation2 + $0x158] sm:$0xff]  ;;  %v2341_v43 = vld [vmem:[#allocation2 + $0x141] sm:$0xff] }
 0x32b   : > { %3652 = vmatmul.mubr.f32.gmra.mrb[60].mxu1 %v3067_v22  ;;  %v5710_v22 = vpop.permute.xlu0 %5709 }
 0x32c   : > { %3656 = vmatprep.mubr.f32.mxu1 %v3100_v7  ;;  %v5707_v7 = vunpack.i.h.bf16 %v5705_v50  ;;  %v5711_v18 = vunpack.i.l.bf16 %v5710_v22  ;;  %v5712_v52 = vunpack.i.h.bf16 %v5710_v22  ;;  %v5735_v50 = vpop.permute.xlu1 %5734 }
 0x32e   : > { %v3107_v31 = vsel %vm1025_vm0, %v7992_v59, %v5711_v18  ;;  %v3075_v29 = vsel %vm1025_vm0, %v2338_v38, %v5712_v52  ;;  %v2343_v52 = vld [vmem:[#allocation2 + $0x159] sm:$0xff] }
 0x32f   : > { %3657 = vmatmul.mubr.f32.gmra.mrb[62].mxu1 %v3068_v19  ;;  %v2337_v19 = vld [vmem:[#allocation2 + $0x111] sm:$0xff]  ;;  %v5720_v61 = vpop.permute.xlu0 %5719 }
 0x330   : > { %3661 = vmatprep.mubr.f32.mxu1 %v3101_v16  ;;  %v3074_v16 = vsel %vm1025_vm0, %v2337_v19, %v5707_v7  ;;  %v5722_v40 = vunpack.i.h.bf16 %v5720_v61  ;;  %v2342_v7 = vld [vmem:[#allocation2 + $0x151] sm:$0xff]  ;;  %v5745_v19 = vpop.permute.xlu1 %5744 }
 0x333   : > { %3662 = vmatmul.mubr.f32.gmra.mrb[64].mxu1 %v3069_v4  ;;  %v5717_v4 = vunpack.i.h.bf16 %v5715_v0  ;;  %v5730_v51 = vpop.permute.xlu0 %5729 }
 0x334   : > { %3666 = vmatprep.mubr.f32.mxu1 %v3102_v44  ;;  %v5721_v44 = vunpack.i.l.bf16 %v5720_v61  ;;  %v5732_v23 = vunpack.i.h.bf16 %v5730_v51  ;;  %v5746_v61 = vunpack.i.l.bf16 %v5745_v19 }
 0x336   : > { %v3109_v59 = vsel %vm1025_vm0, %v2405_v42, %v5721_v44  ;;  %v3079_v18 = vsel %vm1025_vm0, %v2342_v7, %v5732_v23  ;;  %v5747_v44 = vunpack.i.h.bf16 %v5745_v19  ;;  %v2345_v42 = vld [vmem:[#allocation2 + $0x171] sm:$0xff]  ;;  %v2467_v23 = vld [vmem:[#allocation2 + $0x13a] sm:$0xff] }
 0x337   : > { %3667 = vmatmul.mubr.f32.gmra.mrb[66].mxu1 %v3070_v37  ;;  %v3076_v37 = vsel %vm1025_vm0, %v2339_v27, %v5717_v4  ;;  %v5740_v17 = vpop.permute.xlu0 %5739 }
 0x338   : > { %3671 = vmatprep.mubr.f32.mxu1 %v3103_v41  ;;  %v5726_v41 = vunpack.i.l.bf16 %v5725_v54  ;;  %v2410_v54 = vld [vmem:[#allocation2 + $0x188] sm:$0xff] }
 0x33a   : > { %v3110_v46 = vsel %vm1025_vm0, %v2406_v56, %v5726_v41 }
 0x33b   : > { %3672 = vmatmul.mubr.f32.gmra.mrb[68].mxu1 %v3071_v9  ;;  %v3077_v9 = vsel %vm1025_vm0, %v2340_v13, %v5722_v40  ;;  %v5750_v4 = vpop.permute.xlu0 %5749  ;;  %v5755_v40 = vpop.permute.xlu1 %5754 }
 0x33c   : > { %3676 = vmatprep.mubr.f32.mxu1 %v3104_v53  ;;  %v5731_v53 = vunpack.i.l.bf16 %v5730_v51  ;;  %v5751_v27 = vunpack.i.l.bf16 %v5750_v4  ;;  %v5752_v41 = vunpack.i.h.bf16 %v5750_v4  ;;  %v5756_v51 = vunpack.i.l.bf16 %v5755_v40 }
 0x33e   : > { %v3111_v22 = vsel %vm1025_vm0, %v2407_v34, %v5731_v53  ;;  %v3083_v56 = vsel %vm1025_vm0, %v7904_v55, %v5752_v41  ;;  %v2469_v55 = vld [vmem:[#allocation2 + $0x152] sm:$0xff]  ;;  %v2470_v34 = vld [vmem:[#allocation2 + $0x15a] sm:$0xff] }
 0x33f   : > { %3677 = vmatmul.mubr.f32.gmra.mrb[70].mxu1 %v3072_v39  ;;  %v3078_v39 = vsel %vm1025_vm0, %v2341_v43, %v5727_v6  ;;  %v2412_v6 = vld [vmem:[#allocation2 + $0x1a0] sm:$0xff]  ;;  %v2466_v43 = vld [vmem:[#allocation2 + $0x12a] sm:$0xff] }
 0x340   : > { %3681 = vmatprep.mubr.f32.mxu1 %v3105_v35  ;;  %v5736_v35 = vunpack.i.l.bf16 %v5735_v50  ;;  %v3116_v53 = vsel %vm1025_vm0, %v2412_v6, %v5756_v51 }
 0x342   : > { %v3112_v0 = vsel %vm1025_vm0, %v8028_v45, %v5736_v35  ;;  %v3114_v45 = vsel %vm1025_vm0, %v2410_v54, %v5746_v61  ;;  %v2475_v35 = vld [vmem:[#allocation2 + $0x19a] sm:$0xff] }
 0x343   : > { %3682 = vmatmul.mubr.f32.gmra.mrb[72].mxu1 %v3073_v48  ;;  %v5737_v48 = vunpack.i.h.bf16 %v5735_v50  ;;  %v2465_v50 = vld [vmem:[#allocation2 + $0x122] sm:$0xff] }
 0x344   : > { %3686 = vmatprep.mubr.f32.mxu1 %v3106_v15  ;;  %v5741_v15 = vunpack.i.l.bf16 %v5740_v17 }
 0x345   : > { %v3080_v3 = vsel %vm1025_vm0, %v2343_v52, %v5737_v48  ;;  %v4404_v52 = vld [vmem:[%s5933_s30 + $0x21] sm:$0xff] }
 0x347   : > { %3687 = vmatmul.mubr.f32.gmra.mrb[74].mxu1 %v3074_v16  ;;  %v5742_v16 = vunpack.i.h.bf16 %v5740_v17  ;;  %v8179_v17 = vld [vmem:[%s8389_s4] ss:$0 sm:$0xff] }
 0x348   : > { %3691 = vmatprep.mubr.f32.mxu1 %v3107_v31  ;;  %v2409_v31 = vld [vmem:[#allocation2 + $0x180] sm:$0xff] }
 0x349   : > { %v3113_v38 = vsel %vm1025_vm0, %v2409_v31, %v5741_v15 }
 0x34b   : > { %3692 = vmatmul.mubr.f32.gmra.mrb[76].mxu1 %v3075_v29  ;;  %v2344_v29 = vld [vmem:[#allocation2 + $0x169] sm:$0xff] }
 0x34c   : > { %3696 = vmatprep.mubr.f32.mxu1 %v3108_v20  ;;  %v3081_v20 = vsel %vm1025_vm0, %v2344_v29, %v5742_v16 }
 0x34f   : > { %3697 = vmatmul.mubr.f32.gmra.mrb[78].mxu1 %v3076_v37  ;;  %v2411_v37 = vld [vmem:[#allocation2 + $0x198] sm:$0xff] }
 0x350   : > { %3701 = vmatprep.mubr.f32.mxu1 %v3109_v59  ;;  %v3082_v59 = vsel %vm1025_vm0, %v2345_v42, %v5747_v44  ;;  %v3115_v13 = vsel %vm1025_vm0, %v2411_v37, %v5751_v27 }
 0x353   : > { %3702 = vmatmul.mubr.f32.gmra.mrb[80].mxu1 %v3077_v9  ;;  %v5757_v9 = vunpack.i.h.bf16 %v5755_v40 }
 0x354   : > { %3706 = vmatprep.mubr.f32.mxu1 %v3110_v46 }
 0x355   : > { %v3084_v46 = vsel %vm1025_vm0, %v7922_v14, %v5757_v9  ;;  %v2471_v14 = vld [vmem:[#allocation2 + $0x16a] sm:$0xff] }
 0x357   : > { %3707 = vmatmul.mubr.f32.gmra.mrb[82].mxu1 %v3078_v39  ;;  %v2468_v39 = vld [vmem:[#allocation2 + $0x142] sm:$0xff] }
 0x358   : > { %3711 = vmatprep.mubr.f32.mxu1 %v3111_v22  ;;  %v2476_v22 = vld [vmem:[#allocation2 + $0x1a2] sm:$0xff] }
 0x35b   : > { %3712 = vmatmul.mubr.f32.gmra.mrb[84].mxu1 %v3079_v18 }
 0x35c   : > { %3716 = vmatprep.mubr.f32.mxu1 %v3112_v0 }
 0x35f   : > { %3717 = vmatmul.mubr.f32.gmra.mrb[86].mxu1 %v3080_v3 }
 0x360   : > { %3721 = vmatprep.mubr.f32.mxu1 %v3113_v38  ;;  %v4405_v38 = vld [vmem:[%s5933_s30 + $0x31] sm:$0xff] }
 0x363   : > { %3722 = vmatmul.mubr.f32.gmra.mrb[88].mxu1 %v3081_v20 }
 0x364   : > { %3726 = vmatprep.mubr.f32.mxu1 %v3114_v45 }
 0x367   : > { %3727 = vmatmul.mubr.f32.gmra.mrb[90].mxu1 %v3082_v59 }
 0x368   : > { %3731 = vmatprep.mubr.f32.mxu1 %v3115_v13 }
 0x36b   : > { %3732 = vmatmul.mubr.f32.gmra.mrb[92].mxu1 %v3083_v56 }
 0x36c   : > { %3736 = vmatprep.mubr.f32.mxu1 %v3116_v53 }
 0x36f   : > { %3737 = vmatmul.mubr.f32.gmra.mrb[94].mxu1 %v3084_v46 }
 0x370   : > { %4631 = vmatprep.mubr.msk.f32.mxu1 %vm1025_vm0, %v2465_v50 }
 0x373   : > { %4632 = vmatmul.mubr.msk.f32.vlgmr.msra.gmra.mrb[96].mxu1 %vm1025_vm0, %v2466_v43 }
 0x374   : > { %4634 = vmatprep.mubr.msk.f32.mxu1 %vm1025_vm0, %v2467_v23 }
 0x377   : > { %4635 = vmatmul.mubr.msk.f32.gmra.mrb[98].mxu1 %vm1025_vm0, %v2468_v39 }
 0x378   : > { %4637 = vmatprep.mubr.msk.f32.mxu1 %vm1025_vm0, %v2469_v55 }
 0x37b   : > { %4638 = vmatmul.mubr.msk.f32.gmra.mrb[100].mxu1 %vm1025_vm0, %v2470_v34 }
 0x37c   : > { %4640 = vmatprep.mubr.msk.f32.mxu1 %vm1025_vm0, %v2471_v14 }
 0x37f   : > { %4641 = vmatmul.mubr.msk.f32.gmra.mrb[102].mxu1 %vm1025_vm0, %v7933_v10 }
 0x380   : > { %4643 = vmatprep.mubr.msk.f32.mxu1 %vm1025_vm0, %v7924_v12 }
 0x383   : > { %4644 = vmatmul.mubr.msk.f32.gmra.mrb[104].mxu1 %vm1025_vm0, %v7939_v21  ;;  %v4403_v21 = vld [vmem:[%s5933_s30 + $0x19] sm:$0xff] }
 0x384   : > { %4646 = vmatprep.mubr.msk.f32.mxu1 %vm1025_vm0, %v2475_v35 }
 0x387   : > { %4647 = vmatmul.mubr.msk.f32.gmra.mrb[106].mxu1 %vm1025_vm0, %v2476_v22 }
 0x3c6   : > { %v3583_v10 = vpop.f32.mrb[32].mxu1 }
 0x3c7   : > { %v4913_v12 = vadd.f32 %v8179_v17, %v3583_v10  ;;  %v3585_v7 = vpop.f32.mrb[33].mxu1 }
 0x3c9   : > { %v3809_v48 = vadd.f32 %v4913_v12, %v8000_v1 }
 0x3ca   : > { %v3588_v18 = vpop.f32.mrb[34].mxu1 }
 0x3cb   : > { %v3999_v15 = vadd.f32 %v4403_v21, %v3809_v48  ;;  %v4914_v0 = vadd.f32 %v8179_v17, %v3588_v18  ;;  %v3590_v19 = vpop.f32.mrb[35].mxu1 }
 0x3cd   : > { %4031 = vst.msk [vmem:[%s8188_s7] sm:$0xff] %vm1025_vm0, %v3999_v15  ;;  %v3814_v16 = vadd.f32 %v4914_v0, %v7998_v63  ;;  %v4406_v63 = vld [vmem:[%s5933_s30 + $0x39] sm:$0xff] }
 0x3ce   : > { %v3593_v3 = vpop.f32.mrb[36].mxu1 }
 0x3cf   : > { %v4000_v31 = vadd.f32 %v4404_v52, %v3814_v16  ;;  %v4915_v1 = vadd.f32 %v8179_v17, %v3593_v3  ;;  %v3595_v61 = vpop.f32.mrb[37].mxu1 }
 0x3d1   : > { %4032 = vst.msk [vmem:[%s8188_s7 + $0x8] sm:$0xff] %vm1025_vm0, %v4000_v31  ;;  %v3819_v4 = vadd.f32 %v4915_v1, %v8014_v25  ;;  %v4407_v25 = vld [vmem:[%s5933_s30 + $0x49] sm:$0xff] }
 0x3d2   : > { %v3598_v29 = vpop.f32.mrb[38].mxu1 }
 0x3d3   : > { %v4001_v44 = vadd.f32 %v4405_v38, %v3819_v4  ;;  %v4916_v20 = vadd.f32 %v8179_v17, %v3598_v29  ;;  %v3600_v54 = vpop.f32.mrb[39].mxu1 }
 0x3d5   : > { %4033 = vst.msk [vmem:[%s8188_s7 + $0x10] sm:$0xff] %vm1025_vm0, %v4001_v44  ;;  %v3824_v27 = vadd.f32 %v4916_v20, %v8012_v47  ;;  %v4408_v47 = vld [vmem:[%s5933_s30 + $0x51] sm:$0xff] }
 0x3d6   : > { %v3603_v45 = vpop.f32.mrb[40].mxu1 }
 0x3d7   : > { %v4002_v40 = vadd.f32 %v4406_v63, %v3824_v27  ;;  %v4917_v37 = vadd.f32 %v8179_v17, %v3603_v45  ;;  %v3605_v42 = vpop.f32.mrb[41].mxu1 }
 0x3d9   : > { %4034 = vst.msk [vmem:[%s8188_s7 + $0x18] sm:$0xff] %vm1025_vm0, %v4002_v40  ;;  %v3829_v41 = vadd.f32 %v4917_v37, %v8026_v28  ;;  %v4409_v28 = vld [vmem:[%s5933_s30 + $0x61] sm:$0xff] }
 0x3da   : > { %v3608_v59 = vpop.f32.mrb[42].mxu1 }
 0x3db   : > { %v4003_v51 = vadd.f32 %v4407_v25, %v3829_v41  ;;  %v4918_v13 = vadd.f32 %v8179_v17, %v3608_v59  ;;  %v3610_v6 = vpop.f32.mrb[43].mxu1 }
 0x3dd   : > { %4035 = vst.msk [vmem:[%s8188_s7 + $0x20] sm:$0xff] %vm1025_vm0, %v4003_v51  ;;  %v3834_v9 = vadd.f32 %v4918_v13, %v8024_v24  ;;  %v4410_v24 = vld [vmem:[%s5933_s30 + $0x69] sm:$0xff] }
 0x3de   : > { %v3613_v56 = vpop.f32.mrb[44].mxu1 }
 0x3df   : > { %v4004_v53 = vadd.f32 %v4408_v47, %v3834_v9  ;;  %v4919_v46 = vadd.f32 %v8179_v17, %v3613_v56  ;;  %v3615_v50 = vpop.f32.mrb[45].mxu1 }
 0x3e1   : > { %4036 = vst.msk [vmem:[%s8188_s7 + $0x28] sm:$0xff] %vm1025_vm0, %v4004_v53  ;;  %v3839_v43 = vadd.f32 %v4919_v46, %v8039_v8  ;;  %v4411_v8 = vld [vmem:[%s5933_s30 + $0x79] sm:$0xff] }
 0x3e2   : > { %v3618_v23 = vpop.f32.mrb[46].mxu1 }
 0x3e3   : > { %v4005_v39 = vadd.f32 %v4409_v28, %v3839_v43  ;;  %v4920_v55 = vadd.f32 %v8179_v17, %v3618_v23  ;;  %v3620_v34 = vpop.f32.mrb[47].mxu1 }
 0x3e5   : > { %4037 = vst.msk [vmem:[%s8188_s7 + $0x30] sm:$0xff] %vm1025_vm0, %v4005_v39  ;;  %v3844_v14 = vadd.f32 %v4920_v55, %v8036_v60  ;;  %v4412_v60 = vld [vmem:[%s5933_s30 + $0x81] sm:$0xff] }
 0x3e6   : > { %v3623_v35 = vpop.f32.mrb[48].mxu1 }
 0x3e7   : > { %v4006_v22 = vadd.f32 %v4410_v24, %v3844_v14  ;;  %v4921_v10 = vadd.f32 %v8179_v17, %v3623_v35  ;;  %v3625_v12 = vpop.f32.mrb[49].mxu1 }
 0x3e9   : > { %4038 = vst.msk [vmem:[%s8188_s7 + $0x38] sm:$0xff] %vm1025_vm0, %v4006_v22  ;;  %v3849_v7 = vadd.f32 %v4921_v10, %v8053_v30  ;;  %v4413_v30 = vld [vmem:[%s5933_s30 + $0x91] sm:$0xff] }
 0x3ea   : > { %v3628_v21 = vpop.f32.mrb[50].mxu1 }
 0x3eb   : > { %v4007_v48 = vadd.f32 %v4411_v8, %v3849_v7  ;;  %v4922_v18 = vadd.f32 %v8179_v17, %v3628_v21  ;;  %v3630_v15 = vpop.f32.mrb[51].mxu1  ;;  %v4421_v7 = vld [vmem:[%s5933_s30 + $0xf1] sm:$0xff] }
 0x3ed   : > { %4039 = vst.msk [vmem:[%s8188_s7 + $0x40] sm:$0xff] %vm1025_vm0, %v4007_v48  ;;  %v3854_v0 = vadd.f32 %v4922_v18, %v8050_v36  ;;  %v4414_v36 = vld [vmem:[%s5933_s30 + $0x99] sm:$0xff] }
 0x3ee   : > { %v3633_v19 = vpop.f32.mrb[52].mxu1 }
 0x3ef   : > { %v4008_v52 = vadd.f32 %v4412_v60, %v3854_v0  ;;  %v4923_v16 = vadd.f32 %v8179_v17, %v3633_v19  ;;  %v3635_v3 = vpop.f32.mrb[53].mxu1  ;;  %v4422_v60 = vld [vmem:[%s5933_s30 + $0xf9] sm:$0xff] }
 0x3f1   : > { %4040 = vst.msk [vmem:[%s8188_s7 + $0x48] sm:$0xff] %vm1025_vm0, %v4008_v52  ;;  %v3859_v31 = vadd.f32 %v4923_v16, %v8066_v11  ;;  %v4415_v11 = vld [vmem:[%s5933_s30 + $0xa9] sm:$0xff] }
 0x3f2   : > { %v3638_v1 = vpop.f32.mrb[54].mxu1 }
 0x3f3   : > { %v4009_v61 = vadd.f32 %v4413_v30, %v3859_v31  ;;  %v4924_v38 = vadd.f32 %v8179_v17, %v3638_v1  ;;  %v3640_v4 = vpop.f32.mrb[55].mxu1 }
 0x3f5   : > { %4041 = vst.msk [vmem:[%s8188_s7 + $0x50] sm:$0xff] %vm1025_vm0, %v4009_v61  ;;  %v3864_v29 = vadd.f32 %v4924_v38, %v8063_v2  ;;  %v4416_v2 = vld [vmem:[%s5933_s30 + $0xb1] sm:$0xff] }
 0x3f6   : > { %v3643_v44 = vpop.f32.mrb[56].mxu1 }
 0x3f7   : > { %v4010_v20 = vadd.f32 %v4414_v36, %v3864_v29  ;;  %v4925_v54 = vadd.f32 %v8179_v17, %v3643_v44  ;;  %v3645_v63 = vpop.f32.mrb[57].mxu1 }
 0x3f9   : > { %4042 = vst.msk [vmem:[%s8188_s7 + $0x58] sm:$0xff] %vm1025_vm0, %v4010_v20  ;;  %v3869_v27 = vadd.f32 %v4925_v54, %v8076_v26  ;;  %v4417_v26 = vld [vmem:[%s5933_s30 + $0xc1] sm:$0xff] }
 0x3fa   : > { %v3648_v45 = vpop.f32.mrb[58].mxu1 }
 0x3fb   : > { %v4011_v40 = vadd.f32 %v4415_v11, %v3869_v27  ;;  %v4926_v37 = vadd.f32 %v8179_v17, %v3648_v45  ;;  %v3650_v42 = vpop.f32.mrb[59].mxu1 }
 0x3fd   : > { %4043 = vst.msk [vmem:[%s8188_s7 + $0x60] sm:$0xff] %vm1025_vm0, %v4011_v40  ;;  %v3874_v25 = vadd.f32 %v4926_v37, %v8073_v32  ;;  %v4418_v32 = vld [vmem:[%s5933_s30 + $0xc9] sm:$0xff] }
 0x3fe   : > { %v3653_v41 = vpop.f32.mrb[60].mxu1 }
 0x3ff   : > { %v4012_v59 = vadd.f32 %v4416_v2, %v3874_v25  ;;  %v4927_v51 = vadd.f32 %v8179_v17, %v3653_v41  ;;  %v3655_v13 = vpop.f32.mrb[61].mxu1 }
 0x401   : > { %4044 = vst.msk [vmem:[%s8188_s7 + $0x68] sm:$0xff] %vm1025_vm0, %v4012_v59  ;;  %v3879_v6 = vadd.f32 %v4927_v51, %v8086_v5  ;;  %v4419_v5 = vld [vmem:[%s5933_s30 + $0xd9] sm:$0xff]  ;;  %v4424_v59 = vld [vmem:[%s5933_s30 + $0x111] sm:$0xff] }
 0x402   : > { %v3658_v47 = vpop.f32.mrb[62].mxu1 }
 0x403   : > { %v4013_v9 = vadd.f32 %v4417_v26, %v3879_v6  ;;  %v4928_v56 = vadd.f32 %v8179_v17, %v3658_v47  ;;  %v3660_v53 = vpop.f32.mrb[63].mxu1  ;;  %v4423_v26 = vld [vmem:[%s5933_s30 + $0x109] sm:$0xff] }
 0x405   : > { %4045 = vst.msk [vmem:[%s8188_s7 + $0x70] sm:$0xff] %vm1025_vm0, %v4013_v9  ;;  %v3884_v46 = vadd.f32 %v4928_v56, %v8083_v33  ;;  %v4420_v33 = vld [vmem:[%s5933_s30 + $0xe1] sm:$0xff] }
 0x406   : > { %v3663_v50 = vpop.f32.mrb[64].mxu1 }
 0x407   : > { %v4014_v28 = vadd.f32 %v4418_v32, %v3884_v46  ;;  %v4929_v43 = vadd.f32 %v8179_v17, %v3663_v50  ;;  %v3665_v23 = vpop.f32.mrb[65].mxu1  ;;  %v4426_v46 = vld [vmem:[%s5933_s30 + $0x129] sm:$0xff] }
 0x409   : > { %4046 = vst.msk [vmem:[%s8188_s7 + $0x78] sm:$0xff] %vm1025_vm0, %v4014_v28  ;;  %v3889_v39 = vadd.f32 %v4929_v43, %v8096_v49  ;;  %v4425_v43 = vld [vmem:[%s5933_s30 + $0x121] sm:$0xff] }
 0x40a   : > { %v3668_v55 = vpop.f32.mrb[66].mxu1 }
 0x40b   : > { %v4015_v34 = vadd.f32 %v4419_v5, %v3889_v39  ;;  %v4930_v24 = vadd.f32 %v8179_v17, %v3668_v55  ;;  %v3670_v14 = vpop.f32.mrb[67].mxu1 }
 0x40c   : > { %v4428_v14 = vld [vmem:[%s5933_s30 + $0x141] sm:$0xff] }
 0x40d   : > { %4047 = vst.msk [vmem:[%s8188_s7 + $0x80] sm:$0xff] %vm1025_vm0, %v4015_v34  ;;  %v3894_v35 = vadd.f32 %v4930_v24, %v8093_v62 }
 0x40e   : > { %v3673_v22 = vpop.f32.mrb[68].mxu1 }
 0x40f   : > { %v4016_v10 = vadd.f32 %v4420_v33, %v3894_v35  ;;  %v4931_v12 = vadd.f32 %v8179_v17, %v3673_v22  ;;  %v3675_v8 = vpop.f32.mrb[69].mxu1  ;;  %v4427_v22 = vld [vmem:[%s5933_s30 + $0x139] sm:$0xff] }
 0x411   : > { %4048 = vst.msk [vmem:[%s8188_s7 + $0x88] sm:$0xff] %vm1025_vm0, %v4016_v10  ;;  %v3899_v49 = vadd.f32 %v4931_v12, %v8106_v57 }
 0x412   : > { %v3678_v21 = vpop.f32.mrb[70].mxu1 }
 0x413   : > { %v4017_v48 = vadd.f32 %v4421_v7, %v3899_v49  ;;  %v4932_v18 = vadd.f32 %v8179_v17, %v3678_v21  ;;  %v3680_v15 = vpop.f32.mrb[71].mxu1 }
 0x415   : > { %4049 = vst.msk [vmem:[%s8188_s7 + $0x90] sm:$0xff] %vm1025_vm0, %v4017_v48  ;;  %v3904_v62 = vadd.f32 %v4932_v18, %v8103_v58  ;;  %v4430_v48 = vld [vmem:[%s5933_s30 + $0x159] sm:$0xff] }
 0x416   : > { %v3683_v0 = vpop.f32.mrb[72].mxu1 }
 0x417   : > { %v4018_v19 = vadd.f32 %v4422_v60, %v3904_v62  ;;  %v3685_v52 = vpop.f32.mrb[73].mxu1  ;;  %v4933_v25 = vadd.f32 %v8179_v17, %v3683_v0  ;;  %v4429_v60 = vld [vmem:[%s5933_s30 + $0x151] sm:$0xff] }
 0x419   : > { %4050 = vst.msk [vmem:[%s8188_s7 + $0x98] sm:$0xff] %vm1025_vm0, %v4018_v19 }
 0x41a   : > { %v3688_v16 = vpop.f32.mrb[74].mxu1 }
 0x41b   : > { %v3690_v3 = vpop.f32.mrb[75].mxu1  ;;  %v4934_v2 = vadd.f32 %v8179_v17, %v3688_v16 }
 0x41e   : > { %v3693_v30 = vpop.f32.mrb[76].mxu1 }
 0x41f   : > { %v3695_v31 = vpop.f32.mrb[77].mxu1  ;;  %v4935_v56 = vadd.f32 %v8179_v17, %v3693_v30  ;;  %v4432_v30 = vld [vmem:[%s5933_s30 + $0x171] sm:$0xff] }
 0x422   : > { %v3698_v57 = vpop.f32.mrb[78].mxu1 }
 0x423   : > { %v3700_v1 = vpop.f32.mrb[79].mxu1  ;;  %v4936_v47 = vadd.f32 %v8179_v17, %v3698_v57 }
 0x424   : > { %v4431_v1 = vld [vmem:[%s5933_s30 + $0x169] sm:$0xff] }
 0x426   : > { %v3703_v61 = vpop.f32.mrb[80].mxu1 }
 0x427   : > { %v3705_v38 = vpop.f32.mrb[81].mxu1  ;;  %v4937_v55 = vadd.f32 %v8179_v17, %v3703_v61 }
 0x42a   : > { %v3708_v4 = vpop.f32.mrb[82].mxu1 }
 0x42b   : > { %v3710_v36 = vpop.f32.mrb[83].mxu1  ;;  %v4938_v5 = vadd.f32 %v8179_v17, %v3708_v4 }
 0x42e   : > { %v3713_v29 = vpop.f32.mrb[84].mxu1 }
 0x42f   : > { %v3715_v44 = vpop.f32.mrb[85].mxu1  ;;  %v4939_v7 = vadd.f32 %v8179_v17, %v3713_v29 }
 0x432   : > { %v3718_v20 = vpop.f32.mrb[86].mxu1 }
 0x433   : > { %v3720_v58 = vpop.f32.mrb[87].mxu1  ;;  %v4940_v12 = vadd.f32 %v8179_v17, %v3718_v20  ;;  %v4434_v20 = vld [vmem:[%s5933_s30 + $0x189] sm:$0xff] }
 0x436   : > { %v3723_v54 = vpop.f32.mrb[88].mxu1 }
 0x437   : > { %v3725_v63 = vpop.f32.mrb[89].mxu1  ;;  %v4941_v52 = vadd.f32 %v8179_v17, %v3723_v54 }
 0x438   : > { %v4433_v63 = vld [vmem:[%s5933_s30 + $0x181] sm:$0xff]  ;;  %s5760_s30 = scalar_lea.vmem %s8336_s9, 4096 }
 0x439   : > { %p5761_p11 = scmp.ne.s32.totalorder %s8336_s9, %s5760_s30  ;;  %p5768_p1 = scmp.lt.s32.totalorder %s5766_s16, %s5760_s30 }
 0x43a   : > { %v3728_v11 = vpop.f32.mrb[90].mxu1 }
 0x43b   : > { %v3730_v27 = vpop.f32.mrb[91].mxu1  ;;  %v4942_v0 = vadd.f32 %v8179_v17, %v3728_v11  ;;  %p5762_p12 = pnand %p5761_p11, %p5898_p5  ;;  %p5769_p2 = por %p5768_p1, %p5767_p0 }
 0x43d   : > { %p5763_p13 = pneg %p5762_p12 }
 0x43e   : > { %v3733_v45 = vpop.f32.mrb[92].mxu1 }
 0x43f   : > { %v3735_v40 = vpop.f32.mrb[93].mxu1  ;;  %v4943_v36 = vadd.f32 %v8179_v17, %v3733_v45  ;;  %p5770_p3 = pnand %p5769_p2, %p5763_p13 }
 0x442   : > { %v3738_v37 = vpop.f32.mrb[94].mxu1 }
 0x443   : > { %v3740_v42 = vpop.f32.mrb[95].mxu1  ;;  %v4944_v38 = vadd.f32 %v8179_v17, %v3738_v37 }
 0x446   : > { %v4633_v41 = vpop.f32.mrb[96].mxu1 }
 0x447   : > { %v3914_v51 = vadd.f32 %v4934_v2, %v4633_v41  ;;  %v3908_v13 = vpop.f32.mrb[97].mxu1 }
 0x448   : > { %v3909_v6 = vadd.f32 %v4933_v25, %v3908_v13 }
 0x449   : > { %v4020_v9 = vadd.f32 %v4424_v59, %v3914_v51 }
 0x44a   : > { %v4019_v53 = vadd.f32 %v4423_v26, %v3909_v6  ;;  %v4636_v32 = vpop.f32.mrb[98].mxu1 }
 0x44b   : > { %4052 = vst.msk [vmem:[%s8188_s7 + $0xa8] sm:$0xff] %vm1025_vm0, %v4020_v9  ;;  %v3924_v50 = vadd.f32 %v4936_v47, %v4636_v32  ;;  %v3918_v28 = vpop.f32.mrb[99].mxu1 }
 0x44c   : > { %4051 = vst.msk [vmem:[%s8188_s7 + $0xa0] sm:$0xff] %vm1025_vm0, %v4019_v53  ;;  %v3919_v23 = vadd.f32 %v4935_v56, %v3918_v28 }
 0x44d   : > { %v4022_v39 = vadd.f32 %v4426_v46, %v3924_v50 }
 0x44e   : > { %v4021_v34 = vadd.f32 %v4425_v43, %v3919_v23  ;;  %v4639_v24 = vpop.f32.mrb[100].mxu1 }
 0x44f   : > { %4054 = vst.msk [vmem:[%s8188_s7 + $0xb8] sm:$0xff] %vm1025_vm0, %v4022_v39  ;;  %v3934_v33 = vadd.f32 %v4938_v5, %v4639_v24  ;;  %v3928_v35 = vpop.f32.mrb[101].mxu1 }
 0x450   : > { %4053 = vst.msk [vmem:[%s8188_s7 + $0xb0] sm:$0xff] %vm1025_vm0, %v4021_v34  ;;  %v3929_v10 = vadd.f32 %v4937_v55, %v3928_v35 }
 0x451   : > { %v4024_v8 = vadd.f32 %v4428_v14, %v3934_v33 }
 0x452   : > { %v4023_v49 = vadd.f32 %v4427_v22, %v3929_v10  ;;  %v4642_v21 = vpop.f32.mrb[102].mxu1 }
 0x453   : > { %4056 = vst.msk [vmem:[%s8188_s7 + $0xc8] sm:$0xff] %vm1025_vm0, %v4024_v8  ;;  %v3944_v18 = vadd.f32 %v4940_v12, %v4642_v21  ;;  %v3938_v15 = vpop.f32.mrb[103].mxu1 }
 0x454   : > { %4055 = vst.msk [vmem:[%s8188_s7 + $0xc0] sm:$0xff] %vm1025_vm0, %v4023_v49  ;;  %v3939_v62 = vadd.f32 %v4939_v7, %v3938_v15 }
 0x455   : > { %v4026_v19 = vadd.f32 %v4430_v48, %v3944_v18 }
 0x456   : > { %v4025_v16 = vadd.f32 %v4429_v60, %v3939_v62  ;;  %v4645_v3 = vpop.f32.mrb[104].mxu1 }
 0x457   : > { %4058 = vst.msk [vmem:[%s8188_s7 + $0xd8] sm:$0xff] %vm1025_vm0, %v4026_v19  ;;  %v3954_v31 = vadd.f32 %v4942_v0, %v4645_v3  ;;  %v3948_v57 = vpop.f32.mrb[105].mxu1 }
 0x458   : > { %4057 = vst.msk [vmem:[%s8188_s7 + $0xd0] sm:$0xff] %vm1025_vm0, %v4025_v16  ;;  %v3949_v61 = vadd.f32 %v4941_v52, %v3948_v57 }
 0x459   : > { %v4028_v4 = vadd.f32 %v4432_v30, %v3954_v31 }
 0x45a   : > { %v4027_v29 = vadd.f32 %v4431_v1, %v3949_v61  ;;  %v4648_v44 = vpop.f32.mrb[106].mxu1 }
 0x45b   : > { %4060 = vst.msk [vmem:[%s8188_s7 + $0xe8] sm:$0xff] %vm1025_vm0, %v4028_v4  ;;  %v3964_v58 = vadd.f32 %v4944_v38, %v4648_v44  ;;  %v3958_v54 = vpop.f32.mrb[107].mxu1 }
 0x45c   : > { %4059 = vst.msk [vmem:[%s8188_s7 + $0xe0] sm:$0xff] %vm1025_vm0, %v4027_v29  ;;  %v3959_v11 = vadd.f32 %v4943_v36, %v3958_v54 }
 0x45d   : > { %v4030_v27 = vadd.f32 %v4434_v20, %v3964_v58 }
 0x45e   : > { %v4029_v17 = vadd.f32 %v4433_v63, %v3959_v11 }
 0x45f   : > { %4062 = vst.msk [vmem:[%s8188_s7 + $0xf8] sm:$0xff] %vm1025_vm0, %v4030_v27 }
 0x460   : > { %4061 = vst.msk [vmem:[%s8188_s7 + $0xf0] sm:$0xff] %vm1025_vm0, %v4029_v17 }
 0x461   : > { %5773 = shalt.err (!%p5770_p3)
}
 0x462   : > { %s5774_s17 = scalar_lea.hbm %s8334_s13, 4096  ;;  %s5778_s25 = scalar_lea.hbm %s8390_s5, 8192 }
 0x463   : > { %p5775_p4 = scmp.ne.s32.totalorder %s8334_s13, %s5774_s17  ;;  %p5779_p9 = scmp.lt.u32.totalorder %s8334_s13, %s8390_s5 }
 0x464   : > { %p5780_p10 = scmp.lt.u32.totalorder %s5778_s25, %s5774_s17  ;;  %p5782_p12 = scmp.lt.u32.totalorder %s5774_s17, %s8334_s13 }
 0x465   : > { %p5776_p7 = pnand %p5775_p4, %p5898_p5 }
 0x466   : > { %p5781_p11 = por %p5780_p10, %p5779_p9 }
 0x467   : > { %p5777_p8 = pneg %p5776_p7 }
 0x468   : > { %p5783_p13 = por %p5782_p12, %p5781_p11 }
 0x46a   : > { %p5784_p0 = pnand %p5783_p13, %p5777_p8 }
 0x46c   : > { %5787 = shalt.err (!%p5784_p0)
}
 0x46d   : > { %s5828_s7 = smov 128   ;;  %s5829_s8 = smov 8  }
 0x46e   : > { %5074 = dma.vmem_to_hbm [thread:$0]  (%p5898_p5), %s8336_s9, 4096, %s8334_s13, %s8344_s22, %s5828_s7, %s5828_s7, %s5829_s8  }
 0x46f PF: > { %p5080_p1 = scmp.ge.s32.totalorder %s5822_s21, 2  ;;  %s4092_s11 = sand.u32 1, %s5810_s18  }
 0x470   : > { %s4093_s12 = scalar_lea.sflag [#allocation4], %s4092_s11 }
 0x471   : > { %p5077_p2 = pnand %p5080_p1, %p5902_p6 }
 0x473   : > { %5805 = dma.done.wait (!%p5077_p2), %s4093_s12, 4096  }
 0x474   : > { %5807 = vsyncadd (!%p5077_p2), %s4093_s12, 4294963200  ;;  %p15_p3 = scmp.ge.s32.totalorder %s5885_s24, 4   ;;  %s8501_s18 = smov %s5814_s19 }
 0x475   : > { %s8502_s19 = smov %s5818_s20  ;;  %s8503_s20 = smov %s5896_s27 }
 0x476   : > { %s8504_s21 = smov %s5885_s24  ;;  %17 = sbr.rel (!%p15_p3) target bundleno = 3 (0x3), region = 79 }
 0x47d   :  { %4098 = vsyncpa [#allocation4], 1 }
 0x47e   :  { %4100 = vsyncpa [#allocation4 + $0x1], 1 }

</bundles_post_ra>
